<compile_context>
chip_gen: v7x
topology: tpu7x:2x2x1
jax: 0.10.0
libtpu: 0.0.40
codegen_flags: <defaults>
</compile_context>

<pallas_src>
import functools
import math

import jax
import jax.numpy as jnp
from jax.experimental import pallas as pl
from jax.experimental.pallas import tpu as pltpu

MATMUL_DTYPE = jnp.bfloat16          # MXU operands / activation storage
K_TILE_MAX = 2048                    # bounds resident weight+x VMEM on v7x


def _round_up(x, m):
    return (x + m - 1) // m * m


def _cdiv(a, b):
    return (a + b - 1) // b


def _balanced_tile(m, max_tile, align):
    """Row tile so that padding never exceeds ~align rows per tile."""
    m = max(int(m), 1)
    tiles = _cdiv(m, max_tile)
    return _round_up(_cdiv(m, tiles), align)


def _default_vmem_limit():
    # ~96 MiB on 128-MiB parts (v5e/v6e), ~48 MiB on v7x (64 MiB physical).
    try:
        cap = int(pltpu.get_tpu_info().vmem_capacity_bytes)
        return min((cap * 3) // 4, 96 * 1024 * 1024)
    except Exception:
        return 32 * 1024 * 1024


_VMEM_LIMIT = _default_vmem_limit()


# ----------------------------------------------------------------------------
# Weight preparation (runs ONCE, outside the jitted forward)
# ----------------------------------------------------------------------------

def prepare_linear(wbs, k_pad=None, k_tile_max=K_TILE_MAX):
    """Concatenate several (w, b) sharing the same input along N, pad N to a
    lane-dense multiple of 128, pad/tile K, cast to bf16."""
    K = int(wbs[0][0].shape[0])
    K_in = int(k_pad) if k_pad is not None else K
    Ns = [int(w.shape[1]) for w, _ in wbs]
    N = sum(Ns)
    Np = _round_up(N, 128)
    if K_in <= k_tile_max:
        Kp = _round_up(K_in, 16)
        TK = Kp
    else:
        nk = _cdiv(K_in, k_tile_max)
        TK = _round_up(_cdiv(K_in, nk), 128)
        Kp = TK * nk
    w_cat = jnp.concatenate([jnp.asarray(w, jnp.float32) for w, _ in wbs], axis=1)
    b_cat = jnp.concatenate([jnp.asarray(b, jnp.float32) for _, b in wbs], axis=0)
    wp = jnp.pad(w_cat, ((0, Kp - K), (0, Np - N))).astype(MATMUL_DTYPE)
    bp = jnp.pad(b_cat, (0, Np - N)).reshape(1, Np)
    return dict(w=wp, b=bp, K_in=K_in, Kp=Kp, TK=TK, N=N, Np=Np, Ns=tuple(Ns))


def prepare_fc6(w, b, C, Cpad, P):
    """Re-order fc6 rows from torch (C,P,P)-major flatten to NHWC (P,P,Cpad)."""
    w = jnp.asarray(w, jnp.float32).reshape(C, P, P, -1).transpose(1, 2, 0, 3)
    w = jnp.pad(w, ((0, 0), (0, 0), (0, Cpad - C), (0, 0)))
    w = w.reshape(P * P * Cpad, -1)
    return prepare_linear([(w, b)])


def prepare_conv(wbs, cin_pad=None):
    """Per-tap weight tensors for the 3x3 conv kernel.  Each group's Cout is
    padded to a multiple of 128 so it can be emitted as its own lane-dense
    output of the fused kernel."""
    Cin = int(wbs[0][0].shape[1])
    kh = int(wbs[0][0].shape[2])
    kw = int(wbs[0][0].shape[3])
    Cinp = int(cin_pad) if cin_pad is not None else Cin
    group_n = [int(w.shape[0]) for w, _ in wbs]
    group_np = [_round_up(n, 128) for n in group_n]
    Np = sum(group_np)
    w_full = jnp.zeros((kh * kw, Cinp, Np), jnp.float32)
    b_full = jnp.zeros((1, Np), jnp.float32)
    off = 0
    for (w, b), n, npad in zip(wbs, group_n, group_np):
        wt = jnp.asarray(w, jnp.float32).transpose(2, 3, 1, 0).reshape(kh * kw, Cin, n)
        w_full = w_full.at[:, :Cin, off:off + n].set(wt)
        b_full = b_full.at[0, off:off + n].set(jnp.asarray(b, jnp.float32))
        off += npad
    return dict(w=w_full.astype(MATMUL_DTYPE), b=b_full, kh=kh, kw=kw,
                cinp=Cinp, group_np=tuple(group_np), Np=Np)


# ----------------------------------------------------------------------------
# Fused linear kernel: (M, N, K) grid, f32 accumulator, bias + optional ReLU
# ----------------------------------------------------------------------------

def _mm_kernel(x_ref, w_ref, b_ref, o_ref, acc_ref, *, act):
    @pl.when(pl.program_id(2) == 0)
    def _():
        acc_ref[...] = jnp.zeros_like(acc_ref)

    acc_ref[...] += jnp.dot(x_ref[...], w_ref[...],
                            preferred_element_type=jnp.float32)

    @pl.when(pl.program_id(2) == pl.num_programs(2) - 1)
    def _():
        out = acc_ref[...] + b_ref[...]
        if act == "relu":
            out = jnp.maximum(out, 0.0)
        o_ref[...] = out.astype(o_ref.dtype)


def pallas_linear_prepared(x, prep, act=None, out_dtype=jnp.float32,
                           tm=512, tn=512, keep_padded=False):
    M, Kx = x.shape
    Kp, Np, TK = prep["Kp"], prep["Np"], prep["TK"]
    assert Kx <= Kp
    TM = _balanced_tile(M, tm, 16)
    Mp = _round_up(M, TM)
    ncols = Np // 128
    ntn = max(1, min(ncols, _cdiv(Np, tn)))
    while ncols % ntn:
        ntn -= 1
    TN = (ncols // ntn) * 128
    nk = Kp // TK

    xp = x.astype(MATMUL_DTYPE)
    if Mp != M or Kp != Kx:
        xp = jnp.pad(xp, ((0, Mp - M), (0, Kp - Kx)))

    out_isz = jnp.dtype(out_dtype).itemsize
    bytes_accessed = int(Mp * Kp * 2 + Kp * Np * 2 + Np * 4 + Mp * Np * out_isz)
    out = pl.pallas_call(
        functools.partial(_mm_kernel, act=act),
        out_shape=jax.ShapeDtypeStruct((Mp, Np), out_dtype),
        grid=(Mp // TM, ntn, nk),
        in_specs=[
            pl.BlockSpec((TM, TK), lambda i, j, k: (i, k)),
            pl.BlockSpec((TK, TN), lambda i, j, k: (k, j)),
            pl.BlockSpec((1, TN), lambda i, j, k: (0, j)),
        ],
        out_specs=pl.BlockSpec((TM, TN), lambda i, j, k: (i, j)),
        scratch_shapes=[pltpu.VMEM((TM, TN), jnp.float32)],
        compiler_params=pltpu.CompilerParams(
            dimension_semantics=("parallel", "parallel", "arbitrary"),
            vmem_limit_bytes=_VMEM_LIMIT),
        cost_estimate=pl.CostEstimate(
            flops=int(2 * Mp * Kp * Np), transcendentals=0,
            bytes_accessed=bytes_accessed),
    )(xp, prep["w"], prep["b"])

    if keep_padded:
        return out                      # (Mp, Np); padded rows/cols flow onward
    outs, off = [], 0
    for n in prep["Ns"]:
        outs.append(out[:M, off:off + n])
        off += n
    return outs


# ----------------------------------------------------------------------------
# FastRCNN predictor head: fused cls+bbox matmul with softmax epilogue
# ----------------------------------------------------------------------------

def _det_head_kernel(x_ref, w_ref, b_ref, o_ref, s_ref, acc_ref, *, nc):
    @pl.when(pl.program_id(1) == 0)
    def _():
        acc_ref[...] = jnp.zeros_like(acc_ref)

    acc_ref[...] += jnp.dot(x_ref[...], w_ref[...],
                            preferred_element_type=jnp.float32)

    @pl.when(pl.program_id(1) == pl.num_programs(1) - 1)
    def _():
        out = acc_ref[...] + b_ref[...]
        o_ref[...] = out
        nc_pad = s_ref.shape[-1]
        logits = out[:, :nc_pad]
        col = jax.lax.broadcasted_iota(jnp.int32, logits.shape, 1)
        masked = jnp.where(col < nc, logits, -jnp.inf)
        m = jnp.max(masked, axis=-1, keepdims=True)
        e = jnp.exp(masked - m)
        s_ref[...] = e * pl.reciprocal(jnp.sum(e, axis=-1, keepdims=True),
                                       approx=True)


def pallas_det_head(feat, prep, num_classes, tm=512):
    M, Kx = feat.shape
    Kp, Np, TK = prep["Kp"], prep["Np"], prep["TK"]
    Nc, Nb = prep["Ns"]
    Nc_pad = _round_up(Nc, 128)
    TM = _balanced_tile(M, tm, 16)
    Mp = _round_up(M, TM)
    nk = Kp // TK

    xp = feat.astype(MATMUL_DTYPE)
    if Mp != M or Kp != Kx:
        xp = jnp.pad(xp, ((0, Mp - M), (0, Kp - Kx)))

    bytes_accessed = int(Mp * Kp * 2 + Kp * Np * 2 + Np * 4
                         + Mp * (Np + Nc_pad) * 4)
    logits, scores = pl.pallas_call(
        functools.partial(_det_head_kernel, nc=Nc),
        out_shape=(jax.ShapeDtypeStruct((Mp, Np), jnp.float32),
                   jax.ShapeDtypeStruct((Mp, Nc_pad), jnp.float32)),
        grid=(Mp // TM, nk),
        in_specs=[
            pl.BlockSpec((TM, TK), lambda i, k: (i, k)),
            pl.BlockSpec((TK, Np), lambda i, k: (k, 0)),
            pl.BlockSpec((1, Np), lambda i, k: (0, 0)),
        ],
        out_specs=(pl.BlockSpec((TM, Np), lambda i, k: (i, 0)),
                   pl.BlockSpec((TM, Nc_pad), lambda i, k: (i, 0))),
        scratch_shapes=[pltpu.VMEM((TM, Np), jnp.float32)],
        compiler_params=pltpu.CompilerParams(
            dimension_semantics=("parallel", "arbitrary"),
            vmem_limit_bytes=_VMEM_LIMIT),
        cost_estimate=pl.CostEstimate(
            flops=int(2 * Mp * Kp * Np), transcendentals=int(Mp * Nc_pad),
            bytes_accessed=bytes_accessed),
    )(xp, prep["w"], prep["b"])

    class_logits = logits[:M, :Nc]
    box_regression = logits[:M, Nc:Nc + Nb]
    pred_scores = scores[:M, :Nc]
    return class_logits, box_regression, pred_scores


# ----------------------------------------------------------------------------
# 3x3 conv (NHWC, in-kernel tap accumulation, no im2col)
# ----------------------------------------------------------------------------

def _conv3x3_kernel(x_ref, w_ref, b_ref, *o_refs, kh, kw, stride, hn, act, slabs):
    # x_ref : (1, n_planes*hn, Wn, Cin)   (stride==1 -> single plane)
    # o_refs: one (1, Ho, Wo, Npg) ref per fused conv group
    Ho = o_refs[0].shape[1]
    Wo = o_refs[0].shape[2]
    bias = b_ref[...]                               # (1, Np_total)
    s = stride

    def row_body(oh, carry):
        acc = jnp.zeros((Wo, bias.shape[1]), jnp.float32)
        for t in range(kh * kw):
            di, dj = t // kw, t % kw
            plane = (di % s) * s + (dj % s)
            row = plane * hn + oh + di // s
            win = x_ref[0, row, pl.ds(dj // s, Wo), :]          # (Wo, Cin)
            acc = acc + jnp.dot(win, w_ref[t],
                                preferred_element_type=jnp.float32)
        out = acc + bias
        if act == "relu":
            out = jnp.maximum(out, 0.0)
        off = 0
        for g, npad in enumerate(slabs):
            o_refs[g][0, oh] = out[:, off:off + npad].astype(o_refs[g].dtype)
            off += npad
        return carry

    jax.lax.fori_loop(0, Ho, row_body, 0, unroll=False)


def pallas_conv3x3(x, prep, *, stride=1, padding=1, act="relu",
                   out_dtype=MATMUL_DTYPE):
    """x: (B, H, W, C) NHWC.  Returns one channel-padded NHWC map per group."""
    kh, kw = prep["kh"], prep["kw"]
    Cinp, Np = prep["cinp"], prep["Np"]
    x = x.astype(MATMUL_DTYPE)
    B, H, W, Cx = x.shape
    if Cx < Cinp:
        x = jnp.pad(x, ((0, 0), (0, 0), (0, 0), (0, Cinp - Cx)))
    Ho = (H + 2 * padding - kh) // stride + 1
    Wo = (W + 2 * padding - kw) // stride + 1
    xp = jnp.pad(x, ((0, 0), (padding, padding), (padding, padding), (0, 0)))

    s = stride
    if s == 1:
        planes = xp
        Hn, Wn = xp.shape[1], xp.shape[2]
        n_planes = 1
    else:
        # Parity split: every tap becomes a contiguous (non-strided) window.
        Hn = Ho + (kh - 1) // s
        Wn = Wo + (kw - 1) // s
        plist = []
        for pi in range(s):
            for pj in range(s):
                pln = xp[:, pi::s, pj::s, :][:, :Hn, :Wn, :]
                pad_h, pad_w = Hn - pln.shape[1], Wn - pln.shape[2]
                if pad_h or pad_w:
                    pln = jnp.pad(pln, ((0, 0), (0, pad_h), (0, pad_w), (0, 0)))
                plist.append(pln)
        planes = jnp.stack(plist, axis=1).reshape(B, s * s * Hn, Wn, Cinp)
        n_planes = s * s

    group_np = prep["group_np"]
    out_shapes = tuple(jax.ShapeDtypeStruct((B, Ho, Wo, npad), out_dtype)
                       for npad in group_np)
    out_specs = tuple(pl.BlockSpec((1, Ho, Wo, npad), lambda b: (b, 0, 0, 0))
                      for npad in group_np)
    in_specs = [
        pl.BlockSpec((1, n_planes * Hn, Wn, Cinp), lambda b: (b, 0, 0, 0)),
        pl.BlockSpec((kh * kw, Cinp, Np), lambda b: (0, 0, 0)),
        pl.BlockSpec((1, Np), lambda b: (0, 0)),
    ]
    out_isz = jnp.dtype(out_dtype).itemsize
    bytes_accessed = int(planes.size * 2 + prep["w"].size * 2 + Np * 4
                         + B * Ho * Wo * Np * out_isz)
    # TODO(synk): for very large feature maps add an H-tiling grid axis (manual
    # overlapping-window DMA) so the padded image does not have to be fully
    # VMEM-resident per batch element.
    outs = pl.pallas_call(
        functools.partial(_conv3x3_kernel, kh=kh, kw=kw, stride=s, hn=Hn,
                          act=act, slabs=group_np),
        out_shape=out_shapes,
        grid=(B,),
        in_specs=in_specs,
        out_specs=out_specs,
        compiler_params=pltpu.CompilerParams(
            dimension_semantics=("parallel",),
            vmem_limit_bytes=_VMEM_LIMIT),
        cost_estimate=pl.CostEstimate(
            flops=int(2 * B * Ho * Wo * kh * kw * Cinp * Np),
            transcendentals=0, bytes_accessed=bytes_accessed),
    )(planes, prep["w"], prep["b"])
    return list(outs)


# ----------------------------------------------------------------------------
# Box decode kernel (torchvision BoxCoder.decode_single) with fused clipping
# ----------------------------------------------------------------------------

def _decode_kernel(rel_ref, box_ref, o_ref, *, wx, wy, ww, wh, clamp,
                   clip_h, clip_w):
    rel = rel_ref[...]                          # (4, Np)
    boxes = box_ref[...]                        # (4, Np)
    widths = boxes[2:3] - boxes[0:1]
    heights = boxes[3:4] - boxes[1:2]
    ctr_x = boxes[0:1] + 0.5 * widths
    ctr_y = boxes[1:2] + 0.5 * heights
    dx = rel[0:1] * (1.0 / wx)
    dy = rel[1:2] * (1.0 / wy)
    dw = jnp.minimum(rel[2:3] * (1.0 / ww), clamp)
    dh = jnp.minimum(rel[3:4] * (1.0 / wh), clamp)
    pcx = dx * widths + ctr_x
    pcy = dy * heights + ctr_y
    pw = jnp.exp(dw) * widths
    ph = jnp.exp(dh) * heights
    x1 = pcx - 0.5 * pw
    y1 = pcy - 0.5 * ph
    x2 = pcx + 0.5 * pw
    y2 = pcy + 0.5 * ph
    if clip_w is not None:
        x1 = jnp.clip(x1, 0.0, clip_w)
        x2 = jnp.clip(x2, 0.0, clip_w)
        y1 = jnp.clip(y1, 0.0, clip_h)
        y2 = jnp.clip(y2, 0.0, clip_h)
    o_ref[...] = jnp.concatenate([x1, y1, x2, y2], axis=0)


def pallas_box_decode(rel, boxes, weights, clip_hw=None):
    """rel, boxes: (N, 4) -> decoded (and optionally clipped) (N, 4)."""
    N = rel.shape[0]
    Np = _round_up(max(int(N), 1), 128)
    relT = jnp.pad(rel.astype(jnp.float32).T, ((0, 0), (0, Np - N)))
    boxT = jnp.pad(boxes.astype(jnp.float32).T, ((0, 0), (0, Np - N)))
    wx, wy, ww, wh = (float(w) for w in weights)
    clamp = math.log(1000.0 / 16.0)
    clip_h = float(clip_hw[0]) if clip_hw is not None else None
    clip_w = float(clip_hw[1]) if clip_hw is not None else None
    out = pl.pallas_call(
        functools.partial(_decode_kernel, wx=wx, wy=wy, ww=ww, wh=wh,
                          clamp=clamp, clip_h=clip_h, clip_w=clip_w),
        out_shape=jax.ShapeDtypeStruct((4, Np), jnp.float32),
        grid=(1,),
        in_specs=[pl.BlockSpec((4, Np), lambda i: (0, 0)),
                  pl.BlockSpec((4, Np), lambda i: (0, 0))],
        out_specs=pl.BlockSpec((4, Np), lambda i: (0, 0)),
        compiler_params=pltpu.CompilerParams(vmem_limit_bytes=_VMEM_LIMIT),
    )(relT, boxT)
    return out[:, :N].T


# ----------------------------------------------------------------------------
# Anchors (glue, pure arithmetic)
# ----------------------------------------------------------------------------

def generate_anchors(sizes, aspect_ratios, feat_h, feat_w, stride_h, stride_w):
    scales = jnp.asarray(sizes, jnp.float32)
    ratios = jnp.asarray(aspect_ratios, jnp.float32)
    h_ratios = jnp.sqrt(ratios)
    w_ratios = 1.0 / h_ratios
    ws = (w_ratios[:, None] * scales[None, :]).reshape(-1)
    hs = (h_ratios[:, None] * scales[None, :]).reshape(-1)
    base = jnp.round(jnp.stack([-ws, -hs, ws, hs], axis=1) / 2.0)
    shifts_x = jnp.arange(feat_w, dtype=jnp.float32) * stride_w
    shifts_y = jnp.arange(feat_h, dtype=jnp.float32) * stride_h
    sy, sx = jnp.meshgrid(shifts_y, shifts_x, indexing="ij")
    sx = sx.reshape(-1)
    sy = sy.reshape(-1)
    shifts = jnp.stack([sx, sy, sx, sy], axis=1)
    return (shifts[:, None, :] + base[None, :, :]).reshape(-1, 4)   # (H*W*A, 4)


# ----------------------------------------------------------------------------
# RoIAlign (NHWC, sampling_ratio=2, aligned=False) -- plain JAX gather
# ----------------------------------------------------------------------------
# TODO(synk): data-dependent bilinear gather would need a PrefetchScalarGridSpec
# DMA-gather Pallas kernel; plain JAX (channels-last, so contiguous C reads).

def roi_align_nhwc(feat, rois, spatial_scale, output_size, sampling_ratio):
    H, W, C = feat.shape
    P, sr = output_size, sampling_ratio
    x1 = rois[:, 0] * spatial_scale
    y1 = rois[:, 1] * spatial_scale
    x2 = rois[:, 2] * spatial_scale
    y2 = rois[:, 3] * spatial_scale
    roi_w = jnp.maximum(x2 - x1, 1.0)
    roi_h = jnp.maximum(y2 - y1, 1.0)
    bin_w = roi_w / P
    bin_h = roi_h / P
    grid = (jnp.arange(P, dtype=jnp.float32)[:, None]
            + (jnp.arange(sr, dtype=jnp.float32)[None, :] + 0.5) / sr).reshape(-1)
    ys = y1[:, None] + grid[None, :] * bin_h[:, None]     # (R, S)
    xs = x1[:, None] + grid[None, :] * bin_w[:, None]

    valid_y = (ys >= -1.0) & (ys <= H)
    valid_x = (xs >= -1.0) & (xs <= W)
    yc = jnp.clip(ys, 0.0, H - 1.0)
    xc = jnp.clip(xs, 0.0, W - 1.0)
    y0 = jnp.floor(yc).astype(jnp.int32)
    x0 = jnp.floor(xc).astype(jnp.int32)
    y1i = jnp.minimum(y0 + 1, H - 1)
    x1i = jnp.minimum(x0 + 1, W - 1)
    ly = yc - y0
    lx = xc - x0
    hy = 1.0 - ly
    hx = 1.0 - lx

    Y0, Y1 = y0[:, :, None], y1i[:, :, None]
    X0, X1 = x0[:, None, :], x1i[:, None, :]
    f00 = feat[Y0, X0]                                     # (R, S, S, C)
    f01 = feat[Y0, X1]
    f10 = feat[Y1, X0]
    f11 = feat[Y1, X1]
    LY, HY = ly[:, :, None, None], hy[:, :, None, None]
    LX, HX = lx[:, None, :, None], hx[:, None, :, None]
    val = HY * HX * f00 + HY * LX * f01 + LY * HX * f10 + LY * LX * f11
    mask = (valid_y[:, :, None] & valid_x[:, None, :]).astype(jnp.float32)
    val = val * mask[..., None]                            # (R, S, S, C) f32
    R = rois.shape[0]
    val = val.reshape(R, P, sr, P, sr, C).mean(axis=(2, 4))
    return val                                             # (R, P, P, C)


# ----------------------------------------------------------------------------
# Model pieces
# ----------------------------------------------------------------------------

def rpn_forward(prep, det_feat, image_size, anchors, post_nms_top_n, A):
    B, Hf, Wf, _ = det_feat.shape
    x = pallas_conv3x3(det_feat, prep["rpn_conv"], stride=1, padding=1,
                       act="relu", out_dtype=MATMUL_DTYPE)[0]     # (B,Hf,Wf,Cdp)
    xf = x.reshape(B * Hf * Wf, -1)                 # NHWC flatten: no transpose
    obj, deltas = pallas_linear_prepared(
        xf, prep["rpn_head"], act=None, out_dtype=jnp.float32)
    obj = obj.reshape(B, Hf * Wf * A)               # (h, w, a) like torchvision
    deltas = deltas.reshape(B * Hf * Wf * A, 4)

    anchors_rep = jnp.tile(anchors, (B, 1))
    dec = pallas_box_decode(deltas, anchors_rep, (1.0, 1.0, 1.0, 1.0),
                            clip_hw=image_size)
    dec = dec.reshape(B, Hf * Wf * A, 4)
    # TODO(synk): RPN NMS / min-size / score-threshold filtering (data-dependent
    # control flow) not implemented; per-image top-k by objectness instead.
    _, top_idx = jax.lax.top_k(obj, post_nms_top_n)                  # (B, k)
    props = jnp.take_along_axis(dec, top_idx[..., None], axis=1)     # (B, k, 4)
    return props


def roi_heads_forward(prep, det_feat, rec_feat, proposals, image_size, cfg):
    B, k = proposals.shape[0], proposals.shape[1]
    P = cfg["roi_output_size"]
    scale = cfg["spatial_scale"]
    num_classes = cfg["num_classes"]

    # Batched RoIAlign (single fused gather graph across the batch).
    pool = lambda f, r: roi_align_nhwc(f, r, scale, P, 2)
    pooled_det = jax.vmap(pool)(det_feat, proposals)        # (B, k, P, P, Cdp)
    pooled_rec = jax.vmap(pool)(rec_feat, proposals)        # (B, k, P, P, Crp)
    R = B * k
    xd = pooled_det.reshape(R, -1)
    xr = pooled_rec.reshape(R, -1)

    # TwoMLPHead (detect / recog); bf16 activations, padded rows/cols flow on.
    fd = pallas_linear_prepared(xd, prep["fc6_det"], act="relu",
                                out_dtype=MATMUL_DTYPE, keep_padded=True)
    fd = pallas_linear_prepared(fd, prep["fc7_det"], act="relu",
                                out_dtype=MATMUL_DTYPE, keep_padded=True)
    fr = pallas_linear_prepared(xr, prep["fc6_rec"], act="relu",
                                out_dtype=MATMUL_DTYPE, keep_padded=True)
    fr = pallas_linear_prepared(fr, prep["fc7_rec"], act="relu",
                                out_dtype=MATMUL_DTYPE, keep_padded=True)

    class_logits, box_regression, pred_scores = pallas_det_head(
        fd, prep["det_head"], num_classes)
    class_logits = class_logits[:R]
    box_regression = box_regression[:R]
    pred_scores = pred_scores[:R]
    id_embeddings = pallas_linear_prepared(
        fr, prep["id_head"], act=None, out_dtype=jnp.float32)[0][:R]

    # postprocess_detections (no NMS / score threshold in RoIHeadsWithID).
    all_props = proposals.reshape(R, 4)
    rel = box_regression.reshape(R * num_classes, 4)
    props_rep = jnp.repeat(all_props, num_classes, axis=0)
    pred_boxes = pallas_box_decode(rel, props_rep, (10.0, 10.0, 5.0, 5.0),
                                   clip_hw=image_size)
    pred_boxes = pred_boxes.reshape(B, k, num_classes, 4)
    pred_scores = pred_scores.reshape(B, k, num_classes)
    id_embeddings = id_embeddings.reshape(B, k, -1)

    labels = jnp.broadcast_to(jnp.arange(num_classes)[None, :], (k, num_classes))
    roi_idxs = jnp.broadcast_to(jnp.arange(k)[:, None], (k, num_classes))
    results = []
    for b in range(B):
        results.append({
            "boxes": pred_boxes[b, :, 1:, :],        # drop background class
            "labels": labels[:, 1:],
            "scores": pred_scores[b, :, 1:],
            "id_embeddings": id_embeddings[b],
            "roi_idxs": roi_idxs[:, 1:],
            "proposals": proposals[b],
        })
    # TODO(synk): training losses (fastrcnn_loss, recog_loss_fn) not implemented;
    # inference path (targets=None) returns empty loss dict like PyTorch module.
    return results, {}


def joint_rcnn_forward(prep, images, cfg):
    """Inference forward: images (B,3,H,W) NCHW -> (losses, detections)."""
    B, _, H_img, W_img = images.shape
    x = jnp.transpose(images, (0, 2, 3, 1))         # one-time NCHW -> NHWC

    # Backbone: detect + recog convs fused in one kernel (single input DMA,
    # two channel-padded bf16 NHWC outputs).
    det_feat, rec_feat = pallas_conv3x3(
        x, prep["backbone"], stride=2, padding=1, act="relu",
        out_dtype=MATMUL_DTYPE)

    Hf, Wf = det_feat.shape[1], det_feat.shape[2]
    anchors = generate_anchors(cfg["anchor_sizes"][0], cfg["aspect_ratios"],
                               Hf, Wf, H_img // Hf, W_img // Wf)
    proposals = rpn_forward(prep, det_feat, (H_img, W_img), anchors,
                            cfg["post_nms_top_n"], cfg["num_anchors"])

    detections, detector_losses = roi_heads_forward(
        prep, det_feat, rec_feat, proposals, (H_img, W_img), cfg)

    losses = {}
    losses.update(detector_losses)   # proposal_losses = {} at inference
    return losses, detections


# ----------------------------------------------------------------------------
# Parameters (torch-layout) + one-time prep into padded bf16 kernel operands
# ----------------------------------------------------------------------------

def init_params(key, cfg):
    Cd = cfg["detect_out_channels"]
    Cr = cfg["recog_out_channels"]
    A = cfg["num_anchors"]
    P = cfg["roi_output_size"]
    Hc = cfg["box_head_out_channels"]
    E = cfg["id_embedding_size"]
    NC = cfg["num_classes"]
    names_shapes = [
        ("bb_det_w", (Cd, 3, 3, 3)), ("bb_det_b", (Cd,)),
        ("bb_rec_w", (Cr, 3, 3, 3)), ("bb_rec_b", (Cr,)),
        ("rpn_conv_w", (Cd, Cd, 3, 3)), ("rpn_conv_b", (Cd,)),
        ("rpn_cls_w", (Cd, A)), ("rpn_cls_b", (A,)),
        ("rpn_bbox_w", (Cd, A * 4)), ("rpn_bbox_b", (A * 4,)),
        ("fc6_det_w", (Cd * P * P, Hc)), ("fc6_det_b", (Hc,)),
        ("fc7_det_w", (Hc, Hc)), ("fc7_det_b", (Hc,)),
        ("fc6_rec_w", (Cr * P * P, Hc)), ("fc6_rec_b", (Hc,)),
        ("fc7_rec_w", (Hc, Hc)), ("fc7_rec_b", (Hc,)),
        ("cls_w", (Hc, NC)), ("cls_b", (NC,)),
        ("bbox_w", (Hc, NC * 4)), ("bbox_b", (NC * 4,)),
        ("id_w", (Hc, E)), ("id_b", (E,)),
    ]
    keys = jax.random.split(key, len(names_shapes))
    params = {}
    for (name, shape), k in zip(names_shapes, keys):
        if name.endswith("_b"):
            params[name] = jnp.zeros(shape, jnp.float32)
        else:
            params[name] = 0.05 * jax.random.normal(k, shape, dtype=jnp.float32)
    return params


def prepare_model_params(params, cfg):
    """Runs once, outside the jitted forward: concat / pad / cast all weights."""
    Cd = cfg["detect_out_channels"]
    Cr = cfg["recog_out_channels"]
    Cdp = _round_up(Cd, 128)
    Crp = _round_up(Cr, 128)
    Hc = cfg["box_head_out_channels"]
    Hcp = _round_up(Hc, 128)
    P = cfg["roi_output_size"]
    prep = {}
    prep["backbone"] = prepare_conv(
        [(params["bb_det_w"], params["bb_det_b"]),
         (params["bb_rec_w"], params["bb_rec_b"])], cin_pad=_round_up(3, 8))
    prep["rpn_conv"] = prepare_conv(
        [(params["rpn_conv_w"], params["rpn_conv_b"])], cin_pad=Cdp)
    prep["rpn_head"] = prepare_linear(
        [(params["rpn_cls_w"], params["rpn_cls_b"]),
         (params["rpn_bbox_w"], params["rpn_bbox_b"])], k_pad=Cdp)
    prep["fc6_det"] = prepare_fc6(params["fc6_det_w"], params["fc6_det_b"], Cd, Cdp, P)
    prep["fc6_rec"] = prepare_fc6(params["fc6_rec_w"], params["fc6_rec_b"], Cr, Crp, P)
    prep["fc7_det"] = prepare_linear([(params["fc7_det_w"], params["fc7_det_b"])], k_pad=Hcp)
    prep["fc7_rec"] = prepare_linear([(params["fc7_rec_w"], params["fc7_rec_b"])], k_pad=Hcp)
    prep["det_head"] = prepare_linear(
        [(params["cls_w"], params["cls_b"]),
         (params["bbox_w"], params["bbox_b"])], k_pad=Hcp)
    prep["id_head"] = prepare_linear([(params["id_w"], params["id_b"])], k_pad=Hcp)
    return prep


# ----------------------------------------------------------------------------
# Main
# ----------------------------------------------------------------------------

if __name__ == "__main__":
    cfg = dict(
        detect_out_channels=16,
        recog_out_channels=16,
        roi_output_size=4,
        box_head_out_channels=64,
        id_embedding_size=32,
        num_classes=2,
        anchor_sizes=((16, 32),),
        aspect_ratios=(0.5, 1.0, 2.0),
        post_nms_top_n=16,        # rpn_post_nms_top_n_test (small)
        spatial_scale=0.5,        # feature map is image/2
    )
    cfg["num_anchors"] = len(cfg["anchor_sizes"][0]) * len(cfg["aspect_ratios"])

    key = jax.random.PRNGKey(0)
    pkey, ikey = jax.random.split(key)
    params = init_params(pkey, cfg)
    prep = prepare_model_params(params, cfg)      # one-time weight prep, un-jitted
    images = jax.random.normal(ikey, (2, 3, 32, 32), dtype=jnp.float32)

    forward = jax.jit(lambda imgs: joint_rcnn_forward(prep, imgs, cfg))
    losses, detections = forward(images)
    jax.block_until_ready((losses, detections))

    # sanity on output shapes
    assert len(detections) == 2
    assert detections[0]["boxes"].shape == (cfg["post_nms_top_n"], 1, 4)
    assert detections[0]["scores"].shape == (cfg["post_nms_top_n"], 1)
    assert detections[0]["id_embeddings"].shape == (cfg["post_nms_top_n"],
                                                    cfg["id_embedding_size"])
    print("KERNEL_OK")
</pallas_src>

<mosaic_0001>
module attributes {stable_mosaic.version = 11 : i64} {
  func.func @_conv3x3_kernel(%arg0: i32, %arg1: memref<1x68x17x8xbf16, #tpu.memory_space<vmem>>, %arg2: memref<9x8x256xbf16, #tpu.memory_space<vmem>>, %arg3: memref<1x256xf32, #tpu.memory_space<vmem>>, %arg4: memref<1x16x16x128xbf16, #tpu.memory_space<vmem>>, %arg5: memref<1x16x16x128xbf16, #tpu.memory_space<vmem>>) attributes {dimension_semantics = [#tpu.dimension_semantics<parallel>], iteration_bounds = array<i64: 2>, scalar_prefetch = 0 : i64, scratch_operands = 0 : i64, tpu.core_type = #tpu.core_type<tc>, window_params = [{transform_indices = @transform_0, window_bounds = array<i64: 1, 68, 17, 8>}, {pipeline_mode = #tpu.pipeline_mode<synchronous>, transform_indices = @transform_1, window_bounds = array<i64: 9, 8, 256>}, {pipeline_mode = #tpu.pipeline_mode<synchronous>, transform_indices = @transform_2, window_bounds = array<i64: 1, 256>}, {transform_indices = @transform_3, window_bounds = array<i64: 1, 16, 16, 128>}, {transform_indices = @transform_4, window_bounds = array<i64: 1, 16, 16, 128>}]} {
    %c0 = arith.constant 0 : index
    %c0_0 = arith.constant 0 : index
    %0 = vector.load %arg3[%c0, %c0_0] : memref<1x256xf32, #tpu.memory_space<vmem>>, vector<1x256xf32>
    %c0_i32 = arith.constant 0 : i32
    %c16_i32 = arith.constant 16 : i32
    %1 = arith.addi %c0_i32, %c16_i32 : i32
    %c1_i32 = arith.constant 1 : i32
    scf.for %arg6 = %c0_i32 to %1 step %c1_i32  : i32 {
      %cst = arith.constant 0.000000e+00 : f32
      %2 = vector.broadcast %cst : f32 to vector<16x256xf32>
      %c0_i32_2 = arith.constant 0 : i32
      %3 = arith.addi %c0_i32_2, %arg6 : i32
      %c0_i32_3 = arith.constant 0 : i32
      %4 = arith.addi %3, %c0_i32_3 : i32
      %c0_4 = arith.constant 0 : index
      %5 = arith.index_cast %4 : i32 to index
      %c0_5 = arith.constant 0 : index
      %c0_6 = arith.constant 0 : index
      %6 = vector.load %arg1[%c0_4, %5, %c0_5, %c0_6] : memref<1x68x17x8xbf16, #tpu.memory_space<vmem>>, vector<1x1x16x8xbf16>
      %7 = vector.shape_cast %6 : vector<1x1x16x8xbf16> to vector<16x8xbf16>
      %c0_7 = arith.constant 0 : index
      %c0_8 = arith.constant 0 : index
      %c0_9 = arith.constant 0 : index
      %8 = vector.load %arg2[%c0_7, %c0_8, %c0_9] : memref<9x8x256xbf16, #tpu.memory_space<vmem>>, vector<1x8x256xbf16>
      %9 = vector.shape_cast %8 : vector<1x8x256xbf16> to vector<8x256xbf16>
      %cst_10 = arith.constant dense<0.000000e+00> : vector<16x256xf32>
      %10 = tpu.matmul %7, %9, %cst_10 {dimension_numbers = #tpu.dot_dimension_numbers<[1], [0], [0], [1], [0, 0, 1, 1], [], []>} : vector<16x8xbf16>, vector<8x256xbf16>, vector<16x256xf32> -> vector<16x256xf32>
      %11 = arith.addf %2, %10 : vector<16x256xf32>
      %c17_i32 = arith.constant 17 : i32
      %12 = arith.addi %c17_i32, %arg6 : i32
      %c0_i32_11 = arith.constant 0 : i32
      %13 = arith.addi %12, %c0_i32_11 : i32
      %c0_12 = arith.constant 0 : index
      %14 = arith.index_cast %13 : i32 to index
      %c0_13 = arith.constant 0 : index
      %c0_14 = arith.constant 0 : index
      %15 = vector.load %arg1[%c0_12, %14, %c0_13, %c0_14] : memref<1x68x17x8xbf16, #tpu.memory_space<vmem>>, vector<1x1x16x8xbf16>
      %16 = vector.shape_cast %15 : vector<1x1x16x8xbf16> to vector<16x8xbf16>
      %c1 = arith.constant 1 : index
      %c0_15 = arith.constant 0 : index
      %c0_16 = arith.constant 0 : index
      %17 = vector.load %arg2[%c1, %c0_15, %c0_16] : memref<9x8x256xbf16, #tpu.memory_space<vmem>>, vector<1x8x256xbf16>
      %18 = vector.shape_cast %17 : vector<1x8x256xbf16> to vector<8x256xbf16>
      %cst_17 = arith.constant dense<0.000000e+00> : vector<16x256xf32>
      %19 = tpu.matmul %16, %18, %cst_17 {dimension_numbers = #tpu.dot_dimension_numbers<[1], [0], [0], [1], [0, 0, 1, 1], [], []>} : vector<16x8xbf16>, vector<8x256xbf16>, vector<16x256xf32> -> vector<16x256xf32>
      %20 = arith.addf %11, %19 : vector<16x256xf32>
      %c0_i32_18 = arith.constant 0 : i32
      %21 = arith.addi %c0_i32_18, %arg6 : i32
      %c0_i32_19 = arith.constant 0 : i32
      %22 = arith.addi %21, %c0_i32_19 : i32
      %c0_20 = arith.constant 0 : index
      %23 = arith.index_cast %22 : i32 to index
      %c1_21 = arith.constant 1 : index
      %c0_22 = arith.constant 0 : index
      %24 = vector.load %arg1[%c0_20, %23, %c1_21, %c0_22] : memref<1x68x17x8xbf16, #tpu.memory_space<vmem>>, vector<1x1x16x8xbf16>
      %25 = vector.shape_cast %24 : vector<1x1x16x8xbf16> to vector<16x8xbf16>
      %c2 = arith.constant 2 : index
      %c0_23 = arith.constant 0 : index
      %c0_24 = arith.constant 0 : index
      %26 = vector.load %arg2[%c2, %c0_23, %c0_24] : memref<9x8x256xbf16, #tpu.memory_space<vmem>>, vector<1x8x256xbf16>
      %27 = vector.shape_cast %26 : vector<1x8x256xbf16> to vector<8x256xbf16>
      %cst_25 = arith.constant dense<0.000000e+00> : vector<16x256xf32>
      %28 = tpu.matmul %25, %27, %cst_25 {dimension_numbers = #tpu.dot_dimension_numbers<[1], [0], [0], [1], [0, 0, 1, 1], [], []>} : vector<16x8xbf16>, vector<8x256xbf16>, vector<16x256xf32> -> vector<16x256xf32>
      %29 = arith.addf %20, %28 : vector<16x256xf32>
      %c34_i32 = arith.constant 34 : i32
      %30 = arith.addi %c34_i32, %arg6 : i32
      %c0_i32_26 = arith.constant 0 : i32
      %31 = arith.addi %30, %c0_i32_26 : i32
      %c0_27 = arith.constant 0 : index
      %32 = arith.index_cast %31 : i32 to index
      %c0_28 = arith.constant 0 : index
      %c0_29 = arith.constant 0 : index
      %33 = vector.load %arg1[%c0_27, %32, %c0_28, %c0_29] : memref<1x68x17x8xbf16, #tpu.memory_space<vmem>>, vector<1x1x16x8xbf16>
      %34 = vector.shape_cast %33 : vector<1x1x16x8xbf16> to vector<16x8xbf16>
      %c3 = arith.constant 3 : index
      %c0_30 = arith.constant 0 : index
      %c0_31 = arith.constant 0 : index
      %35 = vector.load %arg2[%c3, %c0_30, %c0_31] : memref<9x8x256xbf16, #tpu.memory_space<vmem>>, vector<1x8x256xbf16>
      %36 = vector.shape_cast %35 : vector<1x8x256xbf16> to vector<8x256xbf16>
      %cst_32 = arith.constant dense<0.000000e+00> : vector<16x256xf32>
      %37 = tpu.matmul %34, %36, %cst_32 {dimension_numbers = #tpu.dot_dimension_numbers<[1], [0], [0], [1], [0, 0, 1, 1], [], []>} : vector<16x8xbf16>, vector<8x256xbf16>, vector<16x256xf32> -> vector<16x256xf32>
      %38 = arith.addf %29, %37 : vector<16x256xf32>
      %c51_i32 = arith.constant 51 : i32
      %39 = arith.addi %c51_i32, %arg6 : i32
      %c0_i32_33 = arith.constant 0 : i32
      %40 = arith.addi %39, %c0_i32_33 : i32
      %c0_34 = arith.constant 0 : index
      %41 = arith.index_cast %40 : i32 to index
      %c0_35 = arith.constant 0 : index
      %c0_36 = arith.constant 0 : index
      %42 = vector.load %arg1[%c0_34, %41, %c0_35, %c0_36] : memref<1x68x17x8xbf16, #tpu.memory_space<vmem>>, vector<1x1x16x8xbf16>
      %43 = vector.shape_cast %42 : vector<1x1x16x8xbf16> to vector<16x8xbf16>
      %c4 = arith.constant 4 : index
      %c0_37 = arith.constant 0 : index
      %c0_38 = arith.constant 0 : index
      %44 = vector.load %arg2[%c4, %c0_37, %c0_38] : memref<9x8x256xbf16, #tpu.memory_space<vmem>>, vector<1x8x256xbf16>
      %45 = vector.shape_cast %44 : vector<1x8x256xbf16> to vector<8x256xbf16>
      %cst_39 = arith.constant dense<0.000000e+00> : vector<16x256xf32>
      %46 = tpu.matmul %43, %45, %cst_39 {dimension_numbers = #tpu.dot_dimension_numbers<[1], [0], [0], [1], [0, 0, 1, 1], [], []>} : vector<16x8xbf16>, vector<8x256xbf16>, vector<16x256xf32> -> vector<16x256xf32>
      %47 = arith.addf %38, %46 : vector<16x256xf32>
      %c34_i32_40 = arith.constant 34 : i32
      %48 = arith.addi %c34_i32_40, %arg6 : i32
      %c0_i32_41 = arith.constant 0 : i32
      %49 = arith.addi %48, %c0_i32_41 : i32
      %c0_42 = arith.constant 0 : index
      %50 = arith.index_cast %49 : i32 to index
      %c1_43 = arith.constant 1 : index
      %c0_44 = arith.constant 0 : index
      %51 = vector.load %arg1[%c0_42, %50, %c1_43, %c0_44] : memref<1x68x17x8xbf16, #tpu.memory_space<vmem>>, vector<1x1x16x8xbf16>
      %52 = vector.shape_cast %51 : vector<1x1x16x8xbf16> to vector<16x8xbf16>
      %c5 = arith.constant 5 : index
      %c0_45 = arith.constant 0 : index
      %c0_46 = arith.constant 0 : index
      %53 = vector.load %arg2[%c5, %c0_45, %c0_46] : memref<9x8x256xbf16, #tpu.memory_space<vmem>>, vector<1x8x256xbf16>
      %54 = vector.shape_cast %53 : vector<1x8x256xbf16> to vector<8x256xbf16>
      %cst_47 = arith.constant dense<0.000000e+00> : vector<16x256xf32>
      %55 = tpu.matmul %52, %54, %cst_47 {dimension_numbers = #tpu.dot_dimension_numbers<[1], [0], [0], [1], [0, 0, 1, 1], [], []>} : vector<16x8xbf16>, vector<8x256xbf16>, vector<16x256xf32> -> vector<16x256xf32>
      %56 = arith.addf %47, %55 : vector<16x256xf32>
      %c0_i32_48 = arith.constant 0 : i32
      %57 = arith.addi %c0_i32_48, %arg6 : i32
      %c1_i32_49 = arith.constant 1 : i32
      %58 = arith.addi %57, %c1_i32_49 : i32
      %c0_50 = arith.constant 0 : index
      %59 = arith.index_cast %58 : i32 to index
      %c0_51 = arith.constant 0 : index
      %c0_52 = arith.constant 0 : index
      %60 = vector.load %arg1[%c0_50, %59, %c0_51, %c0_52] : memref<1x68x17x8xbf16, #tpu.memory_space<vmem>>, vector<1x1x16x8xbf16>
      %61 = vector.shape_cast %60 : vector<1x1x16x8xbf16> to vector<16x8xbf16>
      %c6 = arith.constant 6 : index
      %c0_53 = arith.constant 0 : index
      %c0_54 = arith.constant 0 : index
      %62 = vector.load %arg2[%c6, %c0_53, %c0_54] : memref<9x8x256xbf16, #tpu.memory_space<vmem>>, vector<1x8x256xbf16>
      %63 = vector.shape_cast %62 : vector<1x8x256xbf16> to vector<8x256xbf16>
      %cst_55 = arith.constant dense<0.000000e+00> : vector<16x256xf32>
      %64 = tpu.matmul %61, %63, %cst_55 {dimension_numbers = #tpu.dot_dimension_numbers<[1], [0], [0], [1], [0, 0, 1, 1], [], []>} : vector<16x8xbf16>, vector<8x256xbf16>, vector<16x256xf32> -> vector<16x256xf32>
      %65 = arith.addf %56, %64 : vector<16x256xf32>
      %c17_i32_56 = arith.constant 17 : i32
      %66 = arith.addi %c17_i32_56, %arg6 : i32
      %c1_i32_57 = arith.constant 1 : i32
      %67 = arith.addi %66, %c1_i32_57 : i32
      %c0_58 = arith.constant 0 : index
      %68 = arith.index_cast %67 : i32 to index
      %c0_59 = arith.constant 0 : index
      %c0_60 = arith.constant 0 : index
      %69 = vector.load %arg1[%c0_58, %68, %c0_59, %c0_60] : memref<1x68x17x8xbf16, #tpu.memory_space<vmem>>, vector<1x1x16x8xbf16>
      %70 = vector.shape_cast %69 : vector<1x1x16x8xbf16> to vector<16x8xbf16>
      %c7 = arith.constant 7 : index
      %c0_61 = arith.constant 0 : index
      %c0_62 = arith.constant 0 : index
      %71 = vector.load %arg2[%c7, %c0_61, %c0_62] : memref<9x8x256xbf16, #tpu.memory_space<vmem>>, vector<1x8x256xbf16>
      %72 = vector.shape_cast %71 : vector<1x8x256xbf16> to vector<8x256xbf16>
      %cst_63 = arith.constant dense<0.000000e+00> : vector<16x256xf32>
      %73 = tpu.matmul %70, %72, %cst_63 {dimension_numbers = #tpu.dot_dimension_numbers<[1], [0], [0], [1], [0, 0, 1, 1], [], []>} : vector<16x8xbf16>, vector<8x256xbf16>, vector<16x256xf32> -> vector<16x256xf32>
      %74 = arith.addf %65, %73 : vector<16x256xf32>
      %c0_i32_64 = arith.constant 0 : i32
      %75 = arith.addi %c0_i32_64, %arg6 : i32
      %c1_i32_65 = arith.constant 1 : i32
      %76 = arith.addi %75, %c1_i32_65 : i32
      %c0_66 = arith.constant 0 : index
      %77 = arith.index_cast %76 : i32 to index
      %c1_67 = arith.constant 1 : index
      %c0_68 = arith.constant 0 : index
      %78 = vector.load %arg1[%c0_66, %77, %c1_67, %c0_68] : memref<1x68x17x8xbf16, #tpu.memory_space<vmem>>, vector<1x1x16x8xbf16>
      %79 = vector.shape_cast %78 : vector<1x1x16x8xbf16> to vector<16x8xbf16>
      %c8 = arith.constant 8 : index
      %c0_69 = arith.constant 0 : index
      %c0_70 = arith.constant 0 : index
      %80 = vector.load %arg2[%c8, %c0_69, %c0_70] : memref<9x8x256xbf16, #tpu.memory_space<vmem>>, vector<1x8x256xbf16>
      %81 = vector.shape_cast %80 : vector<1x8x256xbf16> to vector<8x256xbf16>
      %cst_71 = arith.constant dense<0.000000e+00> : vector<16x256xf32>
      %82 = tpu.matmul %79, %81, %cst_71 {dimension_numbers = #tpu.dot_dimension_numbers<[1], [0], [0], [1], [0, 0, 1, 1], [], []>} : vector<16x8xbf16>, vector<8x256xbf16>, vector<16x256xf32> -> vector<16x256xf32>
      %83 = arith.addf %74, %82 : vector<16x256xf32>
      %84 = vector.broadcast %0 : vector<1x256xf32> to vector<16x256xf32>
      %85 = arith.addf %83, %84 : vector<16x256xf32>
      %cst_72 = arith.constant 0.000000e+00 : f32
      %86 = vector.broadcast %cst_72 : f32 to vector<16x256xf32>
      %87 = arith.maximumf %85, %86 : vector<16x256xf32>
      %88 = vector.extract_strided_slice %87 {offsets = [0, 0], sizes = [16, 128], strides = [1, 1]} : vector<16x256xf32> to vector<16x128xf32>
      %89 = arith.truncf %88 : vector<16x128xf32> to vector<16x128xbf16>
      %c0_73 = arith.constant 0 : index
      %90 = arith.index_cast %arg6 : i32 to index
      %c0_74 = arith.constant 0 : index
      %c0_75 = arith.constant 0 : index
      %91 = vector.load %arg4[%c0_73, %90, %c0_74, %c0_75] : memref<1x16x16x128xbf16, #tpu.memory_space<vmem>>, vector<1x1x16x128xbf16>
      %92 = vector.shape_cast %91 : vector<1x1x16x128xbf16> to vector<16x128xbf16>
      %93 = vector.shape_cast %89 : vector<16x128xbf16> to vector<1x1x16x128xbf16>
      tpu.vector_store %arg4[%c0_73, %90, %c0_74, %c0_75], %93 {strides = array<i32>} : memref<1x16x16x128xbf16, #tpu.memory_space<vmem>>, vector<1x1x16x128xbf16>,
      %94 = vector.extract_strided_slice %87 {offsets = [0, 128], sizes = [16, 128], strides = [1, 1]} : vector<16x256xf32> to vector<16x128xf32>
      %95 = arith.truncf %94 : vector<16x128xf32> to vector<16x128xbf16>
      %c0_76 = arith.constant 0 : index
      %96 = arith.index_cast %arg6 : i32 to index
      %c0_77 = arith.constant 0 : index
      %c0_78 = arith.constant 0 : index
      %97 = vector.load %arg5[%c0_76, %96, %c0_77, %c0_78] : memref<1x16x16x128xbf16, #tpu.memory_space<vmem>>, vector<1x1x16x128xbf16>
      %98 = vector.shape_cast %97 : vector<1x1x16x128xbf16> to vector<16x128xbf16>
      %99 = vector.shape_cast %95 : vector<16x128xbf16> to vector<1x1x16x128xbf16>
      tpu.vector_store %arg5[%c0_76, %96, %c0_77, %c0_78], %99 {strides = array<i32>} : memref<1x16x16x128xbf16, #tpu.memory_space<vmem>>, vector<1x1x16x128xbf16>,
    }
    %c16_i32_1 = arith.constant 16 : i32
    return
  }
  func.func @transform_0(%arg0: i32) -> (i32, i32, i32, i32) {
    %c0_i32 = arith.constant 0 : i32
    %c0_i32_0 = arith.constant 0 : i32
    %c0_i32_1 = arith.constant 0 : i32
    %c0_i32_2 = arith.constant 0 : i32
    return %arg0, %c0_i32, %c0_i32_0, %c0_i32_1 : i32, i32, i32, i32
  }
  func.func @transform_1(%arg0: i32) -> (i32, i32, i32) {
    %c0_i32 = arith.constant 0 : i32
    %c0_i32_0 = arith.constant 0 : i32
    %c0_i32_1 = arith.constant 0 : i32
    %c0_i32_2 = arith.constant 0 : i32
    return %c0_i32, %c0_i32_0, %c0_i32_1 : i32, i32, i32
  }
  func.func @transform_2(%arg0: i32) -> (i32, i32) {
    %c0_i32 = arith.constant 0 : i32
    %c0_i32_0 = arith.constant 0 : i32
    %c0_i32_1 = arith.constant 0 : i32
    return %c0_i32, %c0_i32_0 : i32, i32
  }
  func.func @transform_3(%arg0: i32) -> (i32, i32, i32, i32) {
    %c0_i32 = arith.constant 0 : i32
    %c0_i32_0 = arith.constant 0 : i32
    %c0_i32_1 = arith.constant 0 : i32
    %c0_i32_2 = arith.constant 0 : i32
    return %arg0, %c0_i32, %c0_i32_0, %c0_i32_1 : i32, i32, i32, i32
  }
  func.func @transform_4(%arg0: i32) -> (i32, i32, i32, i32) {
    %c0_i32 = arith.constant 0 : i32
    %c0_i32_0 = arith.constant 0 : i32
    %c0_i32_1 = arith.constant 0 : i32
    %c0_i32_2 = arith.constant 0 : i32
    return %arg0, %c0_i32, %c0_i32_0, %c0_i32_1 : i32, i32, i32, i32
  }
}

module attributes {stable_mosaic.version = 11 : i64} {
  func.func @_conv3x3_kernel(%arg0: i32, %arg1: memref<1x18x18x128xbf16, #tpu.memory_space<vmem>>, %arg2: memref<9x128x128xbf16, #tpu.memory_space<vmem>>, %arg3: memref<1x128xf32, #tpu.memory_space<vmem>>, %arg4: memref<1x16x16x128xbf16, #tpu.memory_space<vmem>>) attributes {dimension_semantics = [#tpu.dimension_semantics<parallel>], iteration_bounds = array<i64: 2>, scalar_prefetch = 0 : i64, scratch_operands = 0 : i64, tpu.core_type = #tpu.core_type<tc>, window_params = [{transform_indices = @transform_0, window_bounds = array<i64: 1, 18, 18, 128>}, {pipeline_mode = #tpu.pipeline_mode<synchronous>, transform_indices = @transform_1, window_bounds = array<i64: 9, 128, 128>}, {pipeline_mode = #tpu.pipeline_mode<synchronous>, transform_indices = @transform_2, window_bounds = array<i64: 1, 128>}, {transform_indices = @transform_3, window_bounds = array<i64: 1, 16, 16, 128>}]} {
    %c0 = arith.constant 0 : index
    %c0_0 = arith.constant 0 : index
    %0 = vector.load %arg3[%c0, %c0_0] : memref<1x128xf32, #tpu.memory_space<vmem>>, vector<1x128xf32>
    %c0_i32 = arith.constant 0 : i32
    %c16_i32 = arith.constant 16 : i32
    %1 = arith.addi %c0_i32, %c16_i32 : i32
    %c1_i32 = arith.constant 1 : i32
    scf.for %arg5 = %c0_i32 to %1 step %c1_i32  : i32 {
      %cst = arith.constant 0.000000e+00 : f32
      %2 = vector.broadcast %cst : f32 to vector<16x128xf32>
      %c0_i32_2 = arith.constant 0 : i32
      %3 = arith.addi %c0_i32_2, %arg5 : i32
      %c0_i32_3 = arith.constant 0 : i32
      %4 = arith.addi %3, %c0_i32_3 : i32
      %c0_4 = arith.constant 0 : index
      %5 = arith.index_cast %4 : i32 to index
      %c0_5 = arith.constant 0 : index
      %c0_6 = arith.constant 0 : index
      %6 = vector.load %arg1[%c0_4, %5, %c0_5, %c0_6] : memref<1x18x18x128xbf16, #tpu.memory_space<vmem>>, vector<1x1x16x128xbf16>
      %7 = vector.shape_cast %6 : vector<1x1x16x128xbf16> to vector<16x128xbf16>
      %c0_7 = arith.constant 0 : index
      %c0_8 = arith.constant 0 : index
      %c0_9 = arith.constant 0 : index
      %8 = vector.load %arg2[%c0_7, %c0_8, %c0_9] : memref<9x128x128xbf16, #tpu.memory_space<vmem>>, vector<1x128x128xbf16>
      %9 = vector.shape_cast %8 : vector<1x128x128xbf16> to vector<128x128xbf16>
      %cst_10 = arith.constant dense<0.000000e+00> : vector<16x128xf32>
      %10 = tpu.matmul %7, %9, %cst_10 {dimension_numbers = #tpu.dot_dimension_numbers<[1], [0], [0], [1], [0, 0, 1, 1], [], []>} : vector<16x128xbf16>, vector<128x128xbf16>, vector<16x128xf32> -> vector<16x128xf32>
      %11 = arith.addf %2, %10 : vector<16x128xf32>
      %c0_i32_11 = arith.constant 0 : i32
      %12 = arith.addi %c0_i32_11, %arg5 : i32
      %c0_i32_12 = arith.constant 0 : i32
      %13 = arith.addi %12, %c0_i32_12 : i32
      %c0_13 = arith.constant 0 : index
      %14 = arith.index_cast %13 : i32 to index
      %c1 = arith.constant 1 : index
      %c0_14 = arith.constant 0 : index
      %15 = vector.load %arg1[%c0_13, %14, %c1, %c0_14] : memref<1x18x18x128xbf16, #tpu.memory_space<vmem>>, vector<1x1x16x128xbf16>
      %16 = vector.shape_cast %15 : vector<1x1x16x128xbf16> to vector<16x128xbf16>
      %c1_15 = arith.constant 1 : index
      %c0_16 = arith.constant 0 : index
      %c0_17 = arith.constant 0 : index
      %17 = vector.load %arg2[%c1_15, %c0_16, %c0_17] : memref<9x128x128xbf16, #tpu.memory_space<vmem>>, vector<1x128x128xbf16>
      %18 = vector.shape_cast %17 : vector<1x128x128xbf16> to vector<128x128xbf16>
      %cst_18 = arith.constant dense<0.000000e+00> : vector<16x128xf32>
      %19 = tpu.matmul %16, %18, %cst_18 {dimension_numbers = #tpu.dot_dimension_numbers<[1], [0], [0], [1], [0, 0, 1, 1], [], []>} : vector<16x128xbf16>, vector<128x128xbf16>, vector<16x128xf32> -> vector<16x128xf32>
      %20 = arith.addf %11, %19 : vector<16x128xf32>
      %c0_i32_19 = arith.constant 0 : i32
      %21 = arith.addi %c0_i32_19, %arg5 : i32
      %c0_i32_20 = arith.constant 0 : i32
      %22 = arith.addi %21, %c0_i32_20 : i32
      %c0_21 = arith.constant 0 : index
      %23 = arith.index_cast %22 : i32 to index
      %c2 = arith.constant 2 : index
      %c0_22 = arith.constant 0 : index
      %24 = vector.load %arg1[%c0_21, %23, %c2, %c0_22] : memref<1x18x18x128xbf16, #tpu.memory_space<vmem>>, vector<1x1x16x128xbf16>
      %25 = vector.shape_cast %24 : vector<1x1x16x128xbf16> to vector<16x128xbf16>
      %c2_23 = arith.constant 2 : index
      %c0_24 = arith.constant 0 : index
      %c0_25 = arith.constant 0 : index
      %26 = vector.load %arg2[%c2_23, %c0_24, %c0_25] : memref<9x128x128xbf16, #tpu.memory_space<vmem>>, vector<1x128x128xbf16>
      %27 = vector.shape_cast %26 : vector<1x128x128xbf16> to vector<128x128xbf16>
      %cst_26 = arith.constant dense<0.000000e+00> : vector<16x128xf32>
      %28 = tpu.matmul %25, %27, %cst_26 {dimension_numbers = #tpu.dot_dimension_numbers<[1], [0], [0], [1], [0, 0, 1, 1], [], []>} : vector<16x128xbf16>, vector<128x128xbf16>, vector<16x128xf32> -> vector<16x128xf32>
      %29 = arith.addf %20, %28 : vector<16x128xf32>
      %c0_i32_27 = arith.constant 0 : i32
      %30 = arith.addi %c0_i32_27, %arg5 : i32
      %c1_i32_28 = arith.constant 1 : i32
      %31 = arith.addi %30, %c1_i32_28 : i32
      %c0_29 = arith.constant 0 : index
      %32 = arith.index_cast %31 : i32 to index
      %c0_30 = arith.constant 0 : index
      %c0_31 = arith.constant 0 : index
      %33 = vector.load %arg1[%c0_29, %32, %c0_30, %c0_31] : memref<1x18x18x128xbf16, #tpu.memory_space<vmem>>, vector<1x1x16x128xbf16>
      %34 = vector.shape_cast %33 : vector<1x1x16x128xbf16> to vector<16x128xbf16>
      %c3 = arith.constant 3 : index
      %c0_32 = arith.constant 0 : index
      %c0_33 = arith.constant 0 : index
      %35 = vector.load %arg2[%c3, %c0_32, %c0_33] : memref<9x128x128xbf16, #tpu.memory_space<vmem>>, vector<1x128x128xbf16>
      %36 = vector.shape_cast %35 : vector<1x128x128xbf16> to vector<128x128xbf16>
      %cst_34 = arith.constant dense<0.000000e+00> : vector<16x128xf32>
      %37 = tpu.matmul %34, %36, %cst_34 {dimension_numbers = #tpu.dot_dimension_numbers<[1], [0], [0], [1], [0, 0, 1, 1], [], []>} : vector<16x128xbf16>, vector<128x128xbf16>, vector<16x128xf32> -> vector<16x128xf32>
      %38 = arith.addf %29, %37 : vector<16x128xf32>
      %c0_i32_35 = arith.constant 0 : i32
      %39 = arith.addi %c0_i32_35, %arg5 : i32
      %c1_i32_36 = arith.constant 1 : i32
      %40 = arith.addi %39, %c1_i32_36 : i32
      %c0_37 = arith.constant 0 : index
      %41 = arith.index_cast %40 : i32 to index
      %c1_38 = arith.constant 1 : index
      %c0_39 = arith.constant 0 : index
      %42 = vector.load %arg1[%c0_37, %41, %c1_38, %c0_39] : memref<1x18x18x128xbf16, #tpu.memory_space<vmem>>, vector<1x1x16x128xbf16>
      %43 = vector.shape_cast %42 : vector<1x1x16x128xbf16> to vector<16x128xbf16>
      %c4 = arith.constant 4 : index
      %c0_40 = arith.constant 0 : index
      %c0_41 = arith.constant 0 : index
      %44 = vector.load %arg2[%c4, %c0_40, %c0_41] : memref<9x128x128xbf16, #tpu.memory_space<vmem>>, vector<1x128x128xbf16>
      %45 = vector.shape_cast %44 : vector<1x128x128xbf16> to vector<128x128xbf16>
      %cst_42 = arith.constant dense<0.000000e+00> : vector<16x128xf32>
      %46 = tpu.matmul %43, %45, %cst_42 {dimension_numbers = #tpu.dot_dimension_numbers<[1], [0], [0], [1], [0, 0, 1, 1], [], []>} : vector<16x128xbf16>, vector<128x128xbf16>, vector<16x128xf32> -> vector<16x128xf32>
      %47 = arith.addf %38, %46 : vector<16x128xf32>
      %c0_i32_43 = arith.constant 0 : i32
      %48 = arith.addi %c0_i32_43, %arg5 : i32
      %c1_i32_44 = arith.constant 1 : i32
      %49 = arith.addi %48, %c1_i32_44 : i32
      %c0_45 = arith.constant 0 : index
      %50 = arith.index_cast %49 : i32 to index
      %c2_46 = arith.constant 2 : index
      %c0_47 = arith.constant 0 : index
      %51 = vector.load %arg1[%c0_45, %50, %c2_46, %c0_47] : memref<1x18x18x128xbf16, #tpu.memory_space<vmem>>, vector<1x1x16x128xbf16>
      %52 = vector.shape_cast %51 : vector<1x1x16x128xbf16> to vector<16x128xbf16>
      %c5 = arith.constant 5 : index
      %c0_48 = arith.constant 0 : index
      %c0_49 = arith.constant 0 : index
      %53 = vector.load %arg2[%c5, %c0_48, %c0_49] : memref<9x128x128xbf16, #tpu.memory_space<vmem>>, vector<1x128x128xbf16>
      %54 = vector.shape_cast %53 : vector<1x128x128xbf16> to vector<128x128xbf16>
      %cst_50 = arith.constant dense<0.000000e+00> : vector<16x128xf32>
      %55 = tpu.matmul %52, %54, %cst_50 {dimension_numbers = #tpu.dot_dimension_numbers<[1], [0], [0], [1], [0, 0, 1, 1], [], []>} : vector<16x128xbf16>, vector<128x128xbf16>, vector<16x128xf32> -> vector<16x128xf32>
      %56 = arith.addf %47, %55 : vector<16x128xf32>
      %c0_i32_51 = arith.constant 0 : i32
      %57 = arith.addi %c0_i32_51, %arg5 : i32
      %c2_i32 = arith.constant 2 : i32
      %58 = arith.addi %57, %c2_i32 : i32
      %c0_52 = arith.constant 0 : index
      %59 = arith.index_cast %58 : i32 to index
      %c0_53 = arith.constant 0 : index
      %c0_54 = arith.constant 0 : index
      %60 = vector.load %arg1[%c0_52, %59, %c0_53, %c0_54] : memref<1x18x18x128xbf16, #tpu.memory_space<vmem>>, vector<1x1x16x128xbf16>
      %61 = vector.shape_cast %60 : vector<1x1x16x128xbf16> to vector<16x128xbf16>
      %c6 = arith.constant 6 : index
      %c0_55 = arith.constant 0 : index
      %c0_56 = arith.constant 0 : index
      %62 = vector.load %arg2[%c6, %c0_55, %c0_56] : memref<9x128x128xbf16, #tpu.memory_space<vmem>>, vector<1x128x128xbf16>
      %63 = vector.shape_cast %62 : vector<1x128x128xbf16> to vector<128x128xbf16>
      %cst_57 = arith.constant dense<0.000000e+00> : vector<16x128xf32>
      %64 = tpu.matmul %61, %63, %cst_57 {dimension_numbers = #tpu.dot_dimension_numbers<[1], [0], [0], [1], [0, 0, 1, 1], [], []>} : vector<16x128xbf16>, vector<128x128xbf16>, vector<16x128xf32> -> vector<16x128xf32>
      %65 = arith.addf %56, %64 : vector<16x128xf32>
      %c0_i32_58 = arith.constant 0 : i32
      %66 = arith.addi %c0_i32_58, %arg5 : i32
      %c2_i32_59 = arith.constant 2 : i32
      %67 = arith.addi %66, %c2_i32_59 : i32
      %c0_60 = arith.constant 0 : index
      %68 = arith.index_cast %67 : i32 to index
      %c1_61 = arith.constant 1 : index
      %c0_62 = arith.constant 0 : index
      %69 = vector.load %arg1[%c0_60, %68, %c1_61, %c0_62] : memref<1x18x18x128xbf16, #tpu.memory_space<vmem>>, vector<1x1x16x128xbf16>
      %70 = vector.shape_cast %69 : vector<1x1x16x128xbf16> to vector<16x128xbf16>
      %c7 = arith.constant 7 : index
      %c0_63 = arith.constant 0 : index
      %c0_64 = arith.constant 0 : index
      %71 = vector.load %arg2[%c7, %c0_63, %c0_64] : memref<9x128x128xbf16, #tpu.memory_space<vmem>>, vector<1x128x128xbf16>
      %72 = vector.shape_cast %71 : vector<1x128x128xbf16> to vector<128x128xbf16>
      %cst_65 = arith.constant dense<0.000000e+00> : vector<16x128xf32>
      %73 = tpu.matmul %70, %72, %cst_65 {dimension_numbers = #tpu.dot_dimension_numbers<[1], [0], [0], [1], [0, 0, 1, 1], [], []>} : vector<16x128xbf16>, vector<128x128xbf16>, vector<16x128xf32> -> vector<16x128xf32>
      %74 = arith.addf %65, %73 : vector<16x128xf32>
      %c0_i32_66 = arith.constant 0 : i32
      %75 = arith.addi %c0_i32_66, %arg5 : i32
      %c2_i32_67 = arith.constant 2 : i32
      %76 = arith.addi %75, %c2_i32_67 : i32
      %c0_68 = arith.constant 0 : index
      %77 = arith.index_cast %76 : i32 to index
      %c2_69 = arith.constant 2 : index
      %c0_70 = arith.constant 0 : index
      %78 = vector.load %arg1[%c0_68, %77, %c2_69, %c0_70] : memref<1x18x18x128xbf16, #tpu.memory_space<vmem>>, vector<1x1x16x128xbf16>
      %79 = vector.shape_cast %78 : vector<1x1x16x128xbf16> to vector<16x128xbf16>
      %c8 = arith.constant 8 : index
      %c0_71 = arith.constant 0 : index
      %c0_72 = arith.constant 0 : index
      %80 = vector.load %arg2[%c8, %c0_71, %c0_72] : memref<9x128x128xbf16, #tpu.memory_space<vmem>>, vector<1x128x128xbf16>
      %81 = vector.shape_cast %80 : vector<1x128x128xbf16> to vector<128x128xbf16>
      %cst_73 = arith.constant dense<0.000000e+00> : vector<16x128xf32>
      %82 = tpu.matmul %79, %81, %cst_73 {dimension_numbers = #tpu.dot_dimension_numbers<[1], [0], [0], [1], [0, 0, 1, 1], [], []>} : vector<16x128xbf16>, vector<128x128xbf16>, vector<16x128xf32> -> vector<16x128xf32>
      %83 = arith.addf %74, %82 : vector<16x128xf32>
      %84 = vector.broadcast %0 : vector<1x128xf32> to vector<16x128xf32>
      %85 = arith.addf %83, %84 : vector<16x128xf32>
      %cst_74 = arith.constant 0.000000e+00 : f32
      %86 = vector.broadcast %cst_74 : f32 to vector<16x128xf32>
      %87 = arith.maximumf %85, %86 : vector<16x128xf32>
      %88 = arith.truncf %87 : vector<16x128xf32> to vector<16x128xbf16>
      %c0_75 = arith.constant 0 : index
      %89 = arith.index_cast %arg5 : i32 to index
      %c0_76 = arith.constant 0 : index
      %c0_77 = arith.constant 0 : index
      %90 = vector.load %arg4[%c0_75, %89, %c0_76, %c0_77] : memref<1x16x16x128xbf16, #tpu.memory_space<vmem>>, vector<1x1x16x128xbf16>
      %91 = vector.shape_cast %90 : vector<1x1x16x128xbf16> to vector<16x128xbf16>
      %92 = vector.shape_cast %88 : vector<16x128xbf16> to vector<1x1x16x128xbf16>
      tpu.vector_store %arg4[%c0_75, %89, %c0_76, %c0_77], %92 {strides = array<i32>} : memref<1x16x16x128xbf16, #tpu.memory_space<vmem>>, vector<1x1x16x128xbf16>,
    }
    %c16_i32_1 = arith.constant 16 : i32
    return
  }
  func.func @transform_0(%arg0: i32) -> (i32, i32, i32, i32) {
    %c0_i32 = arith.constant 0 : i32
    %c0_i32_0 = arith.constant 0 : i32
    %c0_i32_1 = arith.constant 0 : i32
    %c0_i32_2 = arith.constant 0 : i32
    return %arg0, %c0_i32, %c0_i32_0, %c0_i32_1 : i32, i32, i32, i32
  }
  func.func @transform_1(%arg0: i32) -> (i32, i32, i32) {
    %c0_i32 = arith.constant 0 : i32
    %c0_i32_0 = arith.constant 0 : i32
    %c0_i32_1 = arith.constant 0 : i32
    %c0_i32_2 = arith.constant 0 : i32
    return %c0_i32, %c0_i32_0, %c0_i32_1 : i32, i32, i32
  }
  func.func @transform_2(%arg0: i32) -> (i32, i32) {
    %c0_i32 = arith.constant 0 : i32
    %c0_i32_0 = arith.constant 0 : i32
    %c0_i32_1 = arith.constant 0 : i32
    return %c0_i32, %c0_i32_0 : i32, i32
  }
  func.func @transform_3(%arg0: i32) -> (i32, i32, i32, i32) {
    %c0_i32 = arith.constant 0 : i32
    %c0_i32_0 = arith.constant 0 : i32
    %c0_i32_1 = arith.constant 0 : i32
    %c0_i32_2 = arith.constant 0 : i32
    return %arg0, %c0_i32, %c0_i32_0, %c0_i32_1 : i32, i32, i32, i32
  }
}

module attributes {stable_mosaic.version = 11 : i64} {
  func.func @_mm_kernel(%arg0: i32, %arg1: i32, %arg2: i32, %arg3: memref<512x128xbf16, #tpu.memory_space<vmem>>, %arg4: memref<128x128xbf16, #tpu.memory_space<vmem>>, %arg5: memref<1x128xf32, #tpu.memory_space<vmem>>, %arg6: memref<512x128xf32, #tpu.memory_space<vmem>>, %arg7: memref<512x128xf32, #tpu.memory_space<vmem>>) attributes {dimension_semantics = [#tpu.dimension_semantics<parallel>, #tpu.dimension_semantics<parallel>, #tpu.dimension_semantics<arbitrary>], iteration_bounds = array<i64: 1, 1, 1>, scalar_prefetch = 0 : i64, scratch_operands = 1 : i64, tpu.core_type = #tpu.core_type<tc>, window_params = [{transform_indices = @transform_0, window_bounds = array<i64: 512, 128>}, {transform_indices = @transform_1, window_bounds = array<i64: 128, 128>}, {transform_indices = @transform_2, window_bounds = array<i64: 1, 128>}, {transform_indices = @transform_3, window_bounds = array<i64: 512, 128>}]} {
    %c0_i32 = arith.constant 0 : i32
    %0 = arith.cmpi eq, %arg2, %c0_i32 : i32
    %1 = arith.extui %0 : i1 to i32
    %c0_i32_0 = arith.constant 0 : i32
    %2 = arith.cmpi ne, %1, %c0_i32_0 : i32
    scf.if %2 {
      %cst_10 = arith.constant 0.000000e+00 : f32
      %12 = vector.broadcast %cst_10 : f32 to vector<512x128xf32>
      %c0_11 = arith.constant 0 : index
      %c0_12 = arith.constant 0 : index
      %13 = vector.load %arg7[%c0_11, %c0_12] : memref<512x128xf32, #tpu.memory_space<vmem>>, vector<512x128xf32>
      tpu.vector_store %arg7[%c0_11, %c0_12], %12 {strides = array<i32>} : memref<512x128xf32, #tpu.memory_space<vmem>>, vector<512x128xf32>,
    } else {
    }
    %c0 = arith.constant 0 : index
    %c0_1 = arith.constant 0 : index
    %3 = vector.load %arg7[%c0, %c0_1] : memref<512x128xf32, #tpu.memory_space<vmem>>, vector<512x128xf32>
    %c0_2 = arith.constant 0 : index
    %c0_3 = arith.constant 0 : index
    %4 = vector.load %arg3[%c0_2, %c0_3] : memref<512x128xbf16, #tpu.memory_space<vmem>>, vector<512x128xbf16>
    %c0_4 = arith.constant 0 : index
    %c0_5 = arith.constant 0 : index
    %5 = vector.load %arg4[%c0_4, %c0_5] : memref<128x128xbf16, #tpu.memory_space<vmem>>, vector<128x128xbf16>
    %cst = arith.constant dense<0.000000e+00> : vector<512x128xf32>
    %6 = tpu.matmul %4, %5, %cst {dimension_numbers = #tpu.dot_dimension_numbers<[1], [0], [0], [1], [0, 0, 1, 1], [], []>} : vector<512x128xbf16>, vector<128x128xbf16>, vector<512x128xf32> -> vector<512x128xf32>
    %7 = arith.addf %3, %6 : vector<512x128xf32>
    %c0_6 = arith.constant 0 : index
    %c0_7 = arith.constant 0 : index
    %8 = vector.load %arg7[%c0_6, %c0_7] : memref<512x128xf32, #tpu.memory_space<vmem>>, vector<512x128xf32>
    tpu.vector_store %arg7[%c0_6, %c0_7], %7 {strides = array<i32>} : memref<512x128xf32, #tpu.memory_space<vmem>>, vector<512x128xf32>,
    %c0_i32_8 = arith.constant 0 : i32
    %9 = arith.cmpi eq, %arg2, %c0_i32_8 : i32
    %10 = arith.extui %9 : i1 to i32
    %c0_i32_9 = arith.constant 0 : i32
    %11 = arith.cmpi ne, %10, %c0_i32_9 : i32
    scf.if %11 {
      %c0_10 = arith.constant 0 : index
      %c0_11 = arith.constant 0 : index
      %12 = vector.load %arg7[%c0_10, %c0_11] : memref<512x128xf32, #tpu.memory_space<vmem>>, vector<512x128xf32>
      %c0_12 = arith.constant 0 : index
      %c0_13 = arith.constant 0 : index
      %13 = vector.load %arg5[%c0_12, %c0_13] : memref<1x128xf32, #tpu.memory_space<vmem>>, vector<1x128xf32>
      %14 = vector.broadcast %13 : vector<1x128xf32> to vector<512x128xf32>
      %15 = arith.addf %12, %14 : vector<512x128xf32>
      %c0_14 = arith.constant 0 : index
      %c0_15 = arith.constant 0 : index
      %16 = vector.load %arg6[%c0_14, %c0_15] : memref<512x128xf32, #tpu.memory_space<vmem>>, vector<512x128xf32>
      tpu.vector_store %arg6[%c0_14, %c0_15], %15 {strides = array<i32>} : memref<512x128xf32, #tpu.memory_space<vmem>>, vector<512x128xf32>,
    } else {
    }
    return
  }
  func.func @transform_0(%arg0: i32, %arg1: i32, %arg2: i32) -> (i32, i32) {
    %c0_i32 = arith.constant 0 : i32
    return %arg0, %arg2 : i32, i32
  }
  func.func @transform_1(%arg0: i32, %arg1: i32, %arg2: i32) -> (i32, i32) {
    %c0_i32 = arith.constant 0 : i32
    return %arg2, %arg1 : i32, i32
  }
  func.func @transform_2(%arg0: i32, %arg1: i32, %arg2: i32) -> (i32, i32) {
    %c0_i32 = arith.constant 0 : i32
    %c0_i32_0 = arith.constant 0 : i32
    return %c0_i32, %arg1 : i32, i32
  }
  func.func @transform_3(%arg0: i32, %arg1: i32, %arg2: i32) -> (i32, i32) {
    %c0_i32 = arith.constant 0 : i32
    return %arg0, %arg1 : i32, i32
  }
}

module attributes {stable_mosaic.version = 11 : i64} {
  func.func @_decode_kernel(%arg0: i32, %arg1: memref<4x3072xf32, #tpu.memory_space<vmem>>, %arg2: memref<4x3072xf32, #tpu.memory_space<vmem>>, %arg3: memref<4x3072xf32, #tpu.memory_space<vmem>>) attributes {dimension_semantics = [#tpu.dimension_semantics<arbitrary>], iteration_bounds = array<i64: 1>, scalar_prefetch = 0 : i64, scratch_operands = 0 : i64, tpu.core_type = #tpu.core_type<tc>, window_params = [{pipeline_mode = #tpu.pipeline_mode<synchronous>, transform_indices = @transform_0, window_bounds = array<i64: 4, 3072>}, {pipeline_mode = #tpu.pipeline_mode<synchronous>, transform_indices = @transform_1, window_bounds = array<i64: 4, 3072>}, {pipeline_mode = #tpu.pipeline_mode<synchronous>, transform_indices = @transform_2, window_bounds = array<i64: 4, 3072>}]} {
    %c0 = arith.constant 0 : index
    %c0_0 = arith.constant 0 : index
    %0 = vector.load %arg1[%c0, %c0_0] : memref<4x3072xf32, #tpu.memory_space<vmem>>, vector<4x3072xf32>
    %c0_1 = arith.constant 0 : index
    %c0_2 = arith.constant 0 : index
    %1 = vector.load %arg2[%c0_1, %c0_2] : memref<4x3072xf32, #tpu.memory_space<vmem>>, vector<4x3072xf32>
    %2 = vector.extract_strided_slice %1 {offsets = [2, 0], sizes = [1, 3072], strides = [1, 1]} : vector<4x3072xf32> to vector<1x3072xf32>
    %3 = vector.extract_strided_slice %1 {offsets = [0, 0], sizes = [1, 3072], strides = [1, 1]} : vector<4x3072xf32> to vector<1x3072xf32>
    %4 = arith.subf %2, %3 : vector<1x3072xf32>
    %5 = vector.extract_strided_slice %1 {offsets = [3, 0], sizes = [1, 3072], strides = [1, 1]} : vector<4x3072xf32> to vector<1x3072xf32>
    %6 = vector.extract_strided_slice %1 {offsets = [1, 0], sizes = [1, 3072], strides = [1, 1]} : vector<4x3072xf32> to vector<1x3072xf32>
    %7 = arith.subf %5, %6 : vector<1x3072xf32>
    %8 = vector.extract_strided_slice %1 {offsets = [0, 0], sizes = [1, 3072], strides = [1, 1]} : vector<4x3072xf32> to vector<1x3072xf32>
    %cst = arith.constant 5.000000e-01 : f32
    %9 = vector.broadcast %cst : f32 to vector<1x3072xf32>
    %10 = arith.mulf %9, %4 : vector<1x3072xf32>
    %11 = arith.addf %8, %10 : vector<1x3072xf32>
    %12 = vector.extract_strided_slice %1 {offsets = [1, 0], sizes = [1, 3072], strides = [1, 1]} : vector<4x3072xf32> to vector<1x3072xf32>
    %cst_3 = arith.constant 5.000000e-01 : f32
    %13 = vector.broadcast %cst_3 : f32 to vector<1x3072xf32>
    %14 = arith.mulf %13, %7 : vector<1x3072xf32>
    %15 = arith.addf %12, %14 : vector<1x3072xf32>
    %16 = vector.extract_strided_slice %0 {offsets = [0, 0], sizes = [1, 3072], strides = [1, 1]} : vector<4x3072xf32> to vector<1x3072xf32>
    %cst_4 = arith.constant 1.000000e+00 : f32
    %17 = vector.broadcast %cst_4 : f32 to vector<1x3072xf32>
    %18 = arith.mulf %16, %17 : vector<1x3072xf32>
    %19 = vector.extract_strided_slice %0 {offsets = [1, 0], sizes = [1, 3072], strides = [1, 1]} : vector<4x3072xf32> to vector<1x3072xf32>
    %cst_5 = arith.constant 1.000000e+00 : f32
    %20 = vector.broadcast %cst_5 : f32 to vector<1x3072xf32>
    %21 = arith.mulf %19, %20 : vector<1x3072xf32>
    %22 = vector.extract_strided_slice %0 {offsets = [2, 0], sizes = [1, 3072], strides = [1, 1]} : vector<4x3072xf32> to vector<1x3072xf32>
    %cst_6 = arith.constant 1.000000e+00 : f32
    %23 = vector.broadcast %cst_6 : f32 to vector<1x3072xf32>
    %24 = arith.mulf %22, %23 : vector<1x3072xf32>
    %cst_7 = arith.constant 4.13516665 : f32
    %25 = vector.broadcast %cst_7 : f32 to vector<1x3072xf32>
    %26 = arith.minimumf %24, %25 : vector<1x3072xf32>
    %27 = vector.extract_strided_slice %0 {offsets = [3, 0], sizes = [1, 3072], strides = [1, 1]} : vector<4x3072xf32> to vector<1x3072xf32>
    %cst_8 = arith.constant 1.000000e+00 : f32
    %28 = vector.broadcast %cst_8 : f32 to vector<1x3072xf32>
    %29 = arith.mulf %27, %28 : vector<1x3072xf32>
    %cst_9 = arith.constant 4.13516665 : f32
    %30 = vector.broadcast %cst_9 : f32 to vector<1x3072xf32>
    %31 = arith.minimumf %29, %30 : vector<1x3072xf32>
    %32 = arith.mulf %18, %4 : vector<1x3072xf32>
    %33 = arith.addf %32, %11 : vector<1x3072xf32>
    %34 = arith.mulf %21, %7 : vector<1x3072xf32>
    %35 = arith.addf %34, %15 : vector<1x3072xf32>
    %36 = math.exp %26 : vector<1x3072xf32>
    %37 = arith.mulf %36, %4 : vector<1x3072xf32>
    %38 = math.exp %31 : vector<1x3072xf32>
    %39 = arith.mulf %38, %7 : vector<1x3072xf32>
    %cst_10 = arith.constant 5.000000e-01 : f32
    %40 = vector.broadcast %cst_10 : f32 to vector<1x3072xf32>
    %41 = arith.mulf %40, %37 : vector<1x3072xf32>
    %42 = arith.subf %33, %41 : vector<1x3072xf32>
    %cst_11 = arith.constant 5.000000e-01 : f32
    %43 = vector.broadcast %cst_11 : f32 to vector<1x3072xf32>
    %44 = arith.mulf %43, %39 : vector<1x3072xf32>
    %45 = arith.subf %35, %44 : vector<1x3072xf32>
    %cst_12 = arith.constant 5.000000e-01 : f32
    %46 = vector.broadcast %cst_12 : f32 to vector<1x3072xf32>
    %47 = arith.mulf %46, %37 : vector<1x3072xf32>
    %48 = arith.addf %33, %47 : vector<1x3072xf32>
    %cst_13 = arith.constant 5.000000e-01 : f32
    %49 = vector.broadcast %cst_13 : f32 to vector<1x3072xf32>
    %50 = arith.mulf %49, %39 : vector<1x3072xf32>
    %51 = arith.addf %35, %50 : vector<1x3072xf32>
    %cst_14 = arith.constant 0.000000e+00 : f32
    %cst_15 = arith.constant 3.200000e+01 : f32
    %52 = vector.broadcast %cst_14 : f32 to vector<1x3072xf32>
    %53 = arith.maximumf %52, %42 : vector<1x3072xf32>
    %54 = vector.broadcast %cst_15 : f32 to vector<1x3072xf32>
    %55 = arith.minimumf %54, %53 : vector<1x3072xf32>
    %cst_16 = arith.constant 0.000000e+00 : f32
    %cst_17 = arith.constant 3.200000e+01 : f32
    %56 = vector.broadcast %cst_16 : f32 to vector<1x3072xf32>
    %57 = arith.maximumf %56, %48 : vector<1x3072xf32>
    %58 = vector.broadcast %cst_17 : f32 to vector<1x3072xf32>
    %59 = arith.minimumf %58, %57 : vector<1x3072xf32>
    %cst_18 = arith.constant 0.000000e+00 : f32
    %cst_19 = arith.constant 3.200000e+01 : f32
    %60 = vector.broadcast %cst_18 : f32 to vector<1x3072xf32>
    %61 = arith.maximumf %60, %45 : vector<1x3072xf32>
    %62 = vector.broadcast %cst_19 : f32 to vector<1x3072xf32>
    %63 = arith.minimumf %62, %61 : vector<1x3072xf32>
    %cst_20 = arith.constant 0.000000e+00 : f32
    %cst_21 = arith.constant 3.200000e+01 : f32
    %64 = vector.broadcast %cst_20 : f32 to vector<1x3072xf32>
    %65 = arith.maximumf %64, %51 : vector<1x3072xf32>
    %66 = vector.broadcast %cst_21 : f32 to vector<1x3072xf32>
    %67 = arith.minimumf %66, %65 : vector<1x3072xf32>
    %68 = tpu.concatenate %55, %63, %59, %67 in 0 : vector<1x3072xf32>, vector<1x3072xf32>, vector<1x3072xf32>, vector<1x3072xf32> -> vector<4x3072xf32>
    %c0_22 = arith.constant 0 : index
    %c0_23 = arith.constant 0 : index
    %69 = vector.load %arg3[%c0_22, %c0_23] : memref<4x3072xf32, #tpu.memory_space<vmem>>, vector<4x3072xf32>
    tpu.vector_store %arg3[%c0_22, %c0_23], %68 {strides = array<i32>} : memref<4x3072xf32, #tpu.memory_space<vmem>>, vector<4x3072xf32>,
    return
  }
  func.func @transform_0(%arg0: i32) -> (i32, i32) {
    %c0_i32 = arith.constant 0 : i32
    %c0_i32_0 = arith.constant 0 : i32
    %c0_i32_1 = arith.constant 0 : i32
    return %c0_i32, %c0_i32_0 : i32, i32
  }
  func.func @transform_1(%arg0: i32) -> (i32, i32) {
    %c0_i32 = arith.constant 0 : i32
    %c0_i32_0 = arith.constant 0 : i32
    %c0_i32_1 = arith.constant 0 : i32
    return %c0_i32, %c0_i32_0 : i32, i32
  }
  func.func @transform_2(%arg0: i32) -> (i32, i32) {
    %c0_i32 = arith.constant 0 : i32
    %c0_i32_0 = arith.constant 0 : i32
    %c0_i32_1 = arith.constant 0 : i32
    return %c0_i32, %c0_i32_0 : i32, i32
  }
}

module attributes {stable_mosaic.version = 11 : i64} {
  func.func @_mm_kernel(%arg0: i32, %arg1: i32, %arg2: i32, %arg3: memref<32x2048xbf16, #tpu.memory_space<vmem>>, %arg4: memref<2048x128xbf16, #tpu.memory_space<vmem>>, %arg5: memref<1x128xf32, #tpu.memory_space<vmem>>, %arg6: memref<32x128xbf16, #tpu.memory_space<vmem>>, %arg7: memref<32x128xf32, #tpu.memory_space<vmem>>) attributes {dimension_semantics = [#tpu.dimension_semantics<parallel>, #tpu.dimension_semantics<parallel>, #tpu.dimension_semantics<arbitrary>], iteration_bounds = array<i64: 1, 1, 1>, scalar_prefetch = 0 : i64, scratch_operands = 1 : i64, tpu.core_type = #tpu.core_type<tc>, window_params = [{transform_indices = @transform_0, window_bounds = array<i64: 32, 2048>}, {transform_indices = @transform_1, window_bounds = array<i64: 2048, 128>}, {transform_indices = @transform_2, window_bounds = array<i64: 1, 128>}, {transform_indices = @transform_3, window_bounds = array<i64: 32, 128>}]} {
    %c0_i32 = arith.constant 0 : i32
    %0 = arith.cmpi eq, %arg2, %c0_i32 : i32
    %1 = arith.extui %0 : i1 to i32
    %c0_i32_0 = arith.constant 0 : i32
    %2 = arith.cmpi ne, %1, %c0_i32_0 : i32
    scf.if %2 {
      %cst_10 = arith.constant 0.000000e+00 : f32
      %12 = vector.broadcast %cst_10 : f32 to vector<32x128xf32>
      %c0_11 = arith.constant 0 : index
      %c0_12 = arith.constant 0 : index
      %13 = vector.load %arg7[%c0_11, %c0_12] : memref<32x128xf32, #tpu.memory_space<vmem>>, vector<32x128xf32>
      tpu.vector_store %arg7[%c0_11, %c0_12], %12 {strides = array<i32>} : memref<32x128xf32, #tpu.memory_space<vmem>>, vector<32x128xf32>,
    } else {
    }
    %c0 = arith.constant 0 : index
    %c0_1 = arith.constant 0 : index
    %3 = vector.load %arg7[%c0, %c0_1] : memref<32x128xf32, #tpu.memory_space<vmem>>, vector<32x128xf32>
    %c0_2 = arith.constant 0 : index
    %c0_3 = arith.constant 0 : index
    %4 = vector.load %arg3[%c0_2, %c0_3] : memref<32x2048xbf16, #tpu.memory_space<vmem>>, vector<32x2048xbf16>
    %c0_4 = arith.constant 0 : index
    %c0_5 = arith.constant 0 : index
    %5 = vector.load %arg4[%c0_4, %c0_5] : memref<2048x128xbf16, #tpu.memory_space<vmem>>, vector<2048x128xbf16>
    %cst = arith.constant dense<0.000000e+00> : vector<32x128xf32>
    %6 = tpu.matmul %4, %5, %cst {dimension_numbers = #tpu.dot_dimension_numbers<[1], [0], [0], [1], [0, 0, 1, 1], [], []>} : vector<32x2048xbf16>, vector<2048x128xbf16>, vector<32x128xf32> -> vector<32x128xf32>
    %7 = arith.addf %3, %6 : vector<32x128xf32>
    %c0_6 = arith.constant 0 : index
    %c0_7 = arith.constant 0 : index
    %8 = vector.load %arg7[%c0_6, %c0_7] : memref<32x128xf32, #tpu.memory_space<vmem>>, vector<32x128xf32>
    tpu.vector_store %arg7[%c0_6, %c0_7], %7 {strides = array<i32>} : memref<32x128xf32, #tpu.memory_space<vmem>>, vector<32x128xf32>,
    %c0_i32_8 = arith.constant 0 : i32
    %9 = arith.cmpi eq, %arg2, %c0_i32_8 : i32
    %10 = arith.extui %9 : i1 to i32
    %c0_i32_9 = arith.constant 0 : i32
    %11 = arith.cmpi ne, %10, %c0_i32_9 : i32
    scf.if %11 {
      %c0_10 = arith.constant 0 : index
      %c0_11 = arith.constant 0 : index
      %12 = vector.load %arg7[%c0_10, %c0_11] : memref<32x128xf32, #tpu.memory_space<vmem>>, vector<32x128xf32>
      %c0_12 = arith.constant 0 : index
      %c0_13 = arith.constant 0 : index
      %13 = vector.load %arg5[%c0_12, %c0_13] : memref<1x128xf32, #tpu.memory_space<vmem>>, vector<1x128xf32>
      %14 = vector.broadcast %13 : vector<1x128xf32> to vector<32x128xf32>
      %15 = arith.addf %12, %14 : vector<32x128xf32>
      %cst_14 = arith.constant 0.000000e+00 : f32
      %16 = vector.broadcast %cst_14 : f32 to vector<32x128xf32>
      %17 = arith.maximumf %15, %16 : vector<32x128xf32>
      %18 = arith.truncf %17 : vector<32x128xf32> to vector<32x128xbf16>
      %c0_15 = arith.constant 0 : index
      %c0_16 = arith.constant 0 : index
      %19 = vector.load %arg6[%c0_15, %c0_16] : memref<32x128xbf16, #tpu.memory_space<vmem>>, vector<32x128xbf16>
      tpu.vector_store %arg6[%c0_15, %c0_16], %18 {strides = array<i32>} : memref<32x128xbf16, #tpu.memory_space<vmem>>, vector<32x128xbf16>,
    } else {
    }
    return
  }
  func.func @transform_0(%arg0: i32, %arg1: i32, %arg2: i32) -> (i32, i32) {
    %c0_i32 = arith.constant 0 : i32
    return %arg0, %arg2 : i32, i32
  }
  func.func @transform_1(%arg0: i32, %arg1: i32, %arg2: i32) -> (i32, i32) {
    %c0_i32 = arith.constant 0 : i32
    return %arg2, %arg1 : i32, i32
  }
  func.func @transform_2(%arg0: i32, %arg1: i32, %arg2: i32) -> (i32, i32) {
    %c0_i32 = arith.constant 0 : i32
    %c0_i32_0 = arith.constant 0 : i32
    return %c0_i32, %arg1 : i32, i32
  }
  func.func @transform_3(%arg0: i32, %arg1: i32, %arg2: i32) -> (i32, i32) {
    %c0_i32 = arith.constant 0 : i32
    return %arg0, %arg1 : i32, i32
  }
}

module attributes {stable_mosaic.version = 11 : i64} {
  func.func @_mm_kernel(%arg0: i32, %arg1: i32, %arg2: i32, %arg3: memref<32x128xbf16, #tpu.memory_space<vmem>>, %arg4: memref<128x128xbf16, #tpu.memory_space<vmem>>, %arg5: memref<1x128xf32, #tpu.memory_space<vmem>>, %arg6: memref<32x128xbf16, #tpu.memory_space<vmem>>, %arg7: memref<32x128xf32, #tpu.memory_space<vmem>>) attributes {dimension_semantics = [#tpu.dimension_semantics<parallel>, #tpu.dimension_semantics<parallel>, #tpu.dimension_semantics<arbitrary>], iteration_bounds = array<i64: 1, 1, 1>, scalar_prefetch = 0 : i64, scratch_operands = 1 : i64, tpu.core_type = #tpu.core_type<tc>, window_params = [{transform_indices = @transform_0, window_bounds = array<i64: 32, 128>}, {transform_indices = @transform_1, window_bounds = array<i64: 128, 128>}, {transform_indices = @transform_2, window_bounds = array<i64: 1, 128>}, {transform_indices = @transform_3, window_bounds = array<i64: 32, 128>}]} {
    %c0_i32 = arith.constant 0 : i32
    %0 = arith.cmpi eq, %arg2, %c0_i32 : i32
    %1 = arith.extui %0 : i1 to i32
    %c0_i32_0 = arith.constant 0 : i32
    %2 = arith.cmpi ne, %1, %c0_i32_0 : i32
    scf.if %2 {
      %cst_10 = arith.constant 0.000000e+00 : f32
      %12 = vector.broadcast %cst_10 : f32 to vector<32x128xf32>
      %c0_11 = arith.constant 0 : index
      %c0_12 = arith.constant 0 : index
      %13 = vector.load %arg7[%c0_11, %c0_12] : memref<32x128xf32, #tpu.memory_space<vmem>>, vector<32x128xf32>
      tpu.vector_store %arg7[%c0_11, %c0_12], %12 {strides = array<i32>} : memref<32x128xf32, #tpu.memory_space<vmem>>, vector<32x128xf32>,
    } else {
    }
    %c0 = arith.constant 0 : index
    %c0_1 = arith.constant 0 : index
    %3 = vector.load %arg7[%c0, %c0_1] : memref<32x128xf32, #tpu.memory_space<vmem>>, vector<32x128xf32>
    %c0_2 = arith.constant 0 : index
    %c0_3 = arith.constant 0 : index
    %4 = vector.load %arg3[%c0_2, %c0_3] : memref<32x128xbf16, #tpu.memory_space<vmem>>, vector<32x128xbf16>
    %c0_4 = arith.constant 0 : index
    %c0_5 = arith.constant 0 : index
    %5 = vector.load %arg4[%c0_4, %c0_5] : memref<128x128xbf16, #tpu.memory_space<vmem>>, vector<128x128xbf16>
    %cst = arith.constant dense<0.000000e+00> : vector<32x128xf32>
    %6 = tpu.matmul %4, %5, %cst {dimension_numbers = #tpu.dot_dimension_numbers<[1], [0], [0], [1], [0, 0, 1, 1], [], []>} : vector<32x128xbf16>, vector<128x128xbf16>, vector<32x128xf32> -> vector<32x128xf32>
    %7 = arith.addf %3, %6 : vector<32x128xf32>
    %c0_6 = arith.constant 0 : index
    %c0_7 = arith.constant 0 : index
    %8 = vector.load %arg7[%c0_6, %c0_7] : memref<32x128xf32, #tpu.memory_space<vmem>>, vector<32x128xf32>
    tpu.vector_store %arg7[%c0_6, %c0_7], %7 {strides = array<i32>} : memref<32x128xf32, #tpu.memory_space<vmem>>, vector<32x128xf32>,
    %c0_i32_8 = arith.constant 0 : i32
    %9 = arith.cmpi eq, %arg2, %c0_i32_8 : i32
    %10 = arith.extui %9 : i1 to i32
    %c0_i32_9 = arith.constant 0 : i32
    %11 = arith.cmpi ne, %10, %c0_i32_9 : i32
    scf.if %11 {
      %c0_10 = arith.constant 0 : index
      %c0_11 = arith.constant 0 : index
      %12 = vector.load %arg7[%c0_10, %c0_11] : memref<32x128xf32, #tpu.memory_space<vmem>>, vector<32x128xf32>
      %c0_12 = arith.constant 0 : index
      %c0_13 = arith.constant 0 : index
      %13 = vector.load %arg5[%c0_12, %c0_13] : memref<1x128xf32, #tpu.memory_space<vmem>>, vector<1x128xf32>
      %14 = vector.broadcast %13 : vector<1x128xf32> to vector<32x128xf32>
      %15 = arith.addf %12, %14 : vector<32x128xf32>
      %cst_14 = arith.constant 0.000000e+00 : f32
      %16 = vector.broadcast %cst_14 : f32 to vector<32x128xf32>
      %17 = arith.maximumf %15, %16 : vector<32x128xf32>
      %18 = arith.truncf %17 : vector<32x128xf32> to vector<32x128xbf16>
      %c0_15 = arith.constant 0 : index
      %c0_16 = arith.constant 0 : index
      %19 = vector.load %arg6[%c0_15, %c0_16] : memref<32x128xbf16, #tpu.memory_space<vmem>>, vector<32x128xbf16>
      tpu.vector_store %arg6[%c0_15, %c0_16], %18 {strides = array<i32>} : memref<32x128xbf16, #tpu.memory_space<vmem>>, vector<32x128xbf16>,
    } else {
    }
    return
  }
  func.func @transform_0(%arg0: i32, %arg1: i32, %arg2: i32) -> (i32, i32) {
    %c0_i32 = arith.constant 0 : i32
    return %arg0, %arg2 : i32, i32
  }
  func.func @transform_1(%arg0: i32, %arg1: i32, %arg2: i32) -> (i32, i32) {
    %c0_i32 = arith.constant 0 : i32
    return %arg2, %arg1 : i32, i32
  }
  func.func @transform_2(%arg0: i32, %arg1: i32, %arg2: i32) -> (i32, i32) {
    %c0_i32 = arith.constant 0 : i32
    %c0_i32_0 = arith.constant 0 : i32
    return %c0_i32, %arg1 : i32, i32
  }
  func.func @transform_3(%arg0: i32, %arg1: i32, %arg2: i32) -> (i32, i32) {
    %c0_i32 = arith.constant 0 : i32
    return %arg0, %arg1 : i32, i32
  }
}

module attributes {stable_mosaic.version = 11 : i64} {
  func.func @_mm_kernel(%arg0: i32, %arg1: i32, %arg2: i32, %arg3: memref<32x128xbf16, #tpu.memory_space<vmem>>, %arg4: memref<128x128xbf16, #tpu.memory_space<vmem>>, %arg5: memref<1x128xf32, #tpu.memory_space<vmem>>, %arg6: memref<32x128xf32, #tpu.memory_space<vmem>>, %arg7: memref<32x128xf32, #tpu.memory_space<vmem>>) attributes {dimension_semantics = [#tpu.dimension_semantics<parallel>, #tpu.dimension_semantics<parallel>, #tpu.dimension_semantics<arbitrary>], iteration_bounds = array<i64: 1, 1, 1>, scalar_prefetch = 0 : i64, scratch_operands = 1 : i64, tpu.core_type = #tpu.core_type<tc>, window_params = [{transform_indices = @transform_0, window_bounds = array<i64: 32, 128>}, {transform_indices = @transform_1, window_bounds = array<i64: 128, 128>}, {transform_indices = @transform_2, window_bounds = array<i64: 1, 128>}, {transform_indices = @transform_3, window_bounds = array<i64: 32, 128>}]} {
    %c0_i32 = arith.constant 0 : i32
    %0 = arith.cmpi eq, %arg2, %c0_i32 : i32
    %1 = arith.extui %0 : i1 to i32
    %c0_i32_0 = arith.constant 0 : i32
    %2 = arith.cmpi ne, %1, %c0_i32_0 : i32
    scf.if %2 {
      %cst_10 = arith.constant 0.000000e+00 : f32
      %12 = vector.broadcast %cst_10 : f32 to vector<32x128xf32>
      %c0_11 = arith.constant 0 : index
      %c0_12 = arith.constant 0 : index
      %13 = vector.load %arg7[%c0_11, %c0_12] : memref<32x128xf32, #tpu.memory_space<vmem>>, vector<32x128xf32>
      tpu.vector_store %arg7[%c0_11, %c0_12], %12 {strides = array<i32>} : memref<32x128xf32, #tpu.memory_space<vmem>>, vector<32x128xf32>,
    } else {
    }
    %c0 = arith.constant 0 : index
    %c0_1 = arith.constant 0 : index
    %3 = vector.load %arg7[%c0, %c0_1] : memref<32x128xf32, #tpu.memory_space<vmem>>, vector<32x128xf32>
    %c0_2 = arith.constant 0 : index
    %c0_3 = arith.constant 0 : index
    %4 = vector.load %arg3[%c0_2, %c0_3] : memref<32x128xbf16, #tpu.memory_space<vmem>>, vector<32x128xbf16>
    %c0_4 = arith.constant 0 : index
    %c0_5 = arith.constant 0 : index
    %5 = vector.load %arg4[%c0_4, %c0_5] : memref<128x128xbf16, #tpu.memory_space<vmem>>, vector<128x128xbf16>
    %cst = arith.constant dense<0.000000e+00> : vector<32x128xf32>
    %6 = tpu.matmul %4, %5, %cst {dimension_numbers = #tpu.dot_dimension_numbers<[1], [0], [0], [1], [0, 0, 1, 1], [], []>} : vector<32x128xbf16>, vector<128x128xbf16>, vector<32x128xf32> -> vector<32x128xf32>
    %7 = arith.addf %3, %6 : vector<32x128xf32>
    %c0_6 = arith.constant 0 : index
    %c0_7 = arith.constant 0 : index
    %8 = vector.load %arg7[%c0_6, %c0_7] : memref<32x128xf32, #tpu.memory_space<vmem>>, vector<32x128xf32>
    tpu.vector_store %arg7[%c0_6, %c0_7], %7 {strides = array<i32>} : memref<32x128xf32, #tpu.memory_space<vmem>>, vector<32x128xf32>,
    %c0_i32_8 = arith.constant 0 : i32
    %9 = arith.cmpi eq, %arg2, %c0_i32_8 : i32
    %10 = arith.extui %9 : i1 to i32
    %c0_i32_9 = arith.constant 0 : i32
    %11 = arith.cmpi ne, %10, %c0_i32_9 : i32
    scf.if %11 {
      %c0_10 = arith.constant 0 : index
      %c0_11 = arith.constant 0 : index
      %12 = vector.load %arg7[%c0_10, %c0_11] : memref<32x128xf32, #tpu.memory_space<vmem>>, vector<32x128xf32>
      %c0_12 = arith.constant 0 : index
      %c0_13 = arith.constant 0 : index
      %13 = vector.load %arg5[%c0_12, %c0_13] : memref<1x128xf32, #tpu.memory_space<vmem>>, vector<1x128xf32>
      %14 = vector.broadcast %13 : vector<1x128xf32> to vector<32x128xf32>
      %15 = arith.addf %12, %14 : vector<32x128xf32>
      %c0_14 = arith.constant 0 : index
      %c0_15 = arith.constant 0 : index
      %16 = vector.load %arg6[%c0_14, %c0_15] : memref<32x128xf32, #tpu.memory_space<vmem>>, vector<32x128xf32>
      tpu.vector_store %arg6[%c0_14, %c0_15], %15 {strides = array<i32>} : memref<32x128xf32, #tpu.memory_space<vmem>>, vector<32x128xf32>,
    } else {
    }
    return
  }
  func.func @transform_0(%arg0: i32, %arg1: i32, %arg2: i32) -> (i32, i32) {
    %c0_i32 = arith.constant 0 : i32
    return %arg0, %arg2 : i32, i32
  }
  func.func @transform_1(%arg0: i32, %arg1: i32, %arg2: i32) -> (i32, i32) {
    %c0_i32 = arith.constant 0 : i32
    return %arg2, %arg1 : i32, i32
  }
  func.func @transform_2(%arg0: i32, %arg1: i32, %arg2: i32) -> (i32, i32) {
    %c0_i32 = arith.constant 0 : i32
    %c0_i32_0 = arith.constant 0 : i32
    return %c0_i32, %arg1 : i32, i32
  }
  func.func @transform_3(%arg0: i32, %arg1: i32, %arg2: i32) -> (i32, i32) {
    %c0_i32 = arith.constant 0 : i32
    return %arg0, %arg1 : i32, i32
  }
}

module attributes {stable_mosaic.version = 11 : i64} {
  func.func @_det_head_kernel(%arg0: i32, %arg1: i32, %arg2: memref<32x128xbf16, #tpu.memory_space<vmem>>, %arg3: memref<128x128xbf16, #tpu.memory_space<vmem>>, %arg4: memref<1x128xf32, #tpu.memory_space<vmem>>, %arg5: memref<32x128xf32, #tpu.memory_space<vmem>>, %arg6: memref<32x128xf32, #tpu.memory_space<vmem>>, %arg7: memref<32x128xf32, #tpu.memory_space<vmem>>) attributes {dimension_semantics = [#tpu.dimension_semantics<parallel>, #tpu.dimension_semantics<arbitrary>], iteration_bounds = array<i64: 1, 1>, scalar_prefetch = 0 : i64, scratch_operands = 1 : i64, tpu.core_type = #tpu.core_type<tc>, window_params = [{transform_indices = @transform_0, window_bounds = array<i64: 32, 128>}, {transform_indices = @transform_1, window_bounds = array<i64: 128, 128>}, {pipeline_mode = #tpu.pipeline_mode<synchronous>, transform_indices = @transform_2, window_bounds = array<i64: 1, 128>}, {transform_indices = @transform_3, window_bounds = array<i64: 32, 128>}, {transform_indices = @transform_4, window_bounds = array<i64: 32, 128>}]} {
    %c0_i32 = arith.constant 0 : i32
    %0 = arith.cmpi eq, %arg1, %c0_i32 : i32
    %1 = arith.extui %0 : i1 to i32
    %c0_i32_0 = arith.constant 0 : i32
    %2 = arith.cmpi ne, %1, %c0_i32_0 : i32
    scf.if %2 {
      %cst_10 = arith.constant 0.000000e+00 : f32
      %12 = vector.broadcast %cst_10 : f32 to vector<32x128xf32>
      %c0_11 = arith.constant 0 : index
      %c0_12 = arith.constant 0 : index
      %13 = vector.load %arg7[%c0_11, %c0_12] : memref<32x128xf32, #tpu.memory_space<vmem>>, vector<32x128xf32>
      tpu.vector_store %arg7[%c0_11, %c0_12], %12 {strides = array<i32>} : memref<32x128xf32, #tpu.memory_space<vmem>>, vector<32x128xf32>,
    } else {
    }
    %c0 = arith.constant 0 : index
    %c0_1 = arith.constant 0 : index
    %3 = vector.load %arg7[%c0, %c0_1] : memref<32x128xf32, #tpu.memory_space<vmem>>, vector<32x128xf32>
    %c0_2 = arith.constant 0 : index
    %c0_3 = arith.constant 0 : index
    %4 = vector.load %arg2[%c0_2, %c0_3] : memref<32x128xbf16, #tpu.memory_space<vmem>>, vector<32x128xbf16>
    %c0_4 = arith.constant 0 : index
    %c0_5 = arith.constant 0 : index
    %5 = vector.load %arg3[%c0_4, %c0_5] : memref<128x128xbf16, #tpu.memory_space<vmem>>, vector<128x128xbf16>
    %cst = arith.constant dense<0.000000e+00> : vector<32x128xf32>
    %6 = tpu.matmul %4, %5, %cst {dimension_numbers = #tpu.dot_dimension_numbers<[1], [0], [0], [1], [0, 0, 1, 1], [], []>} : vector<32x128xbf16>, vector<128x128xbf16>, vector<32x128xf32> -> vector<32x128xf32>
    %7 = arith.addf %3, %6 : vector<32x128xf32>
    %c0_6 = arith.constant 0 : index
    %c0_7 = arith.constant 0 : index
    %8 = vector.load %arg7[%c0_6, %c0_7] : memref<32x128xf32, #tpu.memory_space<vmem>>, vector<32x128xf32>
    tpu.vector_store %arg7[%c0_6, %c0_7], %7 {strides = array<i32>} : memref<32x128xf32, #tpu.memory_space<vmem>>, vector<32x128xf32>,
    %c0_i32_8 = arith.constant 0 : i32
    %9 = arith.cmpi eq, %arg1, %c0_i32_8 : i32
    %10 = arith.extui %9 : i1 to i32
    %c0_i32_9 = arith.constant 0 : i32
    %11 = arith.cmpi ne, %10, %c0_i32_9 : i32
    scf.if %11 {
      %c0_10 = arith.constant 0 : index
      %c0_11 = arith.constant 0 : index
      %12 = vector.load %arg7[%c0_10, %c0_11] : memref<32x128xf32, #tpu.memory_space<vmem>>, vector<32x128xf32>
      %c0_12 = arith.constant 0 : index
      %c0_13 = arith.constant 0 : index
      %13 = vector.load %arg4[%c0_12, %c0_13] : memref<1x128xf32, #tpu.memory_space<vmem>>, vector<1x128xf32>
      %14 = vector.broadcast %13 : vector<1x128xf32> to vector<32x128xf32>
      %15 = arith.addf %12, %14 : vector<32x128xf32>
      %c0_14 = arith.constant 0 : index
      %c0_15 = arith.constant 0 : index
      %16 = vector.load %arg5[%c0_14, %c0_15] : memref<32x128xf32, #tpu.memory_space<vmem>>, vector<32x128xf32>
      tpu.vector_store %arg5[%c0_14, %c0_15], %15 {strides = array<i32>} : memref<32x128xf32, #tpu.memory_space<vmem>>, vector<32x128xf32>,
      %17 = tpu.iota {dimensions = array<i32: 1>} : vector<32x128xi32>
      %c2_i32 = arith.constant 2 : i32
      %18 = vector.broadcast %c2_i32 : i32 to vector<32x128xi32>
      %19 = arith.cmpi slt, %17, %18 : vector<32x128xi32>
      %cst_16 = arith.constant 0xFF800000 : f32
      %20 = vector.broadcast %cst_16 : f32 to vector<32x128xf32>
      %21 = arith.select %19, %15, %20 : vector<32x128xi1>, vector<32x128xf32>
      %cst_17 = arith.constant dense<0xFF800000> : vector<32xf32>
      %22 = vector.multi_reduction <maximumf>, %21, %cst_17 [1] : vector<32x128xf32> to vector<32xf32>
      %23 = vector.shape_cast %22 : vector<32xf32> to vector<32x1xf32>
      %24 = vector.broadcast %23 : vector<32x1xf32> to vector<32x128xf32>
      %25 = arith.subf %21, %24 : vector<32x128xf32>
      %26 = math.exp %25 : vector<32x128xf32>
      %cst_18 = arith.constant dense<0.000000e+00> : vector<32xf32>
      %27 = vector.multi_reduction <add>, %26, %cst_18 [1] : vector<32x128xf32> to vector<32xf32>
      %28 = vector.shape_cast %27 : vector<32xf32> to vector<32x1xf32>
      %29 = tpu.reciprocal %28 {approx = true} : vector<32x1xf32> -> vector<32x1xf32>
      %30 = vector.broadcast %29 : vector<32x1xf32> to vector<32x128xf32>
      %31 = arith.mulf %26, %30 : vector<32x128xf32>
      %c0_19 = arith.constant 0 : index
      %c0_20 = arith.constant 0 : index
      %32 = vector.load %arg6[%c0_19, %c0_20] : memref<32x128xf32, #tpu.memory_space<vmem>>, vector<32x128xf32>
      tpu.vector_store %arg6[%c0_19, %c0_20], %31 {strides = array<i32>} : memref<32x128xf32, #tpu.memory_space<vmem>>, vector<32x128xf32>,
    } else {
    }
    return
  }
  func.func @transform_0(%arg0: i32, %arg1: i32) -> (i32, i32) {
    %c0_i32 = arith.constant 0 : i32
    return %arg0, %arg1 : i32, i32
  }
  func.func @transform_1(%arg0: i32, %arg1: i32) -> (i32, i32) {
    %c0_i32 = arith.constant 0 : i32
    %c0_i32_0 = arith.constant 0 : i32
    return %arg1, %c0_i32 : i32, i32
  }
  func.func @transform_2(%arg0: i32, %arg1: i32) -> (i32, i32) {
    %c0_i32 = arith.constant 0 : i32
    %c0_i32_0 = arith.constant 0 : i32
    %c0_i32_1 = arith.constant 0 : i32
    return %c0_i32, %c0_i32_0 : i32, i32
  }
  func.func @transform_3(%arg0: i32, %arg1: i32) -> (i32, i32) {
    %c0_i32 = arith.constant 0 : i32
    %c0_i32_0 = arith.constant 0 : i32
    return %arg0, %c0_i32 : i32, i32
  }
  func.func @transform_4(%arg0: i32, %arg1: i32) -> (i32, i32) {
    %c0_i32 = arith.constant 0 : i32
    %c0_i32_0 = arith.constant 0 : i32
    return %arg0, %c0_i32 : i32, i32
  }
}

module attributes {stable_mosaic.version = 11 : i64} {
  func.func @_decode_kernel(%arg0: i32, %arg1: memref<4x128xf32, #tpu.memory_space<vmem>>, %arg2: memref<4x128xf32, #tpu.memory_space<vmem>>, %arg3: memref<4x128xf32, #tpu.memory_space<vmem>>) attributes {dimension_semantics = [#tpu.dimension_semantics<arbitrary>], iteration_bounds = array<i64: 1>, scalar_prefetch = 0 : i64, scratch_operands = 0 : i64, tpu.core_type = #tpu.core_type<tc>, window_params = [{pipeline_mode = #tpu.pipeline_mode<synchronous>, transform_indices = @transform_0, window_bounds = array<i64: 4, 128>}, {pipeline_mode = #tpu.pipeline_mode<synchronous>, transform_indices = @transform_1, window_bounds = array<i64: 4, 128>}, {pipeline_mode = #tpu.pipeline_mode<synchronous>, transform_indices = @transform_2, window_bounds = array<i64: 4, 128>}]} {
    %c0 = arith.constant 0 : index
    %c0_0 = arith.constant 0 : index
    %0 = vector.load %arg1[%c0, %c0_0] : memref<4x128xf32, #tpu.memory_space<vmem>>, vector<4x128xf32>
    %c0_1 = arith.constant 0 : index
    %c0_2 = arith.constant 0 : index
    %1 = vector.load %arg2[%c0_1, %c0_2] : memref<4x128xf32, #tpu.memory_space<vmem>>, vector<4x128xf32>
    %2 = vector.extract_strided_slice %1 {offsets = [2, 0], sizes = [1, 128], strides = [1, 1]} : vector<4x128xf32> to vector<1x128xf32>
    %3 = vector.extract_strided_slice %1 {offsets = [0, 0], sizes = [1, 128], strides = [1, 1]} : vector<4x128xf32> to vector<1x128xf32>
    %4 = arith.subf %2, %3 : vector<1x128xf32>
    %5 = vector.extract_strided_slice %1 {offsets = [3, 0], sizes = [1, 128], strides = [1, 1]} : vector<4x128xf32> to vector<1x128xf32>
    %6 = vector.extract_strided_slice %1 {offsets = [1, 0], sizes = [1, 128], strides = [1, 1]} : vector<4x128xf32> to vector<1x128xf32>
    %7 = arith.subf %5, %6 : vector<1x128xf32>
    %8 = vector.extract_strided_slice %1 {offsets = [0, 0], sizes = [1, 128], strides = [1, 1]} : vector<4x128xf32> to vector<1x128xf32>
    %cst = arith.constant 5.000000e-01 : f32
    %9 = vector.broadcast %cst : f32 to vector<1x128xf32>
    %10 = arith.mulf %9, %4 : vector<1x128xf32>
    %11 = arith.addf %8, %10 : vector<1x128xf32>
    %12 = vector.extract_strided_slice %1 {offsets = [1, 0], sizes = [1, 128], strides = [1, 1]} : vector<4x128xf32> to vector<1x128xf32>
    %cst_3 = arith.constant 5.000000e-01 : f32
    %13 = vector.broadcast %cst_3 : f32 to vector<1x128xf32>
    %14 = arith.mulf %13, %7 : vector<1x128xf32>
    %15 = arith.addf %12, %14 : vector<1x128xf32>
    %16 = vector.extract_strided_slice %0 {offsets = [0, 0], sizes = [1, 128], strides = [1, 1]} : vector<4x128xf32> to vector<1x128xf32>
    %cst_4 = arith.constant 1.000000e-01 : f32
    %17 = vector.broadcast %cst_4 : f32 to vector<1x128xf32>
    %18 = arith.mulf %16, %17 : vector<1x128xf32>
    %19 = vector.extract_strided_slice %0 {offsets = [1, 0], sizes = [1, 128], strides = [1, 1]} : vector<4x128xf32> to vector<1x128xf32>
    %cst_5 = arith.constant 1.000000e-01 : f32
    %20 = vector.broadcast %cst_5 : f32 to vector<1x128xf32>
    %21 = arith.mulf %19, %20 : vector<1x128xf32>
    %22 = vector.extract_strided_slice %0 {offsets = [2, 0], sizes = [1, 128], strides = [1, 1]} : vector<4x128xf32> to vector<1x128xf32>
    %cst_6 = arith.constant 2.000000e-01 : f32
    %23 = vector.broadcast %cst_6 : f32 to vector<1x128xf32>
    %24 = arith.mulf %22, %23 : vector<1x128xf32>
    %cst_7 = arith.constant 4.13516665 : f32
    %25 = vector.broadcast %cst_7 : f32 to vector<1x128xf32>
    %26 = arith.minimumf %24, %25 : vector<1x128xf32>
    %27 = vector.extract_strided_slice %0 {offsets = [3, 0], sizes = [1, 128], strides = [1, 1]} : vector<4x128xf32> to vector<1x128xf32>
    %cst_8 = arith.constant 2.000000e-01 : f32
    %28 = vector.broadcast %cst_8 : f32 to vector<1x128xf32>
    %29 = arith.mulf %27, %28 : vector<1x128xf32>
    %cst_9 = arith.constant 4.13516665 : f32
    %30 = vector.broadcast %cst_9 : f32 to vector<1x128xf32>
    %31 = arith.minimumf %29, %30 : vector<1x128xf32>
    %32 = arith.mulf %18, %4 : vector<1x128xf32>
    %33 = arith.addf %32, %11 : vector<1x128xf32>
    %34 = arith.mulf %21, %7 : vector<1x128xf32>
    %35 = arith.addf %34, %15 : vector<1x128xf32>
    %36 = math.exp %26 : vector<1x128xf32>
    %37 = arith.mulf %36, %4 : vector<1x128xf32>
    %38 = math.exp %31 : vector<1x128xf32>
    %39 = arith.mulf %38, %7 : vector<1x128xf32>
    %cst_10 = arith.constant 5.000000e-01 : f32
    %40 = vector.broadcast %cst_10 : f32 to vector<1x128xf32>
    %41 = arith.mulf %40, %37 : vector<1x128xf32>
    %42 = arith.subf %33, %41 : vector<1x128xf32>
    %cst_11 = arith.constant 5.000000e-01 : f32
    %43 = vector.broadcast %cst_11 : f32 to vector<1x128xf32>
    %44 = arith.mulf %43, %39 : vector<1x128xf32>
    %45 = arith.subf %35, %44 : vector<1x128xf32>
    %cst_12 = arith.constant 5.000000e-01 : f32
    %46 = vector.broadcast %cst_12 : f32 to vector<1x128xf32>
    %47 = arith.mulf %46, %37 : vector<1x128xf32>
    %48 = arith.addf %33, %47 : vector<1x128xf32>
    %cst_13 = arith.constant 5.000000e-01 : f32
    %49 = vector.broadcast %cst_13 : f32 to vector<1x128xf32>
    %50 = arith.mulf %49, %39 : vector<1x128xf32>
    %51 = arith.addf %35, %50 : vector<1x128xf32>
    %cst_14 = arith.constant 0.000000e+00 : f32
    %cst_15 = arith.constant 3.200000e+01 : f32
    %52 = vector.broadcast %cst_14 : f32 to vector<1x128xf32>
    %53 = arith.maximumf %52, %42 : vector<1x128xf32>
    %54 = vector.broadcast %cst_15 : f32 to vector<1x128xf32>
    %55 = arith.minimumf %54, %53 : vector<1x128xf32>
    %cst_16 = arith.constant 0.000000e+00 : f32
    %cst_17 = arith.constant 3.200000e+01 : f32
    %56 = vector.broadcast %cst_16 : f32 to vector<1x128xf32>
    %57 = arith.maximumf %56, %48 : vector<1x128xf32>
    %58 = vector.broadcast %cst_17 : f32 to vector<1x128xf32>
    %59 = arith.minimumf %58, %57 : vector<1x128xf32>
    %cst_18 = arith.constant 0.000000e+00 : f32
    %cst_19 = arith.constant 3.200000e+01 : f32
    %60 = vector.broadcast %cst_18 : f32 to vector<1x128xf32>
    %61 = arith.maximumf %60, %45 : vector<1x128xf32>
    %62 = vector.broadcast %cst_19 : f32 to vector<1x128xf32>
    %63 = arith.minimumf %62, %61 : vector<1x128xf32>
    %cst_20 = arith.constant 0.000000e+00 : f32
    %cst_21 = arith.constant 3.200000e+01 : f32
    %64 = vector.broadcast %cst_20 : f32 to vector<1x128xf32>
    %65 = arith.maximumf %64, %51 : vector<1x128xf32>
    %66 = vector.broadcast %cst_21 : f32 to vector<1x128xf32>
    %67 = arith.minimumf %66, %65 : vector<1x128xf32>
    %68 = tpu.concatenate %55, %63, %59, %67 in 0 : vector<1x128xf32>, vector<1x128xf32>, vector<1x128xf32>, vector<1x128xf32> -> vector<4x128xf32>
    %c0_22 = arith.constant 0 : index
    %c0_23 = arith.constant 0 : index
    %69 = vector.load %arg3[%c0_22, %c0_23] : memref<4x128xf32, #tpu.memory_space<vmem>>, vector<4x128xf32>
    tpu.vector_store %arg3[%c0_22, %c0_23], %68 {strides = array<i32>} : memref<4x128xf32, #tpu.memory_space<vmem>>, vector<4x128xf32>,
    return
  }
  func.func @transform_0(%arg0: i32) -> (i32, i32) {
    %c0_i32 = arith.constant 0 : i32
    %c0_i32_0 = arith.constant 0 : i32
    %c0_i32_1 = arith.constant 0 : i32
    return %c0_i32, %c0_i32_0 : i32, i32
  }
  func.func @transform_1(%arg0: i32) -> (i32, i32) {
    %c0_i32 = arith.constant 0 : i32
    %c0_i32_0 = arith.constant 0 : i32
    %c0_i32_1 = arith.constant 0 : i32
    return %c0_i32, %c0_i32_0 : i32, i32
  }
  func.func @transform_2(%arg0: i32) -> (i32, i32) {
    %c0_i32 = arith.constant 0 : i32
    %c0_i32_0 = arith.constant 0 : i32
    %c0_i32_1 = arith.constant 0 : i32
    return %c0_i32, %c0_i32_0 : i32, i32
  }
}

</mosaic_0001>

<bundles_post_ra>
// kernel: neg.19
= control target key start
LH: loop header
LB: loop body
LE: loop exit
PB: predicated region body
PF: predicated region fallthrough
CT: control target
= control target key end

     0   :  { %s24_s0 = inlined_call_operand.vmem [shape: f32[6,1], index: 0, kind: input, shape index: {}]   ;;  %s25_s1 = inlined_call_operand.vmem [shape: f32[6,1], index: 1, kind: output, shape index: {}]  }
   0x1   :  { %v2_v0 = vld [vmem:[%s24_s0] sm:$0x1] }
   0x2   :  { %v5_v1 = vxor.u32 2147483648, %v2_v0 }
   0x4   :  { %7 = vst [vmem:[%s25_s1] sm:$0x1] %v5_v1 }

// kernel: _lambda_.11
= control target key start
LH: loop header
LB: loop body
LE: loop exit
PB: predicated region body
PF: predicated region fallthrough
CT: control target
= control target key end

     0   :  { %s1305_s15 = smov 0   ;;  %s1431_s0 = inlined_call_operand.vmem [shape: bf16[2,68,17,8], index: 0, kind: input, shape index: {}]   ;;  %s1432_s1 = inlined_call_operand.vmem [shape: bf16[9,8,256], index: 1, kind: input, shape index: {}]   ;;  %s1433_s2 = inlined_call_operand.vmem [shape: f32[1,256], index: 2, kind: input, shape index: {}]   ;;  %s1434_s3 = inlined_call_operand.vmem [shape: bf16[2,16,16,128], index: 3, kind: output, shape index: {0}]   ;;  %s1435_s4 = inlined_call_operand.vmem [shape: bf16[2,16,16,128], index: 4, kind: output, shape index: {1}]  }
   0x1 LB: > { %s1072_s16 = sadd.s32 4294967295, %s1273_s15   ;;  %p1076_p0 = scmp.ge.s32.totalorder %s1273_s15, 1  ;;  %s1273_s15 = sphi %s1305_s15, %s15_s15  }
   0x2   : > { %p165_p1 = scmp.lt.s32.totalorder %s1273_s15, 3 }
   0x4   : > { %p166_p2 = pnand %p1076_p0, %p165_p1 }
   0x5   : > { %p196_p3 = scmp.lt.s32.totalorder (!%p166_p2), %s1072_s16, 1  ;;  %v1316_v0 = vld [vmem:[%s1433_s2] sm:$0x3] (!%p166_p2)  ;;  %s1333_s30 = smov (!%p166_p2), 0  }
   0x6   : > { %169 = sbr.rel (%p166_p2) target bundleno = 296 (0x128), region = 32 }
   0xd   : > { %s1437_s16 = smov (!%p196_p3, %s1072_s16), 1 }
   0xe   : > { %s1215_s19 = smul.u32 816, %s1437_s16  ;;  %s1164_s20 = sshll.u32 %s1437_s16, 7 }
   0xf   : > { %s1321_s23 = scalar_lea.vmem %s1434_s3, %s1164_s20  ;;  %s1326_s26 = scalar_lea.vmem %s1435_s4, %s1164_s20 }
  0x10   : > { %s1331_s29 = scalar_lea.vmem %s1431_s0, %s1215_s19 }
  0x11 LB: >> { %vm247_vm0 = vcmask 1043456   ;;  %v1113_v1 = vld [vmem:[%s1432_s1 + $0x20] sm:$0xff]  ;;  %v1085_v2 = vld [vmem:[%s1432_s1 + $0x8] sm:$0xff]  ;;  %v1279_v8 = vmov 0   ;;  %s1166_s13 = smul.u32 12, %s1277_s30  ;;  %v1131_v16 = vld [vmem:[%s1432_s1 + $0x30] sm:$0xff]  ;;  %s1277_s30 = sphi %s1333_s30, %s218_s30  }
  0x12   : >> { %v1122_v3 = vld [vmem:[%s1432_s1 + $0x28] sm:$0xff]  ;;  %v1116_v4 = vcombine.high %v1113_v1, %v1113_v1  ;;  %v1088_v5 = vcombine.high %v1085_v2, %v1085_v2  ;;  %v1115_v6 = vcombine.low %v1113_v1, %v1113_v1  ;;  %v1087_v7 = vcombine.low %v1085_v2, %v1085_v2  ;;  %286 = vmatprep.mubr.bf16.mxu1 %v1279_v8  ;;  %v224_v9 = vld [vmem:[%s1432_s1] sm:$0xff]  ;;  %v1096_v17 = vld [vmem:[%s1432_s1 + $0x10] sm:$0xff]  ;;  %s1169_s28 = sshll.u32 %s1277_s30, 3  ;;  %s218_s30 = sadd.s32 1, %s1277_s30  }
  0x13   : >> { %579 = vmatprep.mubr.bf16.mxu0 %v1279_v8  ;;  %v1126_v10 = vcombine.high %v1122_v3, %v1122_v3  ;;  %v1125_v11 = vcombine.low %v1122_v3, %v1122_v3  ;;  %v1093_v12 = vcombine.high %v224_v9, %v224_v9  ;;  %v1092_v13 = vcombine.low %v224_v9, %v224_v9  ;;  %s1361_s17 = scalar_lea.vmem %s1331_s29, %s1166_s13  ;;  %v1139_v33 = vld [vmem:[%s1432_s1 + $0x38] sm:$0xff]  ;;  %v1148_v52 = vld [vmem:[%s1432_s1 + $0x40] sm:$0xff]  ;;  %s943_s5 = scalar_lea.vmem %s1321_s23, %s1169_s28 }
  0x14   : >> { %1117 = vmatprep.subr.msk.bf16.mxu0 %vm247_vm0, %v1116_v4  ;;  %1089 = vmatprep.subr.msk.bf16.mxu1 %vm247_vm0, %v1088_v5  ;;  %v542_v14 = vsel %vm247_vm0, %v1115_v6, 0  ;;  %v249_v15 = vsel %vm247_vm0, %v1087_v7, 0  ;;  %vm243_vm1 = vcmask 64512   ;;  %v1238_v18 = vld [vmem:[%s1361_s17 + $0xcc] sm:$0xff]   ;;  %v1239_v20 = vld [vmem:[%s1361_s17 + $0x264] sm:$0xff]   ;;  %v1134_v22 = vcombine.high %v1131_v16, %v1131_v16  ;;  %v1245_v24 = vld [vmem:[%s1361_s17 + $0x198] sm:$0xff]   ;;  %s955_s6 = scalar_lea.vmem %s1326_s26, %s1169_s28 }
  0x15   : >> { %548 = vmatpush1.bf16.msra.mxu0 %v542_v14  ;;  %255 = vmatpush1.bf16.msra.mxu1 %v249_v15  ;;  %v311_v19 = vsel %vm247_vm0, %v1092_v13, 0  ;;  %v628_v21 = vsel %vm247_vm0, %v1125_v11, 0  ;;  %v1100_v23 = vcombine.high %v1096_v17, %v1096_v17  ;;  %v1246_v25 = vld [vmem:[%s1361_s17 + $0x1a0] ss:$0 sps:$4 sm:$0x11]   ;;  %v608_v26 = vshrl.u32 %v1245_v24, 16 }
  0x16   : >> { %1127 = vmatprep.subr.msk.bf16.mxu0 %vm247_vm0, %v1126_v10  ;;  %1094 = vmatprep.subr.msk.bf16.mxu1 %vm247_vm0, %v1093_v12  ;;  %v610_v27 = vshll.u32 %v1245_v24, 16  ;;  %v615_v28 = vshll.u32 %v1246_v25, 16  ;;  %v1251_v29 = vld [vmem:[%s1361_s17] sm:$0xff]   ;;  %v1099_v32 = vcombine.low %v1096_v17, %v1096_v17  ;;  %vm372_vm2 = vsmask.f32 7424  ;;  %v1105_v36 = vld [vmem:[%s1432_s1 + $0x18] sm:$0xff] }
  0x17   : >> { %v1133_v34 = vcombine.low %v1131_v16, %v1131_v16  ;;  %v1252_v35 = vld [vmem:[%s1361_s17 + $0x8] ss:$0 sps:$4 sm:$0x11]   ;;  %v1244_v37 = vld [vmem:[%s1361_s17] sm:$0xff]   ;;  %v376_v39 = vshll.u32 %v1251_v29, 16  ;;  %v1142_v43 = vcombine.high %v1139_v33, %v1139_v33  ;;  %v1108_v44 = vcombine.high %v1105_v36, %v1105_v36  ;;  %v1253_v54 = vld [vmem:[%s1361_s17 + $0xc] sm:$0xff]  }
  0x18   : >> { %1090 = vmatmul.mubr.msk.bf16.vlgmr.msra.gmra.mrb[0].mxu1 %vm243_vm1, %v1238_v18  ;;  %1118 = vmatmul.mubr.msk.bf16.vlgmr.msra.gmra.mrb[0].mxu0 %vm243_vm1, %v1239_v20  ;;  %v612_v30 = vrot.slane %v610_v27, 1  ;;  %v617_v31 = vrot.slane %v615_v28, 1  ;;  %v394_v41 = vsel %vm247_vm0, %v1099_v32, 0  ;;  %v374_v45 = vshrl.u32 %v1251_v29, 16  ;;  %v1261_v58 = vld [vmem:[%s1361_s17 + $0xc] sm:$0xff]   ;;  %v1258_v60 = vld [vmem:[%s1361_s17 + $0x198] sm:$0xff]  }
  0x19   : >> { %317 = vmatpush1.bf16.msra.mxu1 %v311_v19  ;;  %634 = vmatpush1.bf16.msra.mxu0 %v628_v21  ;;  %v702_v42 = vsel %vm247_vm0, %v1133_v34, 0  ;;  %v378_v46 = vrot.slane %v376_v39, 1  ;;  %v381_v47 = vshll.u32 %v1252_v35, 16  ;;  %v1107_v50 = vcombine.low %v1105_v36, %v1105_v36  ;;  %v1259_v61 = vld [vmem:[%s1361_s17 + $0xd8] sm:$0xff]   ;;  %p215_p4 = scmp.ge.s32.totalorder %s218_s30, 16  }
  0x1a   : >> { %348 = vmatprep.mubr.bf16.mxu1 %v1279_v8  ;;  %665 = vmatprep.mubr.bf16.mxu0 %v1279_v8  ;;  %v613_v38 = vor.u32 %v612_v30, %v608_v26  ;;  %v1141_v51 = vcombine.low %v1139_v33, %v1139_v33  ;;  %v1152_v57 = vcombine.high %v1148_v52, %v1148_v52  ;;  %v1262_v62 = vld [vmem:[%s1361_s17 + $0x14] ss:$0 sps:$4 sm:$0x11]   ;;  %v844_v63 = vshll.u32 %v1261_v58, 16 }
  0x1b   : >> { %1135 = vmatprep.subr.msk.bf16.mxu0 %vm247_vm0, %v1134_v22  ;;  %1101 = vmatprep.subr.msk.bf16.mxu1 %vm247_vm0, %v1100_v23  ;;  %v379_v48 = vor.u32 %v378_v46, %v374_v45  ;;  %v383_v49 = vrot.slane %v381_v47, 1  ;;  %v468_v55 = vsel %vm247_vm0, %v1107_v50, 0  ;;  %v1151_v59 = vcombine.low %v1148_v52, %v1148_v52 }
  0x1c   : >> { %v618_v40 = vsel %vm372_vm2, %v613_v38, %v617_v31  ;;  %v776_v56 = vsel %vm247_vm0, %v1141_v51, 0  ;;  %v842_v2 = vshrl.u32 %v1261_v58, 16  ;;  %v846_v3 = vrot.slane %v844_v63, 1 }
  0x1d   : >> { %v384_v53 = vsel %vm372_vm2, %v379_v48, %v383_v49  ;;  %v862_v1 = vsel %vm247_vm0, %v1151_v59, 0  ;;  %v849_v4 = vshll.u32 %v1262_v62, 16  ;;  %v915_v10 = vlaneseq }
  0x1e   : >> { %v847_v5 = vor.u32 %v846_v3, %v842_v2 }
  0x1f   : >> { %v851_v6 = vrot.slane %v849_v4, 1  ;;  %v916_v14 = vshrl.u32 %v915_v10, 7 }
  0x21   : >> { %v852_v7 = vsel %vm372_vm2, %v847_v5, %v851_v6  ;;  %v917_v15 = vsub.s32 0, %v916_v14  ;;  %v921_v16 = vsub.s32 1, %v916_v14 }
  0x23   : >> { %v922_v18 = vrot.slane %v1316_v0, %v921_v16 }
  0x24   : >> { %1095 = vmatmul.mubr.msk.bf16.vlgmr.msra.gmra.mrb[0].mxu1 %vm243_vm1, %v1244_v37  ;;  %1128 = vmatmul.mubr.msk.bf16.vlgmr.msra.gmra.mrb[0].mxu0 %vm243_vm1, %v618_v40 }
  0x25   : >> { %400 = vmatpush1.bf16.msra.mxu1 %v394_v41  ;;  %708 = vmatpush1.bf16.msra.mxu0 %v702_v42 }
  0x26   : >> { %431 = vmatprep.mubr.bf16.mxu1 %v1279_v8  ;;  %739 = vmatprep.mubr.bf16.mxu0 %v1279_v8 }
  0x27   : >> { %1143 = vmatprep.subr.msk.bf16.mxu0 %vm247_vm0, %v1142_v43  ;;  %1109 = vmatprep.subr.msk.bf16.mxu1 %vm247_vm0, %v1108_v44 }
  0x30   : >> { %1102 = vmatmul.mubr.msk.bf16.vlgmr.msra.gmra.mrb[0].mxu1 %vm243_vm1, %v384_v53  ;;  %1136 = vmatmul.mubr.msk.bf16.vlgmr.msra.gmra.mrb[0].mxu0 %vm243_vm1, %v1253_v54 }
  0x31   : >> { %474 = vmatpush1.bf16.msra.mxu1 %v468_v55  ;;  %782 = vmatpush1.bf16.msra.mxu0 %v776_v56 }
  0x32   : >> { %505 = vmatprep.mubr.bf16.mxu1 %v1279_v8  ;;  %813 = vmatprep.mubr.bf16.mxu0 %v1279_v8 }
  0x33   : >> { %1153 = vmatprep.subr.msk.bf16.mxu0 %vm247_vm0, %v1152_v57 }
  0x3c   : >> { %1110 = vmatmul.mubr.msk.bf16.vlgmr.msra.gmra.mrb[0].mxu1 %vm243_vm1, %v1258_v60  ;;  %1144 = vmatmul.mubr.msk.bf16.vlgmr.msra.gmra.mrb[0].mxu0 %vm243_vm1, %v1259_v61 }
  0x3d   : >> { %868 = vmatpush1.bf16.msra.mxu0 %v862_v1  ;;  %899 = vmatprep.mubr.bf16.mxu0 %v1279_v8  ;;  %v918_v8 = vrot.slane %v1316_v0, %v917_v15 }
  0x48   : >> { %1154 = vmatmul.mubr.msk.bf16.vlgmr.msra.gmra.mrb[0].mxu0 %vm243_vm1, %v852_v7 }
 0x10f   : >> { %v507_v9 = vpop.f32.mrb[0].mxu1 }
 0x110   : >> { %v509_v11 = vpop.f32.mrb[1].mxu1 }
 0x111   : >> { %v511_v12 = vpop.f32.mrb[2].mxu1 }
 0x112   : >> { %v513_v13 = vpop.f32.mrb[3].mxu1 }
 0x11b   : >> { %v901_v17 = vpop.f32.mrb[0].mxu0 }
 0x11c   : >> { %v1183_v19 = vadd.f32 %v901_v17, %v507_v9  ;;  %v903_v20 = vpop.f32.mrb[1].mxu0 }
 0x11d   : >> { %v1184_v21 = vadd.f32 %v903_v20, %v509_v11  ;;  %v905_v22 = vpop.f32.mrb[2].mxu0 }
 0x11e   : >> { %v925_v23 = vadd.f32 %v1183_v19, %v918_v8  ;;  %v1185_v24 = vadd.f32 %v905_v22, %v511_v12  ;;  %v907_v25 = vpop.f32.mrb[3].mxu0 }
 0x11f   : >> { %v926_v26 = vadd.f32 %v1184_v21, %v922_v18  ;;  %v1186_v27 = vadd.f32 %v907_v25, %v513_v13 }
 0x120   : >> { %v927_v28 = vadd.f32 %v1185_v24, %v918_v8  ;;  %v929_v30 = vmax.f32 %v925_v23, 0.0 }
 0x121   : >> { %v928_v29 = vadd.f32 %v1186_v27, %v922_v18  ;;  %v930_v32 = vmax.f32 %v926_v26, 0.0  ;;  %217 = sbr.rel (!%p215_p4) target bundleno = 17 (0x11), region = 97 }
 0x122   : >> { %v931_v31 = vmax.f32 %v927_v28, 0.0 }
 0x123   : >> { %v932_v33 = vmax.f32 %v928_v29, 0.0 }
 0x124   : >> { %v1176_v34 = vpack.c.bf16 %v931_v31, %v929_v30 }
 0x125   : >> { %v1181_v35 = vpack.c.bf16 %v932_v33, %v930_v32 }
 0x126   : >> { %1177 = vst [vmem:[%s943_s5] sm:$0xff] %v1176_v34  }
 0x127   : >> { %1182 = vst [vmem:[%s955_s6] sm:$0xff] %v1181_v35  }
 0x128 PF: > { %s15_s15 = sadd.s32 1, %s1273_s15  }
 0x129   : > { %p12_p5 = scmp.ge.s32.totalorder %s15_s15, 4  }
 0x12b   :  { %14 = sbr.rel (!%p12_p5) target bundleno = 1 (0x1), region = 108 }

// kernel: _lambda_.12
= control target key start
LH: loop header
LB: loop body
LE: loop exit
PB: predicated region body
PF: predicated region fallthrough
CT: control target
= control target key end

     0   :  { %s2015_s12 = smov 0   ;;  %s2408_s0 = inlined_call_operand.vmem [shape: bf16[2,18,18,128], index: 0, kind: input, shape index: {}]   ;;  %s2409_s1 = inlined_call_operand.vmem [shape: bf16[9,128,128], index: 1, kind: input, shape index: {}]   ;;  %s2410_s2 = inlined_call_operand.vmem [shape: f32[1,128], index: 2, kind: input, shape index: {}]   ;;  %s2411_s3 = inlined_call_operand.vmem [shape: bf16[2,16,16,128], index: 3, kind: output, shape index: {}]  }
   0x1 LB: > { %s1365_s13 = sadd.s32 4294967295, %s1987_s12   ;;  %p1369_p0 = scmp.ge.s32.totalorder %s1987_s12, 1  ;;  %s1987_s12 = sphi %s2015_s12, %s13_s12  }
   0x2   : > { %p137_p1 = scmp.lt.s32.totalorder %s1987_s12, 3 }
   0x4   : > { %p138_p2 = pnand %p1369_p0, %p137_p1 }
   0x5   : > { %p161_p3 = scmp.lt.s32.totalorder (!%p138_p2), %s1365_s13, 1  ;;  %v2026_v0 = vld [vmem:[%s2410_s2] ss:$0 sm:$0xff] (!%p138_p2)  ;;  %s2038_s24 = smov (!%p138_p2), 0  }
   0x6   : > { %141 = sbr.rel (%p138_p2) target bundleno = 401 (0x191), region = 32 }
   0xd   : > { %s2413_s13 = smov (!%p161_p3, %s1365_s13), 1 }
   0xe   : > { %s1875_s16 = smul.u32 216, %s2413_s13  ;;  %s1604_s17 = sshll.u32 %s2413_s13, 7 }
   0xf   : > { %s2031_s20 = scalar_lea.vmem %s2411_s3, %s1604_s17 }
  0x10   : > { %s2036_s23 = scalar_lea.vmem %s2408_s0, %s1875_s16 }
  0x11 LB: >> { %v1894_v1 = vld [vmem:[%s2409_s1 + $0x40] sm:$0xff]   ;;  %v1993_v2 = vmov 0.0   ;;  %v1896_v4 = vld [vmem:[%s2409_s1 + $0x48] sm:$0xff]   ;;  %vm1994_vm0 = vmmov 0   ;;  %v1898_v6 = vld [vmem:[%s2409_s1 + $0x50] sm:$0xff]   ;;  %s1605_s10 = smul.u32 12, %s1991_s24  ;;  %s1991_s24 = sphi %s2038_s24, %s178_s24  }
  0x12   : >> { %1695 = vmatprep.subr.bf16.mxu0 %v1993_v2  ;;  %1715 = vmatprep.subr.bf16.mxu1 %v1993_v2  ;;  %v1895_v3 = vld [vmem:[%s2409_s1] sm:$0xff]   ;;  %v1897_v5 = vld [vmem:[%s2409_s1 + $0x8] sm:$0xff]   ;;  %v1899_v7 = vld [vmem:[%s2409_s1 + $0x10] sm:$0xff]   ;;  %vm226_vm1 = vsmask.f32 7424  ;;  %vm440_vm2 = vcmask 1046528  }
  0x13   : >> { %1696 = vmatpush3.bf16.msra.mxu0 %v1894_v1  ;;  %1711 = vmatprep.mubr.msk.bf16.mxu0 %vm1994_vm0, %v1993_v2  ;;  %v1900_v8 = vld [vmem:[%s2409_s1 + $0x58] sm:$0xff]   ;;  %s2081_s16 = scalar_lea.vmem %s2036_s23, %s1605_s10  ;;  %v1902_v10 = vld [vmem:[%s2409_s1 + $0x60] sm:$0xff]   ;;  %v1904_v14 = vld [vmem:[%s2409_s1 + $0x68] sm:$0xff]   ;;  %s1608_s10 = sshll.u32 %s1991_s24, 3 }
  0x14   : >> { %1716 = vmatpush3.bf16.msra.mxu1 %v1895_v3  ;;  %1697 = vmatprep.subr.bf16.mxu0 %v1993_v2  ;;  %v1901_v9 = vld [vmem:[%s2409_s1 + $0x18] sm:$0xff]   ;;  %v1903_v11 = vld [vmem:[%s2409_s1 + $0x20] sm:$0xff]   ;;  %v2100_v16 = vld [vmem:[%s2081_s16 + $0x8] ss:$0 sps:$4 sm:$0x11]   ;;  %s1292_s11 = scalar_lea.vmem %s2031_s20, %s1608_s10  ;;  %s178_s24 = sadd.s32 1, %s1991_s24  }
  0x15   : >> { %1717 = vmatprep.subr.bf16.mxu1 %v1993_v2  ;;  %1731 = vmatprep.mubr.msk.bf16.mxu1 %vm1994_vm0, %v1993_v2  ;;  %v182_v12 = vld [vmem:[%s2081_s16] sm:$0xf]  ;;  %v2093_v13 = vld [vmem:[%s2081_s16 + $0x4] sm:$0xf]  ;;  %v1905_v17 = vld [vmem:[%s2409_s1 + $0x28] sm:$0xff]   ;;  %v235_v22 = vshll.u32 %v2100_v16, 16 }
  0x16   : >> { %v1390_v15 = vcombine.low %v182_v12, %v2093_v13  ;;  %v1906_v19 = vld [vmem:[%s2409_s1 + $0x70] sm:$0xff]   ;;  %v1908_v24 = vld [vmem:[%s2409_s1 + $0x78] sm:$0xff]   ;;  %v1912_v29 = vld [vmem:[%s2409_s1 + $0x80] sm:$0xff]   ;;  %v442_v52 = vrot.slane %v2100_v16, 1  ;;  %p175_p4 = scmp.ge.s32.totalorder %s178_s24, 16  }
  0x17   : >> { %1698 = vmatpush3.bf16.msra.mxu0 %v1896_v4  ;;  %v1907_v23 = vld [vmem:[%s2409_s1 + $0x30] sm:$0xff]   ;;  %v1909_v25 = vld [vmem:[%s2409_s1 + $0x38] sm:$0xff]   ;;  %v237_v27 = vrot.slane %v235_v22, 1  ;;  %v1913_v30 = vld [vmem:[%s2409_s1 + $0xc0] sm:$0xff]  }
  0x18   : >> { %1718 = vmatpush3.bf16.msra.mxu1 %v1897_v5  ;;  %1699 = vmatprep.subr.bf16.mxu0 %v1993_v2  ;;  %v230_v18 = vshll.u32 %v1390_v15, 16  ;;  %v228_v20 = vshrl.u32 %v1390_v15, 16  ;;  %v1914_v31 = vld [vmem:[%s2409_s1 + $0x88] sm:$0xff]   ;;  %v1916_v33 = vld [vmem:[%s2409_s1 + $0x90] sm:$0xff]   ;;  %v1918_v35 = vld [vmem:[%s2409_s1 + $0x98] sm:$0xff]  }
  0x19   : >> { %1719 = vmatprep.subr.bf16.mxu1 %v1993_v2  ;;  %v1915_v32 = vld [vmem:[%s2409_s1 + $0xc8] sm:$0xff]   ;;  %v1917_v34 = vld [vmem:[%s2409_s1 + $0xd0] sm:$0xff]   ;;  %v1919_v36 = vld [vmem:[%s2409_s1 + $0xd8] sm:$0xff]  }
  0x1a   : >> { %v232_v21 = vrot.slane %v230_v18, 1  ;;  %v1920_v37 = vld [vmem:[%s2409_s1 + $0xa0] sm:$0xff]   ;;  %v1922_v39 = vld [vmem:[%s2409_s1 + $0xa8] sm:$0xff]   ;;  %v2180_v43 = vld [vmem:[%s2081_s16 + $0x10] sm:$0xf] }
  0x1b   : >> { %1700 = vmatpush3.bf16.msra.mxu0 %v1898_v6  ;;  %v1921_v38 = vld [vmem:[%s2409_s1 + $0xe0] sm:$0xff]   ;;  %v1923_v40 = vld [vmem:[%s2409_s1 + $0xe8] sm:$0xff]   ;;  %v2184_v45 = vld [vmem:[%s2081_s16 + $0x14] ss:$0 sps:$4 sm:$0x11]  }
  0x1c   : >> { %1720 = vmatpush3.bf16.msra.mxu1 %v1899_v7  ;;  %1701 = vmatprep.subr.bf16.mxu0 %v1993_v2  ;;  %v233_v26 = vor.u32 %v232_v21, %v228_v20  ;;  %v419_v41 = vld [vmem:[%s2081_s16] sm:$0xe]  ;;  %v1460_v42 = vld [vmem:[%s2081_s16 + $0xc] sm:$0xf]  ;;  %v1924_v46 = vld [vmem:[%s2409_s1 + $0xb0] sm:$0xff]   ;;  %v692_v51 = vshll.u32 %v2184_v45, 16 }
  0x1d   : >> { %1721 = vmatprep.subr.bf16.mxu1 %v1993_v2  ;;  %v1479_v44 = vcombine.low %v1460_v42, %v2180_v43  ;;  %v1424_v47 = vcombine.low %v419_v41, %v2093_v13  ;;  %v1925_v48 = vld [vmem:[%s2409_s1 + $0xf0] sm:$0xff]   ;;  %v1926_v55 = vld [vmem:[%s2409_s1 + $0xb8] sm:$0xff]   ;;  %v1929_v59 = vld [vmem:[%s2409_s1 + $0x100] sm:$0xff]  }
  0x1e   : >> { %v238_v28 = vsel %vm226_vm1, %v233_v26, %v237_v27  ;;  %v694_v54 = vrot.slane %v692_v51, 1  ;;  %v1927_v57 = vld [vmem:[%s2409_s1 + $0xf8] sm:$0xff]   ;;  %v1930_v62 = vld [vmem:[%s2081_s16 + $0xc] sm:$0xff]   ;;  %v1931_v63 = vld [vmem:[%s2409_s1 + $0x140] sm:$0xff]  }
  0x1f   : >> { %1702 = vmatpush3.bf16.msra.mxu0 %v1900_v8  ;;  %v685_v49 = vshrl.u32 %v1479_v44, 16  ;;  %v687_v50 = vshll.u32 %v1479_v44, 16  ;;  %v441_v56 = vrot.slane %v1424_v47, 1  ;;  %v1932_v1 = vld [vmem:[%s2409_s1 + $0x108] sm:$0xff]   ;;  %v1934_v4 = vld [vmem:[%s2409_s1 + $0x110] sm:$0xff]   ;;  %v1936_v8 = vld [vmem:[%s2409_s1 + $0x118] sm:$0xff]  }
  0x20   : >> { %1722 = vmatpush3.bf16.msra.mxu1 %v1901_v9  ;;  %1703 = vmatprep.subr.bf16.mxu0 %v1993_v2  ;;  %v1933_v3 = vld [vmem:[%s2409_s1 + $0x148] sm:$0xff]   ;;  %v1935_v5 = vld [vmem:[%s2409_s1 + $0x150] sm:$0xff]   ;;  %v1542_v6 = vld [vmem:[%s2081_s16 + $0x18] sm:$0xf] }
  0x21   : >> { %1723 = vmatprep.subr.bf16.mxu1 %v1993_v2  ;;  %v689_v53 = vrot.slane %v687_v50, 1  ;;  %v443_v61 = vsel %vm440_vm2, %v441_v56, %v442_v52  ;;  %v1543_v7 = vld [vmem:[%s2081_s16 + $0x1c] sm:$0xf]  ;;  %v1939_v18 = vld [vmem:[%s2409_s1 + $0x160] sm:$0xff]   ;;  %v1571_v20 = vld [vmem:[%s2081_s16 + $0x18] sm:$0xe] }
  0x22   : >> { %v1561_v9 = vcombine.low %v1542_v6, %v1543_v7  ;;  %v1588_v22 = vcombine.low %v1571_v20, %v1543_v7  ;;  %v1489_v27 = vld [vmem:[%s2081_s16 + $0xc] sm:$0xe]  ;;  %v1953_v41 = vld [vmem:[%s2409_s1 + $0x190] sm:$0xff]   ;;  %v1956_v44 = vld [vmem:[%s2409_s1 + $0x1d8] sm:$0xff]  }
  0x23   : >> { %1704 = vmatpush3.bf16.msra.mxu0 %v1902_v10  ;;  %v690_v58 = vor.u32 %v689_v53, %v685_v49  ;;  %v1968_v10 = vld [vmem:[%s2081_s16 + $0x20] ss:$0 sps:$4 sm:$0x11]   ;;  %v1954_v42 = vld [vmem:[%s2409_s1 + $0x1d0] sm:$0xff]   ;;  %v1959_v47 = vld [vmem:[%s2409_s1 + $0x1a8] sm:$0xff]  }
  0x24   : >> { %1724 = vmatpush3.bf16.msra.mxu1 %v1903_v11  ;;  %1705 = vmatprep.subr.bf16.mxu0 %v1993_v2  ;;  %v1937_v11 = vld [vmem:[%s2409_s1 + $0x158] sm:$0xff]   ;;  %v1053_v12 = vshrl.u32 %v1561_v9, 16  ;;  %v1055_v13 = vshll.u32 %v1561_v9, 16  ;;  %v1177_v26 = vrot.slane %v1588_v22, 1  ;;  %v1961_v49 = vld [vmem:[%s2409_s1 + $0x1b0] sm:$0xff]  }
  0x25   : >> { %1725 = vmatprep.subr.bf16.mxu1 %v1993_v2  ;;  %v2209_v60 = vsel %vm226_vm1, %v690_v58, %v694_v54  ;;  %v1962_v50 = vld [vmem:[%s2409_s1 + $0x1f0] sm:$0xff]   ;;  %v1963_v51 = vld [vmem:[%s2409_s1 + $0x1b8] sm:$0xff]   ;;  %v1966_v54 = vld [vmem:[%s2409_s1 + $0x200] sm:$0xff]  }
  0x26   : >> { %v1057_v16 = vrot.slane %v1055_v13, 1  ;;  %v1964_v52 = vld [vmem:[%s2409_s1 + $0x1f8] sm:$0xff]   ;;  %v1970_v56 = vld [vmem:[%s2409_s1 + $0x210] sm:$0xff]   ;;  %v1972_v58 = vld [vmem:[%s2409_s1 + $0x220] sm:$0xff]  }
  0x27   : >> { %1706 = vmatpush3.bf16.msra.mxu0 %v1904_v14  ;;  %v1060_v14 = vshll.u32 %v1968_v10, 16  ;;  %v1965_v53 = vld [vmem:[%s2081_s16 + $0x18] sm:$0xff]  }
  0x28   : >> { %1726 = vmatpush3.bf16.msra.mxu1 %v1905_v17  ;;  %1707 = vmatprep.subr.bf16.mxu0 %v1993_v2 }
  0x29   : >> { %1727 = vmatprep.subr.bf16.mxu1 %v1993_v2  ;;  %v1062_v17 = vrot.slane %v1060_v14, 1 }
  0x2b   : >> { %1708 = vmatpush3.bf16.msra.mxu0 %v1906_v19  ;;  %v1058_v19 = vor.u32 %v1057_v16, %v1053_v12 }
  0x2c   : >> { %1728 = vmatpush3.bf16.msra.mxu1 %v1907_v23  ;;  %1709 = vmatprep.subr.bf16.mxu0 %v1993_v2  ;;  %v1178_v23 = vrot.slane %v1968_v10, 1 }
  0x2d   : >> { %1729 = vmatprep.subr.bf16.mxu1 %v1993_v2  ;;  %v2259_v21 = vsel %vm226_vm1, %v1058_v19, %v1062_v17 }
  0x2f   : >> { %1710 = vmatpush3.bf16.msra.mxu0 %v1908_v24  ;;  %v1940_v24 = vld [vmem:[%s2409_s1 + $0x128] sm:$0xff]  }
  0x30   : >> { %1730 = vmatpush3.bf16.msra.mxu1 %v1909_v25  ;;  %1735 = vmatprep.subr.bf16.mxu0 %v1993_v2  ;;  %v1941_v25 = vld [vmem:[%s2409_s1 + $0x168] sm:$0xff]  }
  0x31   : >> { %1755 = vmatprep.subr.bf16.mxu1 %v1993_v2 }
  0x32   : >> { %1712 = vmatmul.mubr.bf16.vlgmr.msra.gmra.mrb[0].mxu0 %v238_v28  ;;  %v2271_v28 = vsel %vm440_vm2, %v1177_v26, %v1178_v23 }
  0x33   : >> { %1732 = vmatmul.mubr.bf16.vlgmr.msra.gmra.mrb[0].mxu1 %v1390_v15  ;;  %1736 = vmatpush3.bf16.msra.mxu0 %v1912_v29  ;;  %v1938_v15 = vld [vmem:[%s2409_s1 + $0x120] sm:$0xff]   ;;  %v1942_v29 = vld [vmem:[%s2409_s1 + $0x130] sm:$0xff]  }
  0x34   : >> { %1756 = vmatpush3.bf16.msra.mxu1 %v1913_v30  ;;  %1737 = vmatprep.subr.bf16.mxu0 %v1993_v2  ;;  %v1943_v30 = vld [vmem:[%s2409_s1 + $0x170] sm:$0xff]  }
  0x35   : >> { %1757 = vmatprep.subr.bf16.mxu1 %v1993_v2  ;;  %1751 = vmatprep.mubr.msk.bf16.mxu0 %vm1994_vm0, %v1993_v2 }
  0x36   : >> { %1771 = vmatprep.mubr.msk.bf16.mxu1 %vm1994_vm0, %v1993_v2 }
  0x37   : >> { %1738 = vmatpush3.bf16.msra.mxu0 %v1914_v31  ;;  %v1506_v31 = vcombine.low %v1489_v27, %v2180_v43  ;;  %v1955_v43 = vld [vmem:[%s2409_s1 + $0x198] sm:$0xff]  }
  0x38   : >> { %1758 = vmatpush3.bf16.msra.mxu1 %v1915_v32  ;;  %1739 = vmatprep.subr.bf16.mxu0 %v1993_v2  ;;  %v1944_v32 = vld [vmem:[%s2409_s1 + $0x138] sm:$0xff]  }
  0x39   : >> { %1759 = vmatprep.subr.bf16.mxu1 %v1993_v2 }
  0x3b   : >> { %1740 = vmatpush3.bf16.msra.mxu0 %v1916_v33  ;;  %v1945_v33 = vld [vmem:[%s2409_s1 + $0x178] sm:$0xff]  }
  0x3c   : >> { %1760 = vmatpush3.bf16.msra.mxu1 %v1917_v34  ;;  %1741 = vmatprep.subr.bf16.mxu0 %v1993_v2  ;;  %v809_v34 = vrot.slane %v1506_v31, 1 }
  0x3d   : >> { %1761 = vmatprep.subr.bf16.mxu1 %v1993_v2 }
  0x3f   : >> { %1742 = vmatpush3.bf16.msra.mxu0 %v1918_v35  ;;  %v810_v35 = vrot.slane %v2184_v45, 1  ;;  %v1957_v45 = vld [vmem:[%s2409_s1 + $0x1a0] sm:$0xff]  }
  0x40   : >> { %1762 = vmatpush3.bf16.msra.mxu1 %v1919_v36  ;;  %1743 = vmatprep.subr.bf16.mxu0 %v1993_v2  ;;  %v1948_v36 = vld [vmem:[%s2409_s1 + $0x180] sm:$0xff]  }
  0x41   : >> { %1763 = vmatprep.subr.bf16.mxu1 %v1993_v2 }
  0x43   : >> { %1744 = vmatpush3.bf16.msra.mxu0 %v1920_v37  ;;  %v811_v37 = vsel %vm440_vm2, %v809_v34, %v810_v35 }
  0x44   : >> { %1764 = vmatpush3.bf16.msra.mxu1 %v1921_v38  ;;  %1745 = vmatprep.subr.bf16.mxu0 %v1993_v2  ;;  %v1950_v38 = vld [vmem:[%s2409_s1 + $0x1c0] sm:$0xff]  }
  0x45   : >> { %1765 = vmatprep.subr.bf16.mxu1 %v1993_v2 }
  0x47   : >> { %1746 = vmatpush3.bf16.msra.mxu0 %v1922_v39  ;;  %v1951_v39 = vld [vmem:[%s2409_s1 + $0x188] sm:$0xff]  }
  0x48   : >> { %1766 = vmatpush3.bf16.msra.mxu1 %v1923_v40  ;;  %1747 = vmatprep.subr.bf16.mxu0 %v1993_v2  ;;  %v1952_v40 = vld [vmem:[%s2409_s1 + $0x1c8] sm:$0xff]  }
  0x49   : >> { %1767 = vmatprep.subr.bf16.mxu1 %v1993_v2 }
  0x4b   : >> { %1748 = vmatpush3.bf16.msra.mxu0 %v1924_v46  ;;  %v1958_v46 = vld [vmem:[%s2409_s1 + $0x1e0] sm:$0xff]  }
  0x4c   : >> { %1768 = vmatpush3.bf16.msra.mxu1 %v1925_v48  ;;  %1749 = vmatprep.subr.bf16.mxu0 %v1993_v2  ;;  %v1960_v48 = vld [vmem:[%s2409_s1 + $0x1e8] sm:$0xff]  }
  0x4d   : >> { %1769 = vmatprep.subr.bf16.mxu1 %v1993_v2 }
  0x4f   : >> { %1750 = vmatpush3.bf16.msra.mxu0 %v1926_v55  ;;  %v1969_v55 = vld [vmem:[%s2409_s1 + $0x208] sm:$0xff]  }
  0x50   : >> { %1770 = vmatpush3.bf16.msra.mxu1 %v1927_v57  ;;  %1775 = vmatprep.subr.bf16.mxu0 %v1993_v2  ;;  %v1971_v57 = vld [vmem:[%s2409_s1 + $0x218] sm:$0xff]  }
  0x51   : >> { %1795 = vmatprep.subr.bf16.mxu1 %v1993_v2 }
  0x52   : >> { %1752 = vmatmul.mubr.bf16.vlgmr.msra.gmra.mrb[4].mxu0 %v443_v61  ;;  %v1975_v61 = vld [vmem:[%s2409_s1 + $0x238] sm:$0xff]  }
  0x53   : >> { %1776 = vmatpush3.bf16.msra.mxu0 %v1929_v59  ;;  %1772 = vmatmul.mubr.bf16.vlgmr.msra.gmra.mrb[4].mxu1 %v1930_v62  ;;  %v1973_v59 = vld [vmem:[%s2409_s1 + $0x228] sm:$0xff]  }
  0x54   : >> { %1796 = vmatpush3.bf16.msra.mxu1 %v1931_v63  ;;  %1777 = vmatprep.subr.bf16.mxu0 %v1993_v2 }
  0x55   : >> { %1797 = vmatprep.subr.bf16.mxu1 %v1993_v2  ;;  %1791 = vmatprep.mubr.msk.bf16.mxu0 %vm1994_vm0, %v1993_v2 }
  0x56   : >> { %1811 = vmatprep.mubr.msk.bf16.mxu1 %vm1994_vm0, %v1993_v2 }
  0x57   : >> { %1778 = vmatpush3.bf16.msra.mxu0 %v1932_v1 }
  0x58   : >> { %1798 = vmatpush3.bf16.msra.mxu1 %v1933_v3  ;;  %1779 = vmatprep.subr.bf16.mxu0 %v1993_v2 }
  0x59   : >> { %1799 = vmatprep.subr.bf16.mxu1 %v1993_v2 }
  0x5b   : >> { %1780 = vmatpush3.bf16.msra.mxu0 %v1934_v4 }
  0x5c   : >> { %1800 = vmatpush3.bf16.msra.mxu1 %v1935_v5  ;;  %1781 = vmatprep.subr.bf16.mxu0 %v1993_v2 }
  0x5d   : >> { %1801 = vmatprep.subr.bf16.mxu1 %v1993_v2 }
  0x5f   : >> { %1782 = vmatpush3.bf16.msra.mxu0 %v1936_v8 }
  0x60   : >> { %1802 = vmatpush3.bf16.msra.mxu1 %v1937_v11  ;;  %1783 = vmatprep.subr.bf16.mxu0 %v1993_v2 }
  0x61   : >> { %1803 = vmatprep.subr.bf16.mxu1 %v1993_v2 }
  0x63   : >> { %1784 = vmatpush3.bf16.msra.mxu0 %v1938_v15 }
  0x64   : >> { %1804 = vmatpush3.bf16.msra.mxu1 %v1939_v18  ;;  %1785 = vmatprep.subr.bf16.mxu0 %v1993_v2 }
  0x65   : >> { %1805 = vmatprep.subr.bf16.mxu1 %v1993_v2 }
  0x67   : >> { %1786 = vmatpush3.bf16.msra.mxu0 %v1940_v24 }
  0x68   : >> { %1806 = vmatpush3.bf16.msra.mxu1 %v1941_v25  ;;  %1787 = vmatprep.subr.bf16.mxu0 %v1993_v2 }
  0x69   : >> { %1807 = vmatprep.subr.bf16.mxu1 %v1993_v2 }
  0x6b   : >> { %1788 = vmatpush3.bf16.msra.mxu0 %v1942_v29 }
  0x6c   : >> { %1808 = vmatpush3.bf16.msra.mxu1 %v1943_v30  ;;  %1789 = vmatprep.subr.bf16.mxu0 %v1993_v2 }
  0x6d   : >> { %1809 = vmatprep.subr.bf16.mxu1 %v1993_v2 }
  0x6f   : >> { %1790 = vmatpush3.bf16.msra.mxu0 %v1944_v32 }
  0x70   : >> { %1810 = vmatpush3.bf16.msra.mxu1 %v1945_v33  ;;  %1815 = vmatprep.subr.bf16.mxu0 %v1993_v2 }
  0x71   : >> { %1835 = vmatprep.subr.bf16.mxu1 %v1993_v2 }
  0x72   : >> { %1792 = vmatmul.mubr.bf16.vlgmr.msra.gmra.mrb[8].mxu0 %v2209_v60  ;;  %v1974_v60 = vld [vmem:[%s2409_s1 + $0x230] sm:$0xff]  }
  0x73   : >> { %1816 = vmatpush3.bf16.msra.mxu0 %v1948_v36  ;;  %1812 = vmatmul.mubr.bf16.vlgmr.msra.gmra.mrb[8].mxu1 %v811_v37 }
  0x74   : >> { %1836 = vmatpush3.bf16.msra.mxu1 %v1950_v38  ;;  %1817 = vmatprep.subr.bf16.mxu0 %v1993_v2 }
  0x75   : >> { %1837 = vmatprep.subr.bf16.mxu1 %v1993_v2  ;;  %1831 = vmatprep.mubr.msk.bf16.mxu0 %vm1994_vm0, %v1993_v2 }
  0x76   : >> { %1851 = vmatprep.mubr.msk.bf16.mxu1 %vm1994_vm0, %v1993_v2 }
  0x77   : >> { %1818 = vmatpush3.bf16.msra.mxu0 %v1951_v39 }
  0x78   : >> { %1838 = vmatpush3.bf16.msra.mxu1 %v1952_v40  ;;  %1819 = vmatprep.subr.bf16.mxu0 %v1993_v2 }
  0x79   : >> { %1839 = vmatprep.subr.bf16.mxu1 %v1993_v2 }
  0x7b   : >> { %1820 = vmatpush3.bf16.msra.mxu0 %v1953_v41 }
  0x7c   : >> { %1840 = vmatpush3.bf16.msra.mxu1 %v1954_v42  ;;  %1821 = vmatprep.subr.bf16.mxu0 %v1993_v2 }
  0x7d   : >> { %1841 = vmatprep.subr.bf16.mxu1 %v1993_v2 }
  0x7f   : >> { %1822 = vmatpush3.bf16.msra.mxu0 %v1955_v43 }
  0x80   : >> { %1842 = vmatpush3.bf16.msra.mxu1 %v1956_v44  ;;  %1823 = vmatprep.subr.bf16.mxu0 %v1993_v2 }
  0x81   : >> { %1843 = vmatprep.subr.bf16.mxu1 %v1993_v2 }
  0x83   : >> { %1824 = vmatpush3.bf16.msra.mxu0 %v1957_v45 }
  0x84   : >> { %1844 = vmatpush3.bf16.msra.mxu1 %v1958_v46  ;;  %1825 = vmatprep.subr.bf16.mxu0 %v1993_v2 }
  0x85   : >> { %1845 = vmatprep.subr.bf16.mxu1 %v1993_v2 }
  0x87   : >> { %1826 = vmatpush3.bf16.msra.mxu0 %v1959_v47 }
  0x88   : >> { %1846 = vmatpush3.bf16.msra.mxu1 %v1960_v48  ;;  %1827 = vmatprep.subr.bf16.mxu0 %v1993_v2 }
  0x89   : >> { %1847 = vmatprep.subr.bf16.mxu1 %v1993_v2 }
  0x8b   : >> { %1828 = vmatpush3.bf16.msra.mxu0 %v1961_v49 }
  0x8c   : >> { %1848 = vmatpush3.bf16.msra.mxu1 %v1962_v50  ;;  %1829 = vmatprep.subr.bf16.mxu0 %v1993_v2 }
  0x8d   : >> { %1849 = vmatprep.subr.bf16.mxu1 %v1993_v2 }
  0x8f   : >> { %1830 = vmatpush3.bf16.msra.mxu0 %v1963_v51 }
  0x90   : >> { %1850 = vmatpush3.bf16.msra.mxu1 %v1964_v52  ;;  %1855 = vmatprep.subr.bf16.mxu0 %v1993_v2 }
  0x92   : >> { %1832 = vmatmul.mubr.bf16.vlgmr.msra.gmra.mrb[12].mxu0 %v1965_v53 }
  0x93   : >> { %1856 = vmatpush3.bf16.msra.mxu0 %v1966_v54  ;;  %1852 = vmatmul.mubr.bf16.vlgmr.msra.gmra.mrb[12].mxu1 %v2259_v21 }
  0x94   : >> { %1857 = vmatprep.subr.bf16.mxu0 %v1993_v2  ;;  %1871 = vmatprep.mubr.msk.bf16.mxu0 %vm1994_vm0, %v1993_v2 }
  0x97   : >> { %1858 = vmatpush3.bf16.msra.mxu0 %v1969_v55 }
  0x98   : >> { %1859 = vmatprep.subr.bf16.mxu0 %v1993_v2 }
  0x9b   : >> { %1860 = vmatpush3.bf16.msra.mxu0 %v1970_v56 }
  0x9c   : >> { %1861 = vmatprep.subr.bf16.mxu0 %v1993_v2 }
  0x9f   : >> { %1862 = vmatpush3.bf16.msra.mxu0 %v1971_v57 }
  0xa0   : >> { %1863 = vmatprep.subr.bf16.mxu0 %v1993_v2 }
  0xa3   : >> { %1864 = vmatpush3.bf16.msra.mxu0 %v1972_v58 }
  0xa4   : >> { %1865 = vmatprep.subr.bf16.mxu0 %v1993_v2 }
  0xa7   : >> { %1866 = vmatpush3.bf16.msra.mxu0 %v1973_v59 }
  0xa8   : >> { %1867 = vmatprep.subr.bf16.mxu0 %v1993_v2 }
  0xab   : >> { %1868 = vmatpush3.bf16.msra.mxu0 %v1974_v60 }
  0xac   : >> { %1869 = vmatprep.subr.bf16.mxu0 %v1993_v2 }
  0xaf   : >> { %1870 = vmatpush3.bf16.msra.mxu0 %v1975_v61 }
  0xb2   : >> { %1872 = vmatmul.mubr.bf16.vlgmr.msra.gmra.mrb[16].mxu0 %v2271_v28 }
 0x105   : >> { %v322_v62 = vpop.f32.mrb[0].mxu0 }
 0x106   : >> { %v412_v63 = vpop.f32.mrb[0].mxu1  ;;  %v1713_v1 = vpop.f32.mrb[1].mxu0 }
 0x107   : >> { %v413_v3 = vadd.f32 %v412_v63, %v322_v62  ;;  %v1733_v4 = vpop.f32.mrb[1].mxu1  ;;  %v325_v5 = vpop.f32.mrb[2].mxu0 }
 0x108   : >> { %v415_v6 = vpop.f32.mrb[2].mxu1  ;;  %v1714_v7 = vpop.f32.mrb[3].mxu0 }
 0x109   : >> { %v416_v8 = vadd.f32 %v415_v6, %v325_v5  ;;  %v1734_v9 = vpop.f32.mrb[3].mxu1 }
 0x125   : >> { %v527_v10 = vpop.f32.mrb[4].mxu0 }
 0x126   : >> { %v534_v11 = vadd.f32 %v527_v10, %v413_v3  ;;  %v1753_v12 = vpop.f32.mrb[5].mxu0  ;;  %v647_v13 = vpop.f32.mrb[4].mxu1 }
 0x127   : >> { %v530_v14 = vpop.f32.mrb[6].mxu0  ;;  %v1773_v15 = vpop.f32.mrb[5].mxu1 }
 0x128   : >> { %v535_v2 = vadd.f32 %v530_v14, %v416_v8  ;;  %v654_v16 = vadd.f32 %v647_v13, %v534_v11  ;;  %v1754_v17 = vpop.f32.mrb[7].mxu0  ;;  %v650_v18 = vpop.f32.mrb[6].mxu1 }
 0x129   : >> { %v1774_v19 = vpop.f32.mrb[7].mxu1 }
 0x12a   : >> { %v655_v20 = vadd.f32 %v650_v18, %v535_v2 }
 0x145   : >> { %v779_v21 = vpop.f32.mrb[8].mxu0 }
 0x146   : >> { %v786_v22 = vadd.f32 %v779_v21, %v654_v16  ;;  %v1793_v23 = vpop.f32.mrb[9].mxu0  ;;  %v895_v24 = vpop.f32.mrb[8].mxu1 }
 0x147   : >> { %v782_v25 = vpop.f32.mrb[10].mxu0  ;;  %v1813_v26 = vpop.f32.mrb[9].mxu1 }
 0x148   : >> { %v787_v27 = vadd.f32 %v782_v25, %v655_v20  ;;  %v902_v28 = vadd.f32 %v895_v24, %v786_v22  ;;  %v1794_v29 = vpop.f32.mrb[11].mxu0  ;;  %v898_v30 = vpop.f32.mrb[10].mxu1 }
 0x149   : >> { %v1814_v31 = vpop.f32.mrb[11].mxu1 }
 0x14a   : >> { %v903_v32 = vadd.f32 %v898_v30, %v787_v27 }
 0x165   : >> { %v1015_v33 = vpop.f32.mrb[12].mxu0 }
 0x166   : >> { %v1022_v34 = vadd.f32 %v1015_v33, %v902_v28  ;;  %v1833_v35 = vpop.f32.mrb[13].mxu0  ;;  %v1147_v36 = vpop.f32.mrb[12].mxu1 }
 0x167   : >> { %v1018_v37 = vpop.f32.mrb[14].mxu0  ;;  %v1853_v38 = vpop.f32.mrb[13].mxu1 }
 0x168   : >> { %v1023_v39 = vadd.f32 %v1018_v37, %v903_v32  ;;  %v1154_v40 = vadd.f32 %v1147_v36, %v1022_v34  ;;  %v1834_v41 = vpop.f32.mrb[15].mxu0  ;;  %v1150_v42 = vpop.f32.mrb[14].mxu1 }
 0x169   : >> { %v1854_v43 = vpop.f32.mrb[15].mxu1 }
 0x16a   : >> { %v1155_v44 = vadd.f32 %v1150_v42, %v1023_v39 }
 0x185   : >> { %v1263_v45 = vpop.f32.mrb[16].mxu0 }
 0x186   : >> { %v1270_v46 = vadd.f32 %v1263_v45, %v1154_v40  ;;  %v1873_v47 = vpop.f32.mrb[17].mxu0 }
 0x187   : >> { %v1266_v48 = vpop.f32.mrb[18].mxu0 }
 0x188   : >> { %v1278_v49 = vadd.f32 %v2026_v0, %v1270_v46  ;;  %v1271_v50 = vadd.f32 %v1266_v48, %v1155_v44  ;;  %v1874_v51 = vpop.f32.mrb[19].mxu0 }
 0x18a   : >> { %v1279_v52 = vadd.f32 %v2026_v0, %v1271_v50  ;;  %v1280_v53 = vmax.f32 %v1278_v49, 0.0  ;;  %177 = sbr.rel (!%p175_p4) target bundleno = 17 (0x11), region = 81 }
 0x18c   : >> { %v1281_v54 = vmax.f32 %v1279_v52, 0.0 }
 0x18e   : >> { %v1612_v55 = vpack.c.bf16 %v1281_v54, %v1280_v53 }
 0x190   : >> { %1613 = vst [vmem:[%s1292_s11] sm:$0xff] %v1612_v55  }
 0x191 PF: > { %s13_s12 = sadd.s32 1, %s1987_s12  }
 0x192   : > { %p10_p5 = scmp.ge.s32.totalorder %s13_s12, 4  }
 0x194   :  { %12 = sbr.rel (!%p10_p5) target bundleno = 1 (0x1), region = 92 }

// kernel: _lambda_.13
= control target key start
LH: loop header
LB: loop body
LE: loop exit
PB: predicated region body
PF: predicated region fallthrough
CT: control target
= control target key end

     0   :  { %s1708_s1 = inlined_call_operand.vmem [shape: bf16[128,128], index: 1, kind: input, shape index: {}]   ;;  %s1709_s0 = inlined_call_operand.vmem [shape: bf16[512,128], index: 0, kind: input, shape index: {}]   ;;  %s1710_s2 = inlined_call_operand.vmem [shape: f32[1,128], index: 2, kind: input, shape index: {}]   ;;  %s1711_s3 = inlined_call_operand.vmem [shape: f32[512,128], index: 3, kind: output, shape index: {}]  }
   0x1   :  { %v1267_v0 = vld [vmem:[%s1708_s1] sm:$0xff]   ;;  %v1268_v1 = vld [vmem:[%s1708_s1 + $0x8] sm:$0xff]   ;;  %v1269_v2 = vld [vmem:[%s1708_s1 + $0x10] sm:$0xff]  }
   0x2   :  { %1171 = vmatprep.subr.bf16.mxu0 %v1267_v0  ;;  %1251 = vmatprep.subr.bf16.mxu1 %v1267_v0  ;;  %v1270_v3 = vld [vmem:[%s1708_s1 + $0x18] sm:$0xff]   ;;  %v1275_v4 = vld [vmem:[%s1709_s0] sm:$0xff]   ;;  %v1272_v7 = vld [vmem:[%s1708_s1 + $0x28] sm:$0xff]  }
   0x3   :  { %1172 = vmatpush3.bf16.msra.mxu0 %v1267_v0  ;;  %1259 = vmatpush3.bf16.msra.mxu1 %v1267_v0  ;;  %v1276_v5 = vld [vmem:[%s1709_s0 + $0x80] sm:$0xff]   ;;  %v1273_v8 = vld [vmem:[%s1708_s1 + $0x30] sm:$0xff]   ;;  %v1274_v9 = vld [vmem:[%s1708_s1 + $0x38] sm:$0xff]  }
   0x4   :  { %1173 = vmatprep.subr.bf16.mxu0 %v1268_v1  ;;  %1252 = vmatprep.subr.bf16.mxu1 %v1268_v1  ;;  %v1271_v6 = vld [vmem:[%s1708_s1 + $0x20] sm:$0xff]   ;;  %v1277_v10 = vld [vmem:[%s1709_s0 + $0x8] sm:$0xff]   ;;  %v1279_v12 = vld [vmem:[%s1709_s0 + $0x10] sm:$0xff]  }
   0x5   :  { %1187 = vmatprep.mubr.bf16.mxu0 %v1275_v4  ;;  %1219 = vmatprep.mubr.bf16.mxu1 %v1276_v5  ;;  %v1278_v11 = vld [vmem:[%s1709_s0 + $0x88] sm:$0xff]   ;;  %v1280_v13 = vld [vmem:[%s1709_s0 + $0x90] sm:$0xff]   ;;  %v1281_v14 = vld [vmem:[%s1709_s0 + $0x18] sm:$0xff]  }
   0x6   :  { %v1282_v15 = vld [vmem:[%s1709_s0 + $0x98] sm:$0xff]   ;;  %v1283_v16 = vld [vmem:[%s1709_s0 + $0x20] sm:$0xff]   ;;  %v1285_v18 = vld [vmem:[%s1709_s0 + $0x28] sm:$0xff]  }
   0x7   :  { %1174 = vmatpush3.bf16.msra.mxu0 %v1268_v1  ;;  %1260 = vmatpush3.bf16.msra.mxu1 %v1268_v1  ;;  %v1284_v17 = vld [vmem:[%s1709_s0 + $0xa0] sm:$0xff]   ;;  %v1286_v19 = vld [vmem:[%s1709_s0 + $0xa8] sm:$0xff]   ;;  %v1287_v20 = vld [vmem:[%s1709_s0 + $0x30] sm:$0xff]  }
   0x8   :  { %1175 = vmatprep.subr.bf16.mxu0 %v1269_v2  ;;  %1253 = vmatprep.subr.bf16.mxu1 %v1269_v2  ;;  %v1288_v21 = vld [vmem:[%s1709_s0 + $0xb0] sm:$0xff]   ;;  %v1289_v22 = vld [vmem:[%s1709_s0 + $0x38] sm:$0xff]   ;;  %v1291_v24 = vld [vmem:[%s1709_s0 + $0x40] sm:$0xff]  }
   0x9   :  { %v1290_v23 = vld [vmem:[%s1709_s0 + $0xb8] sm:$0xff]   ;;  %v1292_v25 = vld [vmem:[%s1709_s0 + $0xc0] sm:$0xff]   ;;  %v1293_v26 = vld [vmem:[%s1709_s0 + $0x48] sm:$0xff]  }
   0xa   :  { %v1294_v27 = vld [vmem:[%s1709_s0 + $0xc8] sm:$0xff]   ;;  %v1295_v28 = vld [vmem:[%s1709_s0 + $0x50] sm:$0xff]   ;;  %v1297_v30 = vld [vmem:[%s1709_s0 + $0x58] sm:$0xff]  }
   0xb   :  { %1176 = vmatpush3.bf16.msra.mxu0 %v1269_v2  ;;  %1261 = vmatpush3.bf16.msra.mxu1 %v1269_v2  ;;  %v1296_v29 = vld [vmem:[%s1709_s0 + $0xd0] sm:$0xff]   ;;  %v1298_v31 = vld [vmem:[%s1709_s0 + $0xd8] sm:$0xff]   ;;  %v1299_v32 = vld [vmem:[%s1709_s0 + $0x60] sm:$0xff]  }
   0xc   :  { %1177 = vmatprep.subr.bf16.mxu0 %v1270_v3  ;;  %1254 = vmatprep.subr.bf16.mxu1 %v1270_v3  ;;  %v1300_v33 = vld [vmem:[%s1709_s0 + $0xe0] sm:$0xff]   ;;  %v1301_v34 = vld [vmem:[%s1709_s0 + $0x68] sm:$0xff]   ;;  %v1303_v36 = vld [vmem:[%s1709_s0 + $0x70] sm:$0xff]  }
   0xd   :  { %v1302_v35 = vld [vmem:[%s1709_s0 + $0xe8] sm:$0xff]   ;;  %v1304_v37 = vld [vmem:[%s1709_s0 + $0xf0] sm:$0xff]   ;;  %v1305_v38 = vld [vmem:[%s1709_s0 + $0x78] sm:$0xff]  }
   0xe   :  { %v1306_v39 = vld [vmem:[%s1709_s0 + $0xf8] sm:$0xff]   ;;  %v1450_v40 = vld [vmem:[%s1710_s2] ss:$0 sm:$0xff] }
   0xf   :  { %1178 = vmatpush3.bf16.msra.mxu0 %v1270_v3  ;;  %1262 = vmatpush3.bf16.msra.mxu1 %v1270_v3 }
  0x10   :  { %1179 = vmatprep.subr.bf16.mxu0 %v1271_v6  ;;  %1255 = vmatprep.subr.bf16.mxu1 %v1271_v6 }
  0x13   :  { %1180 = vmatpush3.bf16.msra.mxu0 %v1271_v6  ;;  %1263 = vmatpush3.bf16.msra.mxu1 %v1271_v6 }
  0x14   :  { %1181 = vmatprep.subr.bf16.mxu0 %v1272_v7  ;;  %1256 = vmatprep.subr.bf16.mxu1 %v1272_v7 }
  0x17   :  { %1182 = vmatpush3.bf16.msra.mxu0 %v1272_v7  ;;  %1264 = vmatpush3.bf16.msra.mxu1 %v1272_v7 }
  0x18   :  { %1183 = vmatprep.subr.bf16.mxu0 %v1273_v8  ;;  %1257 = vmatprep.subr.bf16.mxu1 %v1273_v8 }
  0x1b   :  { %1184 = vmatpush3.bf16.msra.mxu0 %v1273_v8  ;;  %1265 = vmatpush3.bf16.msra.mxu1 %v1273_v8 }
  0x1c   :  { %1185 = vmatprep.subr.bf16.mxu0 %v1274_v9  ;;  %1258 = vmatprep.subr.bf16.mxu1 %v1274_v9 }
  0x1f   :  { %1186 = vmatpush3.bf16.msra.mxu0 %v1274_v9  ;;  %1266 = vmatpush3.bf16.msra.mxu1 %v1274_v9 }
  0x22   :  { %1188 = vmatmul.mubr.bf16.vlgmr.msra.gmra.mrb[0].mxu0 %v1277_v10  ;;  %1220 = vmatmul.mubr.bf16.vlgmr.msra.gmra.mrb[0].mxu1 %v1278_v11 }
  0x23   :  { %1191 = vmatprep.mubr.bf16.mxu0 %v1279_v12  ;;  %1223 = vmatprep.mubr.bf16.mxu1 %v1280_v13 }
  0x2a   :  { %1192 = vmatmul.mubr.bf16.gmra.mrb[4].mxu0 %v1281_v14  ;;  %1224 = vmatmul.mubr.bf16.gmra.mrb[4].mxu1 %v1282_v15 }
  0x2b   :  { %1195 = vmatprep.mubr.bf16.mxu0 %v1283_v16  ;;  %1227 = vmatprep.mubr.bf16.mxu1 %v1284_v17 }
  0x32   :  { %1196 = vmatmul.mubr.bf16.gmra.mrb[8].mxu0 %v1285_v18  ;;  %1228 = vmatmul.mubr.bf16.gmra.mrb[8].mxu1 %v1286_v19 }
  0x33   :  { %1199 = vmatprep.mubr.bf16.mxu0 %v1287_v20  ;;  %1231 = vmatprep.mubr.bf16.mxu1 %v1288_v21 }
  0x3a   :  { %1200 = vmatmul.mubr.bf16.gmra.mrb[12].mxu0 %v1289_v22  ;;  %1232 = vmatmul.mubr.bf16.gmra.mrb[12].mxu1 %v1290_v23 }
  0x3b   :  { %1203 = vmatprep.mubr.bf16.mxu0 %v1291_v24  ;;  %1235 = vmatprep.mubr.bf16.mxu1 %v1292_v25 }
  0x42   :  { %1204 = vmatmul.mubr.bf16.gmra.mrb[16].mxu0 %v1293_v26  ;;  %1236 = vmatmul.mubr.bf16.gmra.mrb[16].mxu1 %v1294_v27 }
  0x43   :  { %1207 = vmatprep.mubr.bf16.mxu0 %v1295_v28  ;;  %1239 = vmatprep.mubr.bf16.mxu1 %v1296_v29 }
  0x4a   :  { %1208 = vmatmul.mubr.bf16.gmra.mrb[20].mxu0 %v1297_v30  ;;  %1240 = vmatmul.mubr.bf16.gmra.mrb[20].mxu1 %v1298_v31 }
  0x4b   :  { %1211 = vmatprep.mubr.bf16.mxu0 %v1299_v32  ;;  %1243 = vmatprep.mubr.bf16.mxu1 %v1300_v33 }
  0x52   :  { %1212 = vmatmul.mubr.bf16.gmra.mrb[24].mxu0 %v1301_v34  ;;  %1244 = vmatmul.mubr.bf16.gmra.mrb[24].mxu1 %v1302_v35 }
  0x53   :  { %1215 = vmatprep.mubr.bf16.mxu0 %v1303_v36  ;;  %1247 = vmatprep.mubr.bf16.mxu1 %v1304_v37 }
  0x5a   :  { %1216 = vmatmul.mubr.bf16.gmra.mrb[28].mxu0 %v1305_v38  ;;  %1248 = vmatmul.mubr.bf16.gmra.mrb[28].mxu1 %v1306_v39 }
  0xf5   :  { %v1189_v41 = vpop.f32.mrb[0].mxu0  ;;  %v1221_v42 = vpop.f32.mrb[0].mxu1 }
  0xf6   :  { %v960_v43 = vadd.f32 %v1189_v41, %v1450_v40  ;;  %v992_v44 = vadd.f32 %v1221_v42, %v1450_v40  ;;  %v501_v45 = vpop.f32.mrb[1].mxu0  ;;  %v629_v46 = vpop.f32.mrb[1].mxu1 }
  0xf7   :  { %v958_v47 = vadd.f32 %v1450_v40, %v501_v45  ;;  %v990_v48 = vadd.f32 %v1450_v40, %v629_v46  ;;  %v1190_v49 = vpop.f32.mrb[2].mxu0  ;;  %v1222_v50 = vpop.f32.mrb[2].mxu1 }
  0xf8   :  { %1024 = vst [vmem:[%s1711_s3 + $0x10] sm:$0xff] %v960_v43  ;;  %1056 = vst [vmem:[%s1711_s3 + $0x110] sm:$0xff] %v992_v44  ;;  %v961_v51 = vadd.f32 %v1190_v49, %v1450_v40  ;;  %v993_v52 = vadd.f32 %v1222_v50, %v1450_v40  ;;  %v504_v53 = vpop.f32.mrb[3].mxu0  ;;  %v632_v54 = vpop.f32.mrb[3].mxu1 }
  0xf9   :  { %1022 = vst [vmem:[%s1711_s3] sm:$0xff] %v958_v47  ;;  %1054 = vst [vmem:[%s1711_s3 + $0x100] sm:$0xff] %v990_v48  ;;  %v959_v55 = vadd.f32 %v1450_v40, %v504_v53  ;;  %v991_v56 = vadd.f32 %v1450_v40, %v632_v54 }
  0xfa   :  { %1025 = vst [vmem:[%s1711_s3 + $0x18] sm:$0xff] %v961_v51  ;;  %1057 = vst [vmem:[%s1711_s3 + $0x118] sm:$0xff] %v993_v52 }
  0xfb   :  { %1023 = vst [vmem:[%s1711_s3 + $0x8] sm:$0xff] %v959_v55  ;;  %1055 = vst [vmem:[%s1711_s3 + $0x108] sm:$0xff] %v991_v56 }
  0xfd   :  { %v1193_v57 = vpop.f32.mrb[4].mxu0  ;;  %v1225_v58 = vpop.f32.mrb[4].mxu1 }
  0xfe   :  { %v964_v59 = vadd.f32 %v1193_v57, %v1450_v40  ;;  %v996_v60 = vadd.f32 %v1225_v58, %v1450_v40  ;;  %v517_v61 = vpop.f32.mrb[5].mxu0  ;;  %v645_v62 = vpop.f32.mrb[5].mxu1 }
  0xff   :  { %v962_v63 = vadd.f32 %v1450_v40, %v517_v61  ;;  %v994_v0 = vadd.f32 %v1450_v40, %v645_v62  ;;  %v1194_v1 = vpop.f32.mrb[6].mxu0  ;;  %v1226_v2 = vpop.f32.mrb[6].mxu1 }
 0x100   :  { %1028 = vst [vmem:[%s1711_s3 + $0x30] sm:$0xff] %v964_v59  ;;  %1060 = vst [vmem:[%s1711_s3 + $0x130] sm:$0xff] %v996_v60  ;;  %v965_v3 = vadd.f32 %v1194_v1, %v1450_v40  ;;  %v997_v4 = vadd.f32 %v1226_v2, %v1450_v40  ;;  %v520_v5 = vpop.f32.mrb[7].mxu0  ;;  %v648_v6 = vpop.f32.mrb[7].mxu1 }
 0x101   :  { %1026 = vst [vmem:[%s1711_s3 + $0x20] sm:$0xff] %v962_v63  ;;  %1058 = vst [vmem:[%s1711_s3 + $0x120] sm:$0xff] %v994_v0  ;;  %v963_v7 = vadd.f32 %v1450_v40, %v520_v5  ;;  %v995_v8 = vadd.f32 %v1450_v40, %v648_v6 }
 0x102   :  { %1029 = vst [vmem:[%s1711_s3 + $0x38] sm:$0xff] %v965_v3  ;;  %1061 = vst [vmem:[%s1711_s3 + $0x138] sm:$0xff] %v997_v4 }
 0x103   :  { %1027 = vst [vmem:[%s1711_s3 + $0x28] sm:$0xff] %v963_v7  ;;  %1059 = vst [vmem:[%s1711_s3 + $0x128] sm:$0xff] %v995_v8 }
 0x105   :  { %v1197_v9 = vpop.f32.mrb[8].mxu0  ;;  %v1229_v10 = vpop.f32.mrb[8].mxu1 }
 0x106   :  { %v968_v11 = vadd.f32 %v1197_v9, %v1450_v40  ;;  %v1000_v12 = vadd.f32 %v1229_v10, %v1450_v40  ;;  %v533_v13 = vpop.f32.mrb[9].mxu0  ;;  %v661_v14 = vpop.f32.mrb[9].mxu1 }
 0x107   :  { %v966_v15 = vadd.f32 %v1450_v40, %v533_v13  ;;  %v998_v16 = vadd.f32 %v1450_v40, %v661_v14  ;;  %v1198_v17 = vpop.f32.mrb[10].mxu0  ;;  %v1230_v18 = vpop.f32.mrb[10].mxu1 }
 0x108   :  { %1032 = vst [vmem:[%s1711_s3 + $0x50] sm:$0xff] %v968_v11  ;;  %1064 = vst [vmem:[%s1711_s3 + $0x150] sm:$0xff] %v1000_v12  ;;  %v969_v19 = vadd.f32 %v1198_v17, %v1450_v40  ;;  %v1001_v20 = vadd.f32 %v1230_v18, %v1450_v40  ;;  %v536_v21 = vpop.f32.mrb[11].mxu0  ;;  %v664_v22 = vpop.f32.mrb[11].mxu1 }
 0x109   :  { %1030 = vst [vmem:[%s1711_s3 + $0x40] sm:$0xff] %v966_v15  ;;  %1062 = vst [vmem:[%s1711_s3 + $0x140] sm:$0xff] %v998_v16  ;;  %v967_v23 = vadd.f32 %v1450_v40, %v536_v21  ;;  %v999_v24 = vadd.f32 %v1450_v40, %v664_v22 }
 0x10a   :  { %1033 = vst [vmem:[%s1711_s3 + $0x58] sm:$0xff] %v969_v19  ;;  %1065 = vst [vmem:[%s1711_s3 + $0x158] sm:$0xff] %v1001_v20 }
 0x10b   :  { %1031 = vst [vmem:[%s1711_s3 + $0x48] sm:$0xff] %v967_v23  ;;  %1063 = vst [vmem:[%s1711_s3 + $0x148] sm:$0xff] %v999_v24 }
 0x10d   :  { %v1201_v25 = vpop.f32.mrb[12].mxu0  ;;  %v1233_v26 = vpop.f32.mrb[12].mxu1 }
 0x10e   :  { %v972_v27 = vadd.f32 %v1201_v25, %v1450_v40  ;;  %v1004_v28 = vadd.f32 %v1233_v26, %v1450_v40  ;;  %v549_v29 = vpop.f32.mrb[13].mxu0  ;;  %v677_v30 = vpop.f32.mrb[13].mxu1 }
 0x10f   :  { %v970_v31 = vadd.f32 %v1450_v40, %v549_v29  ;;  %v1002_v32 = vadd.f32 %v1450_v40, %v677_v30  ;;  %v1202_v33 = vpop.f32.mrb[14].mxu0  ;;  %v1234_v34 = vpop.f32.mrb[14].mxu1 }
 0x110   :  { %1036 = vst [vmem:[%s1711_s3 + $0x70] sm:$0xff] %v972_v27  ;;  %1068 = vst [vmem:[%s1711_s3 + $0x170] sm:$0xff] %v1004_v28  ;;  %v973_v35 = vadd.f32 %v1202_v33, %v1450_v40  ;;  %v1005_v36 = vadd.f32 %v1234_v34, %v1450_v40  ;;  %v552_v37 = vpop.f32.mrb[15].mxu0  ;;  %v680_v38 = vpop.f32.mrb[15].mxu1 }
 0x111   :  { %1034 = vst [vmem:[%s1711_s3 + $0x60] sm:$0xff] %v970_v31  ;;  %1066 = vst [vmem:[%s1711_s3 + $0x160] sm:$0xff] %v1002_v32  ;;  %v971_v39 = vadd.f32 %v1450_v40, %v552_v37  ;;  %v1003_v41 = vadd.f32 %v1450_v40, %v680_v38 }
 0x112   :  { %1037 = vst [vmem:[%s1711_s3 + $0x78] sm:$0xff] %v973_v35  ;;  %1069 = vst [vmem:[%s1711_s3 + $0x178] sm:$0xff] %v1005_v36 }
 0x113   :  { %1035 = vst [vmem:[%s1711_s3 + $0x68] sm:$0xff] %v971_v39  ;;  %1067 = vst [vmem:[%s1711_s3 + $0x168] sm:$0xff] %v1003_v41 }
 0x115   :  { %v1205_v42 = vpop.f32.mrb[16].mxu0  ;;  %v1237_v43 = vpop.f32.mrb[16].mxu1 }
 0x116   :  { %v976_v44 = vadd.f32 %v1205_v42, %v1450_v40  ;;  %v1008_v45 = vadd.f32 %v1237_v43, %v1450_v40  ;;  %v565_v46 = vpop.f32.mrb[17].mxu0  ;;  %v693_v47 = vpop.f32.mrb[17].mxu1 }
 0x117   :  { %v974_v48 = vadd.f32 %v1450_v40, %v565_v46  ;;  %v1006_v49 = vadd.f32 %v1450_v40, %v693_v47  ;;  %v1206_v50 = vpop.f32.mrb[18].mxu0  ;;  %v1238_v51 = vpop.f32.mrb[18].mxu1 }
 0x118   :  { %1040 = vst [vmem:[%s1711_s3 + $0x90] sm:$0xff] %v976_v44  ;;  %1072 = vst [vmem:[%s1711_s3 + $0x190] sm:$0xff] %v1008_v45  ;;  %v977_v52 = vadd.f32 %v1206_v50, %v1450_v40  ;;  %v1009_v53 = vadd.f32 %v1238_v51, %v1450_v40  ;;  %v568_v54 = vpop.f32.mrb[19].mxu0  ;;  %v696_v55 = vpop.f32.mrb[19].mxu1 }
 0x119   :  { %1038 = vst [vmem:[%s1711_s3 + $0x80] sm:$0xff] %v974_v48  ;;  %1070 = vst [vmem:[%s1711_s3 + $0x180] sm:$0xff] %v1006_v49  ;;  %v975_v56 = vadd.f32 %v1450_v40, %v568_v54  ;;  %v1007_v57 = vadd.f32 %v1450_v40, %v696_v55 }
 0x11a   :  { %1041 = vst [vmem:[%s1711_s3 + $0x98] sm:$0xff] %v977_v52  ;;  %1073 = vst [vmem:[%s1711_s3 + $0x198] sm:$0xff] %v1009_v53 }
 0x11b   :  { %1039 = vst [vmem:[%s1711_s3 + $0x88] sm:$0xff] %v975_v56  ;;  %1071 = vst [vmem:[%s1711_s3 + $0x188] sm:$0xff] %v1007_v57 }
 0x11d   :  { %v1209_v58 = vpop.f32.mrb[20].mxu0  ;;  %v1241_v59 = vpop.f32.mrb[20].mxu1 }
 0x11e   :  { %v980_v60 = vadd.f32 %v1209_v58, %v1450_v40  ;;  %v1012_v61 = vadd.f32 %v1241_v59, %v1450_v40  ;;  %v581_v62 = vpop.f32.mrb[21].mxu0  ;;  %v709_v63 = vpop.f32.mrb[21].mxu1 }
 0x11f   :  { %v978_v0 = vadd.f32 %v1450_v40, %v581_v62  ;;  %v1010_v1 = vadd.f32 %v1450_v40, %v709_v63  ;;  %v1210_v2 = vpop.f32.mrb[22].mxu0  ;;  %v1242_v3 = vpop.f32.mrb[22].mxu1 }
 0x120   :  { %1044 = vst [vmem:[%s1711_s3 + $0xb0] sm:$0xff] %v980_v60  ;;  %1076 = vst [vmem:[%s1711_s3 + $0x1b0] sm:$0xff] %v1012_v61  ;;  %v981_v4 = vadd.f32 %v1210_v2, %v1450_v40  ;;  %v1013_v5 = vadd.f32 %v1242_v3, %v1450_v40  ;;  %v584_v6 = vpop.f32.mrb[23].mxu0  ;;  %v712_v7 = vpop.f32.mrb[23].mxu1 }
 0x121   :  { %1042 = vst [vmem:[%s1711_s3 + $0xa0] sm:$0xff] %v978_v0  ;;  %1074 = vst [vmem:[%s1711_s3 + $0x1a0] sm:$0xff] %v1010_v1  ;;  %v979_v8 = vadd.f32 %v1450_v40, %v584_v6  ;;  %v1011_v9 = vadd.f32 %v1450_v40, %v712_v7 }
 0x122   :  { %1045 = vst [vmem:[%s1711_s3 + $0xb8] sm:$0xff] %v981_v4  ;;  %1077 = vst [vmem:[%s1711_s3 + $0x1b8] sm:$0xff] %v1013_v5 }
 0x123   :  { %1043 = vst [vmem:[%s1711_s3 + $0xa8] sm:$0xff] %v979_v8  ;;  %1075 = vst [vmem:[%s1711_s3 + $0x1a8] sm:$0xff] %v1011_v9 }
 0x125   :  { %v1213_v10 = vpop.f32.mrb[24].mxu0  ;;  %v1245_v11 = vpop.f32.mrb[24].mxu1 }
 0x126   :  { %v984_v12 = vadd.f32 %v1213_v10, %v1450_v40  ;;  %v1016_v13 = vadd.f32 %v1245_v11, %v1450_v40  ;;  %v597_v14 = vpop.f32.mrb[25].mxu0  ;;  %v725_v15 = vpop.f32.mrb[25].mxu1 }
 0x127   :  { %v982_v16 = vadd.f32 %v1450_v40, %v597_v14  ;;  %v1014_v17 = vadd.f32 %v1450_v40, %v725_v15  ;;  %v1214_v18 = vpop.f32.mrb[26].mxu0  ;;  %v1246_v19 = vpop.f32.mrb[26].mxu1 }
 0x128   :  { %1048 = vst [vmem:[%s1711_s3 + $0xd0] sm:$0xff] %v984_v12  ;;  %1080 = vst [vmem:[%s1711_s3 + $0x1d0] sm:$0xff] %v1016_v13  ;;  %v985_v20 = vadd.f32 %v1214_v18, %v1450_v40  ;;  %v1017_v21 = vadd.f32 %v1246_v19, %v1450_v40  ;;  %v600_v22 = vpop.f32.mrb[27].mxu0  ;;  %v728_v23 = vpop.f32.mrb[27].mxu1 }
 0x129   :  { %1046 = vst [vmem:[%s1711_s3 + $0xc0] sm:$0xff] %v982_v16  ;;  %1078 = vst [vmem:[%s1711_s3 + $0x1c0] sm:$0xff] %v1014_v17  ;;  %v983_v24 = vadd.f32 %v1450_v40, %v600_v22  ;;  %v1015_v25 = vadd.f32 %v1450_v40, %v728_v23 }
 0x12a   :  { %1049 = vst [vmem:[%s1711_s3 + $0xd8] sm:$0xff] %v985_v20  ;;  %1081 = vst [vmem:[%s1711_s3 + $0x1d8] sm:$0xff] %v1017_v21 }
 0x12b   :  { %1047 = vst [vmem:[%s1711_s3 + $0xc8] sm:$0xff] %v983_v24  ;;  %1079 = vst [vmem:[%s1711_s3 + $0x1c8] sm:$0xff] %v1015_v25 }
 0x12d   :  { %v1217_v26 = vpop.f32.mrb[28].mxu0  ;;  %v1249_v27 = vpop.f32.mrb[28].mxu1 }
 0x12e   :  { %v988_v28 = vadd.f32 %v1217_v26, %v1450_v40  ;;  %v1020_v29 = vadd.f32 %v1249_v27, %v1450_v40  ;;  %v613_v30 = vpop.f32.mrb[29].mxu0  ;;  %v741_v31 = vpop.f32.mrb[29].mxu1 }
 0x12f   :  { %v986_v32 = vadd.f32 %v1450_v40, %v613_v30  ;;  %v1018_v33 = vadd.f32 %v1450_v40, %v741_v31  ;;  %v1218_v34 = vpop.f32.mrb[30].mxu0  ;;  %v1250_v35 = vpop.f32.mrb[30].mxu1 }
 0x130   :  { %1052 = vst [vmem:[%s1711_s3 + $0xf0] sm:$0xff] %v988_v28  ;;  %1084 = vst [vmem:[%s1711_s3 + $0x1f0] sm:$0xff] %v1020_v29  ;;  %v989_v36 = vadd.f32 %v1218_v34, %v1450_v40  ;;  %v1021_v37 = vadd.f32 %v1250_v35, %v1450_v40  ;;  %v616_v38 = vpop.f32.mrb[31].mxu0  ;;  %v744_v39 = vpop.f32.mrb[31].mxu1 }
 0x131   :  { %1050 = vst [vmem:[%s1711_s3 + $0xe0] sm:$0xff] %v986_v32  ;;  %1082 = vst [vmem:[%s1711_s3 + $0x1e0] sm:$0xff] %v1018_v33  ;;  %v987_v41 = vadd.f32 %v1450_v40, %v616_v38  ;;  %v1019_v42 = vadd.f32 %v1450_v40, %v744_v39 }
 0x132   :  { %1053 = vst [vmem:[%s1711_s3 + $0xf8] sm:$0xff] %v989_v36  ;;  %1085 = vst [vmem:[%s1711_s3 + $0x1f8] sm:$0xff] %v1021_v37 }
 0x133   :  { %1051 = vst [vmem:[%s1711_s3 + $0xe8] sm:$0xff] %v987_v41  ;;  %1083 = vst [vmem:[%s1711_s3 + $0x1e8] sm:$0xff] %v1019_v42 }

// kernel: custom-call
= control target key start
LH: loop header
LB: loop body
LE: loop exit
PB: predicated region body
PF: predicated region fallthrough
CT: control target
= control target key end

     0   :  { %5 = vsyncpa [#allocation9], 0  ;;  %v1559_v0 = vmov 2147483648   ;;  %v1560_v1 = vmov 2147483647   ;;  %s1837_s0 = inlined_call_operand.vmem [shape: f32[2,1536], index: 0, kind: input, shape index: {}]   ;;  %s1838_s1 = inlined_call_operand.hbm [shape: f32[2,16], index: 1, kind: output, shape index: {0}]   ;;  %s1839_s2 = inlined_call_operand.vmem [shape: s32[2,16], index: 2, kind: output, shape index: {1}]  }
   0x1   :  { %7 = vst [vmem:[#allocation12] sm:$0xff] %v1559_v0  ;;  %9 = vst [vmem:[#allocation12 + $0x8] sm:$0xff] %v1559_v0 }
   0x2   :  { %10 = vst [vmem:[#allocation14] sm:$0xff] %v1560_v1  ;;  %12 = vst [vmem:[#allocation14 + $0x8] sm:$0xff] %v1560_v1 }
   0x3   :  { %v40_v2 = vlaneseq  ;;  %v29_v3 = vld [vmem:[%s1837_s0] sm:$0xff]  ;;  %v1561_v4 = vmov 2147483648   ;;  %v1562_v5 = vmov 2147483647   ;;  %v31_v6 = vld [vmem:[%s1837_s0 + $0x8] sm:$0xff]  ;;  %v33_v8 = vld [vmem:[%s1837_s0 + $0x10] sm:$0xff] }
   0x4   :  { %93 = vst [vmem:[#allocation13] sm:$0xff] %v1561_v4  ;;  %95 = vst [vmem:[#allocation13 + $0x8] sm:$0xff] %v1561_v4  ;;  %v51_v11 = vsub.s32 2147483647, %v29_v3  ;;  %vm50_vm0 = vcmp.lt.s32.totalorder %v29_v3, 0  ;;  %vm59_vm1 = vcmp.lt.s32.totalorder %v31_v6, 0 }
   0x5   :  { %96 = vst [vmem:[#allocation15] sm:$0xff] %v1562_v5  ;;  %98 = vst [vmem:[#allocation15 + $0x8] sm:$0xff] %v1562_v5  ;;  %v1591_v7 = vshrl.u32 %v40_v2, 7  ;;  %v41_v9 = vand.u32 127, %v40_v2  ;;  %v60_v12 = vsub.s32 2147483647, %v31_v6 }
   0x6   :  { %v69_v14 = vsub.s32 2147483647, %v33_v8  ;;  %vm68_vm2 = vcmp.lt.s32.totalorder %v33_v8, 0  ;;  %v52_v16 = vsel %vm50_vm0, %v51_v11, %v29_v3  ;;  %s1598_s0 = smov 0  }
   0x7   :  { %v44_v10 = vshrl.u32 %v1591_v7, 1  ;;  %v61_v17 = vsel %vm59_vm1, %v60_v12, %v31_v6 }
   0x8   :  { %v70_v19 = vsel %vm68_vm2, %v69_v14, %v33_v8 }
   0x9   :  { %v46_v13 = vmul.u32 128, %v44_v10 }
   0xb   :  { %v47_v15 = vadd.s32 %v46_v13, %v41_v9 }
   0xd   :  { %vm54_vm3 = vcmp.lt.s32.totalorder %v47_v15, 1536  ;;  %v62_v18 = vadd.s32 512, %v47_v15  ;;  %v71_v20 = vadd.s32 1024, %v47_v15  ;;  %85 = vst [vmem:[#allocation17] sm:$0xff] %v47_v15 }
   0xe   :  { %v55_v21 = vsel %vm54_vm3, %v52_v16, 2147483648 }
   0xf   :  { %56 = vst [vmem:[#allocation16] sm:$0xff] %v55_v21  ;;  %vm63_vm4 = vcmp.lt.s32.totalorder %v62_v18, 1536  ;;  %vm72_vm5 = vcmp.lt.s32.totalorder %v71_v20, 1536  ;;  %88 = vst [vmem:[#allocation17 + $0x8] sm:$0xff] %v62_v18 }
  0x10   :  { %91 = vst [vmem:[#allocation17 + $0x10] sm:$0xff] %v71_v20  ;;  %v64_v22 = vsel %vm63_vm4, %v61_v17, 2147483648  ;;  %v73_v23 = vsel %vm72_vm5, %v70_v19, 2147483648 }
  0x11   :  { %65 = vst [vmem:[#allocation16 + $0x8] sm:$0xff] %v64_v22  ;;  %74 = vst [vmem:[#allocation16 + $0x10] sm:$0xff] %v73_v23 }
  0x12 LB: > { %s445_s15 = scalar_lea.vmem [#allocation13], %s1557_s0  ;;  %s447_s16 = scalar_lea.vmem [#allocation15], %s1557_s0  ;;  %s1557_s0 = sphi %s1598_s0, %s105_s0  }
  0x13   : > { %s105_s0 = sadd.s32 1, %s1557_s0  }
  0x14   : > { %v107_v25 = vld [vmem:[#allocation17] sm:$0xff]  ;;  %p102_p2 = scmp.ge.s32.totalorder %s105_s0, 16  }
  0x15   :  { %s1568_s0 = smov (%p102_p2), [#allocation8]  }
  0x16   : > { %v106_v24 = vld [vmem:[#allocation16] sm:$0xff] }
  0x17   : > { %v112_v27 = vld [vmem:[#allocation17 + $0x8] sm:$0xff]  ;;  %v125_v29 = vld [vmem:[#allocation17 + $0x10] sm:$0xff] }
  0x18   : > { %v110_v26 = vld [vmem:[#allocation16 + $0x8] sm:$0xff]  ;;  %vm116_vm8 = vcmp.lt.s32.totalorder %v112_v27, %v107_v25  ;;  %v123_v28 = vld [vmem:[#allocation16 + $0x10] sm:$0xff] }
  0x19   : > { %vm114_vm6 = vcmp.gt.s32.totalorder %v110_v26, %v106_v24  ;;  %vm115_vm7 = vcmp.eq.s32.totalorder %v110_v26, %v106_v24 }
  0x1a   : > { %vm117_vm9 = vmand %vm115_vm7, %vm116_vm8 }
  0x1b   : > { %vm118_vm10 = vmor %vm114_vm6, %vm117_vm9 }
  0x1c   : > { %v119_v30 = vsel %vm118_vm10, %v110_v26, %v106_v24  ;;  %v120_v31 = vsel %vm118_vm10, %v112_v27, %v107_v25 }
  0x1d   : > { %vm127_vm11 = vcmp.gt.s32.totalorder %v123_v28, %v119_v30  ;;  %vm128_vm12 = vcmp.eq.s32.totalorder %v123_v28, %v119_v30  ;;  %vm129_vm13 = vcmp.lt.s32.totalorder %v125_v29, %v120_v31 }
  0x1e   : > { %vm130_vm14 = vmand %vm128_vm12, %vm129_vm13 }
  0x1f   : > { %vm131_vm15 = vmor %vm127_vm11, %vm130_vm14 }
  0x20   : > { %v132_v32 = vsel %vm131_vm15, %v123_v28, %v119_v30  ;;  %v133_v33 = vsel %vm131_vm15, %v125_v29, %v120_v31 }
  0x21   : > { %v135_v34 = vrot.slane %v132_v32, 2  ;;  %v136_v35 = vrot.slane %v133_v33, 2 }
  0x23   : > { %vm138_vm0 = vcmp.gt.s32.totalorder %v135_v34, %v132_v32  ;;  %vm139_vm1 = vcmp.eq.s32.totalorder %v135_v34, %v132_v32  ;;  %vm140_vm2 = vcmp.lt.s32.totalorder %v136_v35, %v133_v33 }
  0x24   : > { %vm141_vm3 = vmand %vm139_vm1, %vm140_vm2 }
  0x25   : > { %vm142_vm4 = vmor %vm138_vm0, %vm141_vm3 }
  0x26   : > { %v143_v36 = vsel %vm142_vm4, %v135_v34, %v132_v32  ;;  %v144_v37 = vsel %vm142_vm4, %v136_v35, %v133_v33 }
  0x27   : > { %v146_v38 = vrot.slane %v143_v36, 2  ;;  %v147_v39 = vrot.slane %v144_v37, 2 }
  0x29   : > { %vm149_vm5 = vcmp.gt.s32.totalorder %v146_v38, %v143_v36  ;;  %vm150_vm6 = vcmp.eq.s32.totalorder %v146_v38, %v143_v36  ;;  %vm151_vm7 = vcmp.lt.s32.totalorder %v147_v39, %v144_v37 }
  0x2a   : > { %vm152_vm8 = vmand %vm150_vm6, %vm151_vm7 }
  0x2b   : > { %vm153_vm9 = vmor %vm149_vm5, %vm152_vm8 }
  0x2c   : > { %v154_v40 = vsel %vm153_vm9, %v146_v38, %v143_v36  ;;  %v155_v41 = vsel %vm153_vm9, %v147_v39, %v144_v37 }
  0x2d   : > { %v157_v42 = vrot.slane %v154_v40, 2  ;;  %v158_v43 = vrot.slane %v155_v41, 2 }
  0x2f   : > { %vm160_vm10 = vcmp.gt.s32.totalorder %v157_v42, %v154_v40  ;;  %vm161_vm11 = vcmp.eq.s32.totalorder %v157_v42, %v154_v40  ;;  %vm162_vm12 = vcmp.lt.s32.totalorder %v158_v43, %v155_v41 }
  0x30   : > { %vm163_vm13 = vmand %vm161_vm11, %vm162_vm12 }
  0x31   : > { %vm164_vm14 = vmor %vm160_vm10, %vm163_vm13 }
  0x32   : > { %v166_v44 = vsel %vm164_vm14, %v158_v43, %v155_v41  ;;  %v165_v45 = vsel %vm164_vm14, %v157_v42, %v154_v40 }
  0x33   : > { %200 = vxpose.xlu1.b32.start [1/16] %v166_v44, 128  ;;  %168 = vxpose.xlu0.b32.start [1/16] %v165_v45, 128 }
  0x37   : > { %201 = vxpose.xlu1.b32.cont [2/16] %v166_v44, 128  ;;  %169 = vxpose.xlu0.b32.cont [2/16] %v165_v45, 128 }
  0x3b   : > { %202 = vxpose.xlu1.b32.cont [3/16] %v166_v44, 128  ;;  %170 = vxpose.xlu0.b32.cont [3/16] %v165_v45, 128 }
  0x3f   : > { %203 = vxpose.xlu1.b32.cont [4/16] %v166_v44, 128  ;;  %171 = vxpose.xlu0.b32.cont [4/16] %v165_v45, 128 }
  0x43   : > { %204 = vxpose.xlu1.b32.cont [5/16] %v166_v44, 128  ;;  %172 = vxpose.xlu0.b32.cont [5/16] %v165_v45, 128 }
  0x47   : > { %205 = vxpose.xlu1.b32.cont [6/16] %v166_v44, 128  ;;  %173 = vxpose.xlu0.b32.cont [6/16] %v165_v45, 128 }
  0x4b   : > { %206 = vxpose.xlu1.b32.cont [7/16] %v166_v44, 128  ;;  %174 = vxpose.xlu0.b32.cont [7/16] %v165_v45, 128 }
  0x4f   : > { %207 = vxpose.xlu1.b32.cont [8/16] %v166_v44, 128  ;;  %175 = vxpose.xlu0.b32.cont [8/16] %v165_v45, 128 }
  0x53   : > { %208 = vxpose.xlu1.b32.cont [9/16] %v166_v44, 128  ;;  %176 = vxpose.xlu0.b32.cont [9/16] %v165_v45, 128 }
  0x57   : > { %209 = vxpose.xlu1.b32.cont [10/16] %v166_v44, 128  ;;  %177 = vxpose.xlu0.b32.cont [10/16] %v165_v45, 128 }
  0x5b   : > { %210 = vxpose.xlu1.b32.cont [11/16] %v166_v44, 128  ;;  %178 = vxpose.xlu0.b32.cont [11/16] %v165_v45, 128 }
  0x5f   : > { %211 = vxpose.xlu1.b32.cont [12/16] %v166_v44, 128  ;;  %179 = vxpose.xlu0.b32.cont [12/16] %v165_v45, 128 }
  0x63   : > { %212 = vxpose.xlu1.b32.cont [13/16] %v166_v44, 128  ;;  %180 = vxpose.xlu0.b32.cont [13/16] %v165_v45, 128 }
  0x67   : > { %213 = vxpose.xlu1.b32.cont [14/16] %v166_v44, 128  ;;  %181 = vxpose.xlu0.b32.cont [14/16] %v165_v45, 128 }
  0x6b   : > { %214 = vxpose.xlu1.b32.cont [15/16] %v166_v44, 128  ;;  %182 = vxpose.xlu0.b32.cont [15/16] %v165_v45, 128 }
  0x6f   : > { %215 = vxpose.xlu1.b32.end [16/16] %v166_v44, 128  ;;  %183 = vxpose.xlu0.b32.end [16/16] %v165_v45, 128 }
  0xb3   : > { %v216_v46 = vpop.trf.xlu1  ;;  %v184_v47 = vpop.trf.xlu0 }
  0xb7   : > { %v217_v48 = vpop.trf.xlu1  ;;  %v185_v49 = vpop.trf.xlu0 }
  0xb8   : > { %vm236_vm15 = vcmp.lt.s32.totalorder %v217_v48, %v216_v46  ;;  %vm234_vm0 = vcmp.gt.s32.totalorder %v185_v49, %v184_v47  ;;  %vm235_vm1 = vcmp.eq.s32.totalorder %v185_v49, %v184_v47 }
  0xb9   : > { %vm237_vm2 = vmand %vm235_vm1, %vm236_vm15 }
  0xba   : > { %vm238_vm3 = vmor %vm234_vm0, %vm237_vm2 }
  0xbb   : > { %v239_v50 = vsel %vm238_vm3, %v185_v49, %v184_v47  ;;  %v218_v51 = vpop.trf.xlu1  ;;  %v240_v52 = vsel %vm238_vm3, %v217_v48, %v216_v46  ;;  %v186_v53 = vpop.trf.xlu0 }
  0xbc   : > { %vm245_vm4 = vcmp.lt.s32.totalorder %v218_v51, %v240_v52  ;;  %vm243_vm5 = vcmp.gt.s32.totalorder %v186_v53, %v239_v50  ;;  %vm244_vm6 = vcmp.eq.s32.totalorder %v186_v53, %v239_v50 }
  0xbd   : > { %vm246_vm7 = vmand %vm244_vm6, %vm245_vm4 }
  0xbe   : > { %vm247_vm8 = vmor %vm243_vm5, %vm246_vm7 }
  0xbf   : > { %v248_v54 = vsel %vm247_vm8, %v186_v53, %v239_v50  ;;  %v219_v55 = vpop.trf.xlu1  ;;  %v249_v56 = vsel %vm247_vm8, %v218_v51, %v240_v52  ;;  %v187_v57 = vpop.trf.xlu0 }
  0xc0   : > { %vm254_vm9 = vcmp.lt.s32.totalorder %v219_v55, %v249_v56  ;;  %vm252_vm10 = vcmp.gt.s32.totalorder %v187_v57, %v248_v54  ;;  %vm253_vm11 = vcmp.eq.s32.totalorder %v187_v57, %v248_v54 }
  0xc1   : > { %vm255_vm12 = vmand %vm253_vm11, %vm254_vm9 }
  0xc2   : > { %vm256_vm13 = vmor %vm252_vm10, %vm255_vm12 }
  0xc3   : > { %v257_v58 = vsel %vm256_vm13, %v187_v57, %v248_v54  ;;  %v220_v59 = vpop.trf.xlu1  ;;  %v258_v60 = vsel %vm256_vm13, %v219_v55, %v249_v56  ;;  %v188_v61 = vpop.trf.xlu0 }
  0xc4   : > { %vm263_vm14 = vcmp.lt.s32.totalorder %v220_v59, %v258_v60  ;;  %vm261_vm15 = vcmp.gt.s32.totalorder %v188_v61, %v257_v58  ;;  %vm262_vm0 = vcmp.eq.s32.totalorder %v188_v61, %v257_v58 }
  0xc5   : > { %vm264_vm1 = vmand %vm262_vm0, %vm263_vm14 }
  0xc6   : > { %vm265_vm2 = vmor %vm261_vm15, %vm264_vm1 }
  0xc7   : > { %v266_v62 = vsel %vm265_vm2, %v188_v61, %v257_v58  ;;  %v221_v63 = vpop.trf.xlu1  ;;  %v267_v0 = vsel %vm265_vm2, %v220_v59, %v258_v60  ;;  %v189_v1 = vpop.trf.xlu0 }
  0xc8   : > { %vm272_vm3 = vcmp.lt.s32.totalorder %v221_v63, %v267_v0  ;;  %vm270_vm4 = vcmp.gt.s32.totalorder %v189_v1, %v266_v62  ;;  %vm271_vm5 = vcmp.eq.s32.totalorder %v189_v1, %v266_v62 }
  0xc9   : > { %vm273_vm6 = vmand %vm271_vm5, %vm272_vm3 }
  0xca   : > { %vm274_vm7 = vmor %vm270_vm4, %vm273_vm6 }
  0xcb   : > { %v275_v3 = vsel %vm274_vm7, %v189_v1, %v266_v62  ;;  %v222_v4 = vpop.trf.xlu1  ;;  %v276_v5 = vsel %vm274_vm7, %v221_v63, %v267_v0  ;;  %v190_v6 = vpop.trf.xlu0 }
  0xcc   : > { %vm281_vm8 = vcmp.lt.s32.totalorder %v222_v4, %v276_v5  ;;  %vm279_vm9 = vcmp.gt.s32.totalorder %v190_v6, %v275_v3  ;;  %vm280_vm10 = vcmp.eq.s32.totalorder %v190_v6, %v275_v3 }
  0xcd   : > { %vm282_vm11 = vmand %vm280_vm10, %vm281_vm8 }
  0xce   : > { %vm283_vm12 = vmor %vm279_vm9, %vm282_vm11 }
  0xcf   : > { %v284_v8 = vsel %vm283_vm12, %v190_v6, %v275_v3  ;;  %v223_v9 = vpop.trf.xlu1  ;;  %v285_v10 = vsel %vm283_vm12, %v222_v4, %v276_v5  ;;  %v191_v11 = vpop.trf.xlu0 }
  0xd0   : > { %vm290_vm13 = vcmp.lt.s32.totalorder %v223_v9, %v285_v10  ;;  %vm288_vm14 = vcmp.gt.s32.totalorder %v191_v11, %v284_v8  ;;  %vm289_vm15 = vcmp.eq.s32.totalorder %v191_v11, %v284_v8 }
  0xd1   : > { %vm291_vm0 = vmand %vm289_vm15, %vm290_vm13 }
  0xd2   : > { %vm292_vm1 = vmor %vm288_vm14, %vm291_vm0 }
  0xd3   : > { %v293_v12 = vsel %vm292_vm1, %v191_v11, %v284_v8  ;;  %v224_v13 = vpop.trf.xlu1  ;;  %v294_v14 = vsel %vm292_vm1, %v223_v9, %v285_v10  ;;  %v192_v15 = vpop.trf.xlu0 }
  0xd4   : > { %vm299_vm2 = vcmp.lt.s32.totalorder %v224_v13, %v294_v14  ;;  %vm297_vm3 = vcmp.gt.s32.totalorder %v192_v15, %v293_v12  ;;  %vm298_vm4 = vcmp.eq.s32.totalorder %v192_v15, %v293_v12 }
  0xd5   : > { %vm300_vm5 = vmand %vm298_vm4, %vm299_vm2 }
  0xd6   : > { %vm301_vm6 = vmor %vm297_vm3, %vm300_vm5 }
  0xd7   : > { %v302_v16 = vsel %vm301_vm6, %v192_v15, %v293_v12  ;;  %v225_v17 = vpop.trf.xlu1  ;;  %v303_v18 = vsel %vm301_vm6, %v224_v13, %v294_v14  ;;  %v193_v19 = vpop.trf.xlu0  ;;  %v1563_v15 = vmov 2147483648  }
  0xd8   : > { %vm308_vm7 = vcmp.lt.s32.totalorder %v225_v17, %v303_v18  ;;  %vm306_vm8 = vcmp.gt.s32.totalorder %v193_v19, %v302_v16  ;;  %vm307_vm9 = vcmp.eq.s32.totalorder %v193_v19, %v302_v16 }
  0xd9   : > { %vm309_vm10 = vmand %vm307_vm9, %vm308_vm7 }
  0xda   : > { %vm310_vm11 = vmor %vm306_vm8, %vm309_vm10 }
  0xdb   : > { %v311_v20 = vsel %vm310_vm11, %v193_v19, %v302_v16  ;;  %v226_v21 = vpop.trf.xlu1  ;;  %v312_v22 = vsel %vm310_vm11, %v225_v17, %v303_v18  ;;  %v194_v23 = vpop.trf.xlu0  ;;  %v1564_v16 = vmov 2147483647  }
  0xdc   : > { %vm317_vm12 = vcmp.lt.s32.totalorder %v226_v21, %v312_v22  ;;  %vm315_vm13 = vcmp.gt.s32.totalorder %v194_v23, %v311_v20  ;;  %vm316_vm14 = vcmp.eq.s32.totalorder %v194_v23, %v311_v20 }
  0xdd   : > { %vm318_vm15 = vmand %vm316_vm14, %vm317_vm12 }
  0xde   : > { %vm319_vm0 = vmor %vm315_vm13, %vm318_vm15 }
  0xdf   : > { %v320_v24 = vsel %vm319_vm0, %v194_v23, %v311_v20  ;;  %v227_v25 = vpop.trf.xlu1  ;;  %v321_v26 = vsel %vm319_vm0, %v226_v21, %v312_v22  ;;  %v195_v27 = vpop.trf.xlu0  ;;  %v545_v23 = vld [vmem:[#allocation12] sm:$0xff] (%p102_p2) }
  0xe0   : > { %vm326_vm1 = vcmp.lt.s32.totalorder %v227_v25, %v321_v26  ;;  %vm324_vm2 = vcmp.gt.s32.totalorder %v195_v27, %v320_v24  ;;  %vm325_vm3 = vcmp.eq.s32.totalorder %v195_v27, %v320_v24 }
  0xe1   : > { %vm327_vm4 = vmand %vm325_vm3, %vm326_vm1 }
  0xe2   : > { %vm328_vm5 = vmor %vm324_vm2, %vm327_vm4 }
  0xe3   : > { %v329_v28 = vsel %vm328_vm5, %v195_v27, %v320_v24  ;;  %v228_v29 = vpop.trf.xlu1  ;;  %v330_v30 = vsel %vm328_vm5, %v227_v25, %v321_v26  ;;  %v196_v31 = vpop.trf.xlu0  ;;  %v546_v24 = vld [vmem:[#allocation14] sm:$0xff] (%p102_p2)  ;;  %v566_v25 = vld [vmem:[#allocation12 + $0x8] sm:$0xff] (%p102_p2)  ;;  %v1565_v27 = vmov (%p102_p2), 839939668  }
  0xe4   : > { %vm335_vm6 = vcmp.lt.s32.totalorder %v228_v29, %v330_v30  ;;  %vm333_vm7 = vcmp.gt.s32.totalorder %v196_v31, %v329_v28  ;;  %vm334_vm8 = vcmp.eq.s32.totalorder %v196_v31, %v329_v28  ;;  %v568_v26 = vld [vmem:[#allocation14 + $0x8] sm:$0xff] (%p102_p2) }
  0xe5   : > { %vm336_vm9 = vmand %vm334_vm8, %vm335_vm6 }
  0xe6   : > { %vm337_vm10 = vmor %vm333_vm7, %vm336_vm9 }
  0xe7   : > { %v338_v32 = vsel %vm337_vm10, %v196_v31, %v329_v28  ;;  %v229_v33 = vpop.trf.xlu1  ;;  %v339_v34 = vsel %vm337_vm10, %v228_v29, %v330_v30  ;;  %v197_v35 = vpop.trf.xlu0  ;;  %v621_v28 = vunpack.c.l.s4 (%p102_p2), %v1565_v27 }
  0xe8   : > { %vm344_vm11 = vcmp.lt.s32.totalorder %v229_v33, %v339_v34  ;;  %vm342_vm12 = vcmp.gt.s32.totalorder %v197_v35, %v338_v32  ;;  %vm343_vm13 = vcmp.eq.s32.totalorder %v197_v35, %v338_v32 }
  0xe9   : > { %vm345_vm14 = vmand %vm343_vm13, %vm344_vm11  ;;  %v622_v29 = vunpack.c.0.s8 (%p102_p2), %v621_v28 }
  0xea   : > { %vm346_vm15 = vmor %vm342_vm12, %vm345_vm14 }
  0xeb   : > { %v347_v36 = vsel %vm346_vm15, %v197_v35, %v338_v32  ;;  %v230_v37 = vpop.trf.xlu1  ;;  %v348_v38 = vsel %vm346_vm15, %v229_v33, %v339_v34  ;;  %v198_v39 = vpop.trf.xlu0  ;;  %v1566_v33 = vmov (%p102_p2), 1417023538  }
  0xec   : > { %vm353_vm0 = vcmp.lt.s32.totalorder %v230_v37, %v348_v38  ;;  %vm351_vm1 = vcmp.gt.s32.totalorder %v198_v39, %v347_v36  ;;  %vm352_vm2 = vcmp.eq.s32.totalorder %v198_v39, %v347_v36  ;;  %v649_v34 = vunpack.c.l.s4 (%p102_p2), %v1566_v33 }
  0xed   : > { %vm354_vm3 = vmand %vm352_vm2, %vm353_vm0 }
  0xee   : > { %vm355_vm4 = vmor %vm351_vm1, %vm354_vm3 }
  0xef   : > { %v356_v40 = vsel %vm355_vm4, %v198_v39, %v347_v36  ;;  %v231_v41 = vpop.trf.xlu1  ;;  %v357_v42 = vsel %vm355_vm4, %v230_v37, %v348_v38  ;;  %v199_v43 = vpop.trf.xlu0  ;;  %v1619_v39 = vsub.s32 (%p102_p2), %v622_v29, %v1591_v7 }
  0xf0   : > { %vm362_vm5 = vcmp.lt.s32.totalorder %v231_v41, %v357_v42  ;;  %vm360_vm6 = vcmp.gt.s32.totalorder %v199_v43, %v356_v40  ;;  %vm361_vm7 = vcmp.eq.s32.totalorder %v199_v43, %v356_v40 }
  0xf1   : > { %vm363_vm8 = vmand %vm361_vm7, %vm362_vm5 }
  0xf2   : > { %vm364_vm9 = vmor %vm360_vm6, %vm363_vm8 }
  0xf3   : > { %v365_v44 = vsel %vm364_vm9, %v199_v43, %v356_v40  ;;  %v366_v45 = vsel %vm364_vm9, %v231_v41, %v357_v42  ;;  %v642_v40 = vand.u32 (%p102_p2), 4, %v1591_v7  ;;  %v650_v41 = vunpack.c.0.s8 (%p102_p2), %v649_v34 }
  0xf4   : > { %v368_v46 = vrot.slane %v365_v44, 1  ;;  %v369_v47 = vrot.slane %v366_v45, 1 }
  0xf6   : > { %vm371_vm10 = vcmp.gt.s32.totalorder %v368_v46, %v365_v44  ;;  %vm372_vm11 = vcmp.eq.s32.totalorder %v368_v46, %v365_v44  ;;  %vm373_vm12 = vcmp.lt.s32.totalorder %v369_v47, %v366_v45 }
  0xf7   : > { %vm374_vm13 = vmand %vm372_vm11, %vm373_vm12 }
  0xf8   : > { %vm375_vm14 = vmor %vm371_vm10, %vm374_vm13 }
  0xf9   : > { %v376_v48 = vsel %vm375_vm14, %v368_v46, %v365_v44  ;;  %v377_v49 = vsel %vm375_vm14, %v369_v47, %v366_v45 }
  0xfa   : > { %v379_v50 = vrot.slane %v376_v48, 1  ;;  %v380_v51 = vrot.slane %v377_v49, 1 }
  0xfc   : > { %vm382_vm15 = vcmp.gt.s32.totalorder %v379_v50, %v376_v48  ;;  %vm383_vm0 = vcmp.eq.s32.totalorder %v379_v50, %v376_v48  ;;  %vm384_vm1 = vcmp.lt.s32.totalorder %v380_v51, %v377_v49 }
  0xfd   : > { %vm385_vm2 = vmand %vm383_vm0, %vm384_vm1 }
  0xfe   : > { %vm386_vm3 = vmor %vm382_vm15, %vm385_vm2 }
  0xff   : > { %v387_v52 = vsel %vm386_vm3, %v379_v50, %v376_v48  ;;  %v388_v53 = vsel %vm386_vm3, %v380_v51, %v377_v49  ;;  %v1848_v49 = vmov (%p102_p2), 0 }
 0x100   : > { %v390_v54 = vrot.slane %v387_v52, 1  ;;  %v391_v55 = vrot.slane %v388_v53, 1 }
 0x102   : > { %vm395_vm4 = vcmp.lt.s32.totalorder %v391_v55, %v388_v53  ;;  %vm393_vm5 = vcmp.gt.s32.totalorder %v390_v54, %v387_v52  ;;  %vm394_vm6 = vcmp.eq.s32.totalorder %v390_v54, %v387_v52 }
 0x103   : > { %vm396_vm7 = vmand %vm394_vm6, %vm395_vm4 }
 0x104   : > { %vm397_vm8 = vmor %vm393_vm5, %vm396_vm7 }
 0x105   : > { %v398_v56 = vsel %vm397_vm8, %v390_v54, %v387_v52  ;;  %v399_v57 = vsel %vm397_vm8, %v391_v55, %v388_v53  ;;  %v1567_v53 = vmov (%p102_p2), 1732584193   ;;  %v1647_v55 = vsub.s32 (%p102_p2), %v650_v41, %v1591_v7 }
 0x106   : > { %v401_v58 = vrot.slane %v398_v56, 1  ;;  %v402_v59 = vrot.slane %v399_v57, 1  ;;  %v677_v54 = vunpack.c.l.s4 (%p102_p2), %v1567_v53 }
 0x108   : > { %vm404_vm9 = vcmp.gt.s32.totalorder %v401_v58, %v398_v56  ;;  %vm405_vm10 = vcmp.eq.s32.totalorder %v401_v58, %v398_v56  ;;  %vm406_vm11 = vcmp.lt.s32.totalorder %v402_v59, %v399_v57 }
 0x109   : > { %vm407_vm12 = vmand %vm405_vm10, %vm406_vm11 }
 0x10a   : > { %vm408_vm13 = vmor %vm404_vm9, %vm407_vm12 }
 0x10b   : > { %v409_v60 = vsel %vm408_vm13, %v401_v58, %v398_v56  ;;  %v410_v61 = vsel %vm408_vm13, %v402_v59, %v399_v57  ;;  %v670_v57 = vand.u32 (%p102_p2), 2, %v1591_v7 }
 0x10c   : > { %v412_v62 = vrot.slane %v409_v60, 1  ;;  %v413_v63 = vrot.slane %v410_v61, 1 }
 0x10e   : > { %vm415_vm14 = vcmp.gt.s32.totalorder %v412_v62, %v409_v60  ;;  %vm416_vm15 = vcmp.eq.s32.totalorder %v412_v62, %v409_v60  ;;  %vm417_vm0 = vcmp.lt.s32.totalorder %v413_v63, %v410_v61 }
 0x10f   : > { %vm418_vm1 = vmand %vm416_vm15, %vm417_vm0 }
 0x110   : > { %vm419_vm2 = vmor %vm415_vm14, %vm418_vm1 }
 0x111   : > { %v420_v0 = vsel %vm419_vm2, %v412_v62, %v409_v60  ;;  %v421_v1 = vsel %vm419_vm2, %v413_v63, %v410_v61  ;;  %v678_v62 = vunpack.c.0.s8 (%p102_p2), %v677_v54 }
 0x112   : > { %v423_v3 = vrot.slane %v420_v0, 1  ;;  %v424_v4 = vrot.slane %v421_v1, 1 }
 0x114   : > { %vm426_vm3 = vcmp.gt.s32.totalorder %v423_v3, %v420_v0  ;;  %vm427_vm4 = vcmp.eq.s32.totalorder %v423_v3, %v420_v0  ;;  %vm428_vm5 = vcmp.lt.s32.totalorder %v424_v4, %v421_v1 }
 0x115   : > { %vm429_vm6 = vmand %vm427_vm4, %vm428_vm5 }
 0x116   : > { %vm430_vm7 = vmor %vm426_vm3, %vm429_vm6 }
 0x117   : > { %v431_v5 = vsel %vm430_vm7, %v423_v3, %v420_v0  ;;  %v432_v6 = vsel %vm430_vm7, %v424_v4, %v421_v1  ;;  %v1850_v1 = vmov (%p102_p2), 0 }
 0x118   : > { %v434_v8 = vrot.slane %v431_v5, 1  ;;  %v435_v9 = vrot.slane %v432_v6, 1 }
 0x11a   : > { %vm437_vm8 = vcmp.gt.s32.totalorder %v434_v8, %v431_v5  ;;  %vm438_vm9 = vcmp.eq.s32.totalorder %v434_v8, %v431_v5  ;;  %vm439_vm10 = vcmp.lt.s32.totalorder %v435_v9, %v432_v6 }
 0x11b   : > { %vm440_vm11 = vmand %vm438_vm9, %vm439_vm10 }
 0x11c   : > { %vm441_vm12 = vmor %vm437_vm8, %vm440_vm11 }
 0x11d   : > { %v443_v10 = vsel %vm441_vm12, %v435_v9, %v432_v6  ;;  %v442_v11 = vsel %vm441_vm12, %v434_v8, %v431_v5  ;;  %v1677_v5 = vsub.s32 (%p102_p2), %v678_v62, %v1591_v7 }
 0x11e   : > { %450 = vxpose.xlu0.b32.start.end [1/1] (short) (narrow) %v443_v10, 8  ;;  %446 = vst [vmem:[%s445_s15] sm:$0x1] %v442_v11  ;;  %448 = vst [vmem:[%s447_s16] sm:$0x1] %v443_v10  ;;  %v698_v10 = vand.u32 (%p102_p2), 1, %v1591_v7  ;;  %v1856_v7 = vmov (%p102_p2), 0  ;;  %s1434_s15 = sshll.u32 (%p102_p2), %s1568_s0, 4  ;;  %s1435_s15 = int_to_ptr.vmem [resolvable:$true] %s1434_s15 }
 0x11f   :  { %s1527_s16 = scalar_lea.vmem (%p102_p2), %s1435_s15, 32  ;;  %p1532_p4 = scmp.lt.s32.totalorder (%p102_p2), %s1435_s15, %s1435_s15 }
 0x120   :  { %p1528_p3 = scmp.ne.s32.totalorder (%p102_p2), %s1435_s15, %s1527_s16  ;;  %p1533_p5 = scmp.lt.s32.totalorder (%p102_p2), %s1527_s16, %s1527_s16 }
 0x122   :  { %p1534_p6 = por (%p102_p2), %p1533_p5, %p1532_p4 }
 0x124   :  { %p1535_p7 = pnand (%p102_p2), %p1534_p6, %p1528_p3 }
 0x125   :  { %v532_v19 = vld [vmem:[#allocation13 + $0x7] ss:$-1 sm:$0xff] (%p102_p2)  ;;  %v534_v20 = vld [vmem:[#allocation13 + $0xf] ss:$-1 sm:$0xff] (%p102_p2) }
 0x126   :  { %v539_v21 = vld [vmem:[#allocation15 + $0x7] ss:$-1 sm:$0xff] (%p102_p2)  ;;  %v541_v22 = vld [vmem:[#allocation15 + $0xf] ss:$-1 sm:$0xff] (%p102_p2)  ;;  %vm551_vm15 = vcmp.gt.s32.totalorder (%p102_p2), %v545_v23, %v534_v20  ;;  %vm552_vm0 = vcmp.eq.s32.totalorder (%p102_p2), %v545_v23, %v534_v20  ;;  %vm575_vm3 = vcmp.gt.s32.totalorder (%p102_p2), %v566_v25, %v532_v19  ;;  %vm576_vm4 = vcmp.eq.s32.totalorder (%p102_p2), %v566_v25, %v532_v19 }
 0x127   :  { %vm553_vm1 = vcmp.lt.s32.totalorder (%p102_p2), %v546_v24, %v541_v22  ;;  %vm577_vm5 = vcmp.lt.s32.totalorder (%p102_p2), %v568_v26, %v539_v21 }
 0x128   :  { %vm554_vm2 = vmand (%p102_p2), %vm552_vm0, %vm553_vm1 }
 0x129   :  { %vm555_vm6 = vmor (%p102_p2), %vm551_vm15, %vm554_vm2 }
 0x12a   :  { %v556_v30 = vsel (%p102_p2), %vm555_vm6, %v545_v23, %v534_v20  ;;  %vm578_vm7 = vmand (%p102_p2), %vm576_vm4, %vm577_vm5  ;;  %v1610_v31 = vsel (%p102_p2), %vm555_vm6, %v534_v20, %v545_v23  ;;  %v1612_v32 = vsel (%p102_p2), %vm555_vm6, %v541_v22, %v546_v24 }
 0x12b   :  { %vm579_vm8 = vmor (%p102_p2), %vm575_vm3, %vm578_vm7  ;;  %vm1634_vm3 = vcmp.ne.s32.totalorder (%p102_p2), %v642_v40, 0 }
 0x12c   :  { %v581_v35 = vsel (%p102_p2), %vm579_vm8, %v566_v25, %v532_v19  ;;  %v1614_v36 = vsel (%p102_p2), %vm579_vm8, %v532_v19, %v566_v25  ;;  %v587_v37 = vsel (%p102_p2), %vm579_vm8, %v568_v26, %v539_v21  ;;  %v1616_v38 = vsel (%p102_p2), %vm579_vm8, %v539_v21, %v568_v26 }
 0x12d   :  { %vm602_vm9 = vcmp.gt.s32.totalorder (%p102_p2), %v556_v30, %v581_v35  ;;  %vm603_vm10 = vcmp.eq.s32.totalorder (%p102_p2), %v556_v30, %v581_v35  ;;  %vm989_vm0 = vcmp.lt.s32.totalorder (%p102_p2), %v1612_v32, %v1616_v38  ;;  %v1849_v49 = vsel (%p102_p2), %vm1634_vm3, 4294967295, %v1848_v49 }
 0x19e   : > { %v466_v12 = vpop.trf.xlu0 }
 0x19f   : > { %v505_v13 = vrot.slane %v466_v12, 1  ;;  %1504 = vpush %v466_v12 }
 0x1a1   : > { %1506 = vpush %v505_v13 }
 0x1d0   : > { %s1505_s17 = spop %1504 }
 0x1d1   : > { %s483_s18 = sshrl.u32 %s1505_s17, 9  ;;  %s485_s19 = ssub.s32 0, %s1505_s17 }
 0x1d2   : > { %p484_p0 = scmp.lt.s32.totalorder %s1505_s17, 0  ;;  %s1496_s20 = smin.u32 %s1505_s17, %s485_s19 }
 0x1d3   : > { %s487_s21 = sand.u32 511, %s1496_s20   ;;  %s1498_s22 = sshll.u32 %s483_s18, 3 }
 0x1d4   : > { %s488_s23 = ssub.s32 0, %s487_s21  ;;  %s1507_s24 = spop %1506 }
 0x1d5   : > { %s1867_s23 = smov (!%p484_p0, %s488_s23), %s487_s21  ;;  %s509_s28 = ssub.s32 0, %s1507_s24 }
 0x1d6   : > { %s490_s25 = sshrl.u32 %s1867_s23, 7  ;;  %s492_s26 = sand.u32 127, %s1867_s23  }
 0x1d7   : > { %s1497_s27 = sshll.u32 %s490_s25, 8  ;;  %s1500_s30 = smin.u32 %s1507_s24, %s509_s28 }
 0x1d8   : > { %s493_s29 = sadd.s32 %s1497_s27, %s492_s26  ;;  %p508_p1 = scmp.lt.s32.totalorder %s1507_s24, 0 }
 0x1d9   : > { %v495_v14 = vstv %s493_s29  ;;  %s511_s3 = sand.u32 511, %s1500_s30   ;;  %s499_s5 = scalar_lea.vmem [#allocation16], %s1498_s22 }
 0x1da   : > { %vm497_vm13 = vcmp.eq.s32.totalorder %v40_v2, %v495_v14  ;;  %s512_s4 = ssub.s32 0, %s511_s3  ;;  %s502_s6 = scalar_lea.vmem [#allocation17], %s1498_s22 }
 0x1db   : > { %500 = vst.msk [vmem:[%s499_s5] sm:$0xff] %vm497_vm13, %v1563_v15  ;;  %503 = vst.msk [vmem:[%s502_s6] sm:$0xff] %vm497_vm13, %v1564_v16  ;;  %s1869_s4 = smov (!%p508_p1, %s512_s4), %s511_s3  ;;  %s507_s7 = sshrl.u32 %s1507_s24, 9  ;;  %vm987_vm13 = vcmp.gt.s32.totalorder (%p102_p2), %v1610_v31, %v1614_v36 }
 0x1dc   : > { %s514_s8 = sshrl.u32 %s1869_s4, 7  ;;  %s516_s9 = sand.u32 127, %s1869_s4  }
 0x1dd   : > { %s1501_s10 = sshll.u32 %s514_s8, 8  ;;  %s1502_s12 = sshll.u32 %s507_s7, 3 }
 0x1de   : > { %s517_s11 = sadd.s32 %s1501_s10, %s516_s9  ;;  %s523_s13 = scalar_lea.vmem [#allocation16], %s1502_s12 }
 0x1df   : > { %v519_v17 = vstv %s517_s11  ;;  %s526_s14 = scalar_lea.vmem [#allocation17], %s1502_s12  ;;  %104 = sbr.rel (!%p102_p2) target bundleno = 18 (0x12), region = 123 }
 0x1e0   : > { %v520_v18 = vadd.s32 128, %v519_v17 }
 0x1e2   : > { %vm521_vm14 = vcmp.eq.s32.totalorder %v40_v2, %v520_v18  ;;  %v560_v2 = vsel (%p102_p2), %vm555_vm6, %v546_v24, %v541_v22 }
 0x1e3   : > { %524 = vst.msk [vmem:[%s523_s13] sm:$0xff] %vm521_vm14, %v1563_v15  ;;  %527 = vst.msk [vmem:[%s526_s14] sm:$0xff] %vm521_vm14, %v1564_v16  ;;  %vm604_vm11 = vcmp.lt.s32.totalorder (%p102_p2), %v560_v2, %v587_v37  ;;  %vm988_vm14 = vcmp.eq.s32.totalorder (%p102_p2), %v1610_v31, %v1614_v36 }
 0x1e4   :  { %vm605_vm12 = vmand (%p102_p2), %vm603_vm10, %vm604_vm11 }
 0x1e5   :  { %vm606_vm15 = vmor (%p102_p2), %vm602_vm9, %vm605_vm12 }
 0x1e6   :  { %v607_v42 = vsel %vm606_vm15, %v556_v30, %v581_v35  ;;  %v609_v43 = vsel %vm606_vm15, %v581_v35, %v556_v30  ;;  %v611_v44 = vsel %vm606_vm15, %v560_v2, %v587_v37  ;;  %v613_v45 = vsel %vm606_vm15, %v587_v37, %v560_v2  ;;  %vm990_vm1 = vmand %vm988_vm14, %vm989_vm0 }
 0x1e7   :  { %v626_v46 = vrot.slane %v607_v42, %v1619_v39  ;;  %v633_v47 = vrot.slane %v611_v44, %v1619_v39  ;;  %vm1630_vm2 = vmor %vm987_vm13, %vm990_vm1  ;;  %v807_v50 = vrot.slane %v609_v43, %v1619_v39  ;;  %v814_v51 = vrot.slane %v613_v45, %v1619_v39 }
 0x1e8   :  { %v1644_v52 = vsel %vm1630_vm2, %v1610_v31, %v1614_v36  ;;  %v1653_v56 = vsel %vm1630_vm2, %v1612_v32, %v1616_v38  ;;  %vm1666_vm1 = vcmp.ne.s32.totalorder %v670_v57, 0  ;;  %v1721_v29 = vsel %vm1630_vm2, %v1614_v36, %v1610_v31 }
 0x1e9   :  { %vm635_vm4 = vcmp.gt.s32.totalorder %v607_v42, %v626_v46  ;;  %vm636_vm5 = vcmp.eq.s32.totalorder %v607_v42, %v626_v46  ;;  %vm637_vm6 = vcmp.lt.s32.totalorder %v611_v44, %v633_v47  ;;  %vm817_vm8 = vcmp.eq.s32.totalorder %v609_v43, %v807_v50 }
 0x1ea   :  { %vm638_vm7 = vmand %vm636_vm5, %vm637_vm6  ;;  %vm818_vm9 = vcmp.lt.s32.totalorder %v613_v45, %v814_v51  ;;  %vm816_vm11 = vcmp.gt.s32.totalorder %v609_v43, %v807_v50  ;;  %v1011_v58 = vrot.slane %v1644_v52, %v1619_v39  ;;  %v1018_v59 = vrot.slane %v1653_v56, %v1619_v39 }
 0x1eb   :  { %vm639_vm10 = vmor %vm635_vm4, %vm638_vm7  ;;  %v1851_v1 = vsel %vm1666_vm1, 4294967295, %v1850_v1  ;;  %v1727_v30 = vsel %vm1630_vm2, %v1616_v38, %v1612_v32  ;;  %v1737_v31 = vrot.slane %v1721_v29, %v1619_v39 }
 0x1ec   :  { %vm644_vm12 = vmxor %vm639_vm10, %vm1634_vm3  ;;  %vm1021_vm14 = vcmp.eq.s32.totalorder %v1644_v52, %v1011_v58  ;;  %vm1022_vm0 = vcmp.lt.s32.totalorder %v1653_v56, %v1018_v59  ;;  %vm1020_vm10 = vcmp.gt.s32.totalorder %v1644_v52, %v1011_v58  ;;  %v1741_v32 = vrot.slane %v1727_v30, %v1619_v39 }
 0x1ed   :  { %v645_v60 = vsel %vm644_vm12, %v607_v42, %v626_v46  ;;  %v646_v61 = vsel %vm644_vm12, %v611_v44, %v633_v47  ;;  %vm819_vm13 = vmand %vm817_vm8, %vm818_vm9 }
 0x1ee   :  { %v654_v63 = vrot.slane %v645_v60, %v1647_v55  ;;  %v661_v0 = vrot.slane %v646_v61, %v1647_v55  ;;  %vm820_vm15 = vmor %vm816_vm11, %vm819_vm13 }
 0x1ef   :  { %vm825_vm4 = vmxor %vm820_vm15, %vm1634_vm3 }
 0x1f0   :  { %vm663_vm5 = vcmp.gt.s32.totalorder %v645_v60, %v654_v63  ;;  %vm664_vm6 = vcmp.eq.s32.totalorder %v645_v60, %v654_v63  ;;  %vm665_vm7 = vcmp.lt.s32.totalorder %v646_v61, %v661_v0  ;;  %v826_v3 = vsel %vm825_vm4, %v609_v43, %v807_v50  ;;  %vm1672_vm8 = vmand %vm1021_vm14, %vm1022_vm0 }
 0x1f1   :  { %vm666_vm9 = vmand %vm664_vm6, %vm665_vm7  ;;  %v827_v6 = vsel %vm825_vm4, %v613_v45, %v814_v51  ;;  %v835_v8 = vrot.slane %v826_v3, %v1647_v55  ;;  %v1860_v50 = vmov 0 }
 0x1f2   :  { %vm667_vm11 = vmor %vm663_vm5, %vm666_vm9  ;;  %v842_v9 = vrot.slane %v827_v6, %v1647_v55 }
 0x1f3   :  { %vm672_vm12 = vmxor %vm667_vm11, %vm1666_vm1  ;;  %vm844_vm13 = vcmp.gt.s32.totalorder %v826_v3, %v835_v8  ;;  %vm845_vm14 = vcmp.eq.s32.totalorder %v826_v3, %v835_v8  ;;  %vm1693_vm11 = vcmp.ne.s32.totalorder %v698_v10, 0 }
 0x1f4   :  { %v673_v11 = vsel %vm672_vm12, %v645_v60, %v654_v63  ;;  %v674_v12 = vsel %vm672_vm12, %v646_v61, %v661_v0  ;;  %vm846_vm15 = vcmp.lt.s32.totalorder %v827_v6, %v842_v9  ;;  %vm1687_vm0 = vmor %vm1020_vm10, %vm1672_vm8  ;;  %v1857_v7 = vsel %vm1693_vm11, 4294967295, %v1856_v7 }
 0x1f5   :  { %v682_v14 = vrot.slane %v673_v11, %v1677_v5  ;;  %v689_v15 = vrot.slane %v674_v12, %v1677_v5  ;;  %vm847_vm4 = vmand %vm845_vm14, %vm846_vm15 }
 0x1f6   :  { %vm848_vm5 = vmor %vm844_vm13, %vm847_vm4 }
 0x1f7   :  { %vm691_vm6 = vcmp.gt.s32.totalorder %v673_v11, %v682_v14  ;;  %vm692_vm7 = vcmp.eq.s32.totalorder %v673_v11, %v682_v14  ;;  %vm693_vm9 = vcmp.lt.s32.totalorder %v674_v12, %v689_v15  ;;  %vm853_vm12 = vmxor %vm848_vm5, %vm1666_vm1 }
 0x1f8   :  { %vm694_vm8 = vmand %vm692_vm7, %vm693_vm9  ;;  %v854_v16 = vsel %vm853_vm12, %v826_v3, %v835_v8  ;;  %v855_v17 = vsel %vm853_vm12, %v827_v6, %v842_v9 }
 0x1f9   :  { %vm695_vm10 = vmor %vm691_vm6, %vm694_vm8  ;;  %v863_v18 = vrot.slane %v854_v16, %v1677_v5  ;;  %v870_v19 = vrot.slane %v855_v17, %v1677_v5 }
 0x1fa   :  { %vm700_vm13 = vmxor %vm695_vm10, %vm1693_vm11 }
 0x1fb   :  { %v701_v20 = vsel %vm700_vm13, %v673_v11, %v682_v14  ;;  %v702_v21 = vsel %vm700_vm13, %v674_v12, %v689_v15  ;;  %vm872_vm14 = vcmp.gt.s32.totalorder %v854_v16, %v863_v18  ;;  %vm873_vm15 = vcmp.eq.s32.totalorder %v854_v16, %v863_v18  ;;  %vm1029_vm4 = vmxor %vm1687_vm0, %vm1634_vm3 }
 0x1fc   :  { %v716_v22 = vrot.slane %v701_v20, %v1619_v39  ;;  %v723_v23 = vrot.slane %v702_v21, %v1619_v39  ;;  %vm874_vm5 = vcmp.lt.s32.totalorder %v855_v17, %v870_v19  ;;  %v1030_v24 = vsel %vm1029_vm4, %v1644_v52, %v1011_v58 }
 0x1fd   :  { %vm875_vm6 = vmand %vm873_vm15, %vm874_vm5  ;;  %v1031_v25 = vsel %vm1029_vm4, %v1653_v56, %v1018_v59  ;;  %v1039_v26 = vrot.slane %v1030_v24, %v1647_v55 }
 0x1fe   :  { %vm725_vm7 = vcmp.gt.s32.totalorder %v701_v20, %v716_v22  ;;  %vm726_vm9 = vcmp.eq.s32.totalorder %v701_v20, %v716_v22  ;;  %vm727_vm12 = vcmp.lt.s32.totalorder %v702_v21, %v723_v23  ;;  %vm1712_vm8 = vmor %vm872_vm14, %vm875_vm6  ;;  %v1046_v28 = vrot.slane %v1031_v25, %v1647_v55 }
 0x1ff   :  { %vm728_vm0 = vmand %vm726_vm9, %vm727_vm12  ;;  %vm1049_vm13 = vcmp.eq.s32.totalorder %v1030_v24, %v1039_v26  ;;  %vm1048_vm4 = vcmp.gt.s32.totalorder %v1030_v24, %v1039_v26 }
 0x200   :  { %vm729_vm10 = vmor %vm725_vm7, %vm728_vm0  ;;  %vm1050_vm14 = vcmp.lt.s32.totalorder %v1031_v25, %v1046_v28 }
 0x201   :  { %vm734_vm15 = vmxor %vm729_vm10, %vm1634_vm3 }
 0x202   :  { %v735_v2 = vsel %vm734_vm15, %v701_v20, %v716_v22  ;;  %v736_v33 = vsel %vm734_vm15, %v702_v21, %v723_v23  ;;  %vm881_vm5 = vmxor %vm1712_vm8, %vm1693_vm11  ;;  %vm1202_vm11 = vcmp.eq.s32.totalorder %v1721_v29, %v1737_v31 }
 0x203   :  { %v744_v34 = vrot.slane %v735_v2, %v1647_v55  ;;  %v751_v35 = vrot.slane %v736_v33, %v1647_v55  ;;  %v882_v36 = vsel %vm881_vm5, %v854_v16, %v863_v18  ;;  %v883_v37 = vsel %vm881_vm5, %v855_v17, %v870_v19  ;;  %vm1051_vm2 = vmand %vm1049_vm13, %vm1050_vm14 }
 0x204   :  { %v897_v38 = vrot.slane %v882_v36, %v1619_v39  ;;  %v904_v40 = vrot.slane %v883_v37, %v1619_v39  ;;  %vm1052_vm6 = vmor %vm1048_vm4, %vm1051_vm2  ;;  %vm1203_vm14 = vcmp.lt.s32.totalorder %v1727_v30, %v1741_v32 }
 0x205   :  { %vm753_vm7 = vcmp.gt.s32.totalorder %v735_v2, %v744_v34  ;;  %vm754_vm9 = vcmp.eq.s32.totalorder %v735_v2, %v744_v34  ;;  %vm755_vm12 = vcmp.lt.s32.totalorder %v736_v33, %v751_v35  ;;  %vm1057_vm8 = vmxor %vm1052_vm6, %vm1666_vm1 }
 0x206   :  { %vm756_vm0 = vmand %vm754_vm9, %vm755_vm12  ;;  %vm907_vm10 = vcmp.eq.s32.totalorder %v882_v36, %v897_v38  ;;  %vm908_vm15 = vcmp.lt.s32.totalorder %v883_v37, %v904_v40  ;;  %v1058_v41 = vsel %vm1057_vm8, %v1030_v24, %v1039_v26  ;;  %vm906_vm13 = vcmp.gt.s32.totalorder %v882_v36, %v897_v38 }
 0x207   :  { %vm757_vm5 = vmor %vm753_vm7, %vm756_vm0  ;;  %v1059_v42 = vsel %vm1057_vm8, %v1031_v25, %v1046_v28  ;;  %v1067_v43 = vrot.slane %v1058_v41, %v1677_v5 }
 0x208   :  { %vm762_vm4 = vmxor %vm757_vm5, %vm1666_vm1  ;;  %v1074_v44 = vrot.slane %v1059_v42, %v1677_v5 }
 0x209   :  { %v763_v45 = vsel %vm762_vm4, %v735_v2, %v744_v34  ;;  %v764_v46 = vsel %vm762_vm4, %v736_v33, %v751_v35  ;;  %vm909_vm2 = vmand %vm907_vm10, %vm908_vm15  ;;  %vm1077_vm6 = vcmp.eq.s32.totalorder %v1058_v41, %v1067_v43 }
 0x20a   :  { %v772_v47 = vrot.slane %v763_v45, %v1677_v5  ;;  %v779_v48 = vrot.slane %v764_v46, %v1677_v5  ;;  %vm910_vm7 = vmor %vm906_vm13, %vm909_vm2  ;;  %vm1078_vm9 = vcmp.lt.s32.totalorder %v1059_v42, %v1074_v44  ;;  %vm1076_vm13 = vcmp.gt.s32.totalorder %v1058_v41, %v1067_v43 }
 0x20b   :  { %vm1762_vm12 = vmand %vm1202_vm11, %vm1203_vm14  ;;  %vm1862_vm11 = vnez %v1857_v7 }
 0x20c   :  { %v1861_v50 = vsel %vm1762_vm12, 4294967295, %v1860_v50  ;;  %vm915_vm8 = vmxor %vm910_vm7, %vm1634_vm3  ;;  %vm781_vm0 = vcmp.gt.s32.totalorder %v763_v45, %v772_v47  ;;  %vm782_vm5 = vcmp.eq.s32.totalorder %v763_v45, %v772_v47  ;;  %vm783_vm10 = vcmp.lt.s32.totalorder %v764_v46, %v779_v48 }
 0x20d   :  { %v916_v51 = vsel %vm915_vm8, %v882_v36, %v897_v38  ;;  %vm1079_vm15 = vmand %vm1077_vm6, %vm1078_vm9  ;;  %v917_v52 = vsel %vm915_vm8, %v883_v37, %v904_v40  ;;  %vm1201_vm8 = vcmp.gt.s32.totalorder %v1721_v29, %v1737_v31 }
 0x20e   :  { %vm784_vm4 = vmand %vm782_vm5, %vm783_vm10  ;;  %v925_v53 = vrot.slane %v916_v51, %v1647_v55  ;;  %v932_v54 = vrot.slane %v917_v52, %v1647_v55 }
 0x20f   :  { %vm785_vm2 = vmor %vm781_vm0, %vm784_vm4  ;;  %vm1863_vm0 = vnez %v1851_v1 }
 0x210   :  { %vm790_vm14 = vmxor %vm785_vm2, %vm1862_vm11  ;;  %vm934_vm12 = vcmp.gt.s32.totalorder %v916_v51, %v925_v53  ;;  %vm935_vm1 = vcmp.eq.s32.totalorder %v916_v51, %v925_v53  ;;  %vm936_vm7 = vcmp.lt.s32.totalorder %v917_v52, %v932_v54 }
 0x211   :  { %v791_v56 = vsel %vm790_vm14, %v763_v45, %v772_v47  ;;  %v792_v57 = vsel %vm790_vm14, %v764_v46, %v779_v48  ;;  %vm1080_vm3 = vmor %vm1076_vm13, %vm1079_vm15  ;;  %vm1865_vm15 = vnez %v1849_v49 }
 0x212   :  { %794 = vst [vmem:[#allocation12] sm:$0xff] %v791_v56  ;;  %795 = vst [vmem:[#allocation14] sm:$0xff] %v792_v57 }
 0x213   :  { %vm937_vm6 = vmand %vm935_vm1, %vm936_vm7  ;;  %vm1864_vm1 = vnez %v1861_v50 }
 0x214   :  { %vm938_vm9 = vmor %vm934_vm12, %vm937_vm6 }
 0x215   :  { %vm943_vm5 = vmxor %vm938_vm9, %vm1863_vm0 }
 0x216   :  { %v944_v58 = vsel %vm943_vm5, %v916_v51, %v925_v53  ;;  %v945_v59 = vsel %vm943_vm5, %v917_v52, %v932_v54  ;;  %vm1085_vm10 = vmxor %vm1080_vm3, %vm1862_vm11 }
 0x217   :  { %v953_v60 = vrot.slane %v944_v58, %v1677_v5  ;;  %v960_v61 = vrot.slane %v945_v59, %v1677_v5  ;;  %v1086_v62 = vsel %vm1085_vm10, %v1058_v41, %v1067_v43  ;;  %v1087_v63 = vsel %vm1085_vm10, %v1059_v42, %v1074_v44  ;;  %vm1205_vm12 = vmor %vm1201_vm8, %vm1864_vm1 }
 0x218   :  { %v1101_v0 = vrot.slane %v1086_v62, %v1619_v39  ;;  %v1108_v3 = vrot.slane %v1087_v63, %v1619_v39  ;;  %vm1210_vm4 = vmxor %vm1205_vm12, %vm1865_vm15 }
 0x219   :  { %vm962_vm13 = vcmp.gt.s32.totalorder %v944_v58, %v953_v60  ;;  %vm963_vm2 = vcmp.eq.s32.totalorder %v944_v58, %v953_v60  ;;  %vm964_vm14 = vcmp.lt.s32.totalorder %v945_v59, %v960_v61  ;;  %v1211_v4 = vsel %vm1210_vm4, %v1721_v29, %v1737_v31  ;;  %v1396_v1 = vld [vmem:[#allocation14] sm:$0xff] }
 0x21a   :  { %vm965_vm3 = vmand %vm963_vm2, %vm964_vm14  ;;  %vm1111_vm7 = vcmp.eq.s32.totalorder %v1086_v62, %v1101_v0  ;;  %vm1112_vm6 = vcmp.lt.s32.totalorder %v1087_v63, %v1108_v3  ;;  %v1212_v6 = vsel %vm1210_vm4, %v1727_v30, %v1741_v32  ;;  %vm1110_vm8 = vcmp.gt.s32.totalorder %v1086_v62, %v1101_v0  ;;  %v1363_v36 = vld [vmem:[#allocation12] sm:$0xff]  ;;  %1399 = vxpose.xlu0.b32.start [1/2] (short) (narrow) %v1396_v1, 8 }
 0x21b   :  { %vm966_vm9 = vmor %vm962_vm13, %vm965_vm3  ;;  %v1220_v8 = vrot.slane %v1211_v4, %v1647_v55  ;;  %v1227_v9 = vrot.slane %v1212_v6, %v1647_v55  ;;  %v1365_v37 = vsub.s32 2147483647, %v1363_v36 }
 0x21c   :  { %vm971_vm5 = vmxor %vm966_vm9, %vm1862_vm11 }
 0x21d   :  { %v972_v10 = vsel %vm971_vm5, %v944_v58, %v953_v60  ;;  %v973_v11 = vsel %vm971_vm5, %v945_v59, %v960_v61  ;;  %vm1113_vm10 = vmand %vm1111_vm7, %vm1112_vm6  ;;  %vm1230_vm1 = vcmp.eq.s32.totalorder %v1211_v4, %v1220_v8  ;;  %vm1229_vm2 = vcmp.gt.s32.totalorder %v1211_v4, %v1220_v8 }
 0x21e   :  { %975 = vst [vmem:[#allocation12 + $0x8] sm:$0xff] %v972_v10  ;;  %976 = vst [vmem:[#allocation14 + $0x8] sm:$0xff] %v973_v11  ;;  %vm1231_vm14 = vcmp.lt.s32.totalorder %v1212_v6, %v1227_v9 }
 0x21f   :  { %vm1114_vm12 = vmor %vm1110_vm8, %vm1113_vm10 }
 0x220   :  { %vm1119_vm4 = vmxor %vm1114_vm12, %vm1865_vm15 }
 0x221   :  { %v1120_v12 = vsel %vm1119_vm4, %v1086_v62, %v1101_v0  ;;  %v1121_v13 = vsel %vm1119_vm4, %v1087_v63, %v1108_v3  ;;  %vm1232_vm13 = vmand %vm1230_vm1, %vm1231_vm14 }
 0x222   :  { %v1129_v14 = vrot.slane %v1120_v12, %v1647_v55  ;;  %v1136_v15 = vrot.slane %v1121_v13, %v1647_v55  ;;  %vm1233_vm3 = vmor %vm1229_vm2, %vm1232_vm13 }
 0x223   :  { %vm1238_vm7 = vmxor %vm1233_vm3, %vm1863_vm0 }
 0x224   :  { %vm1138_vm6 = vcmp.gt.s32.totalorder %v1120_v12, %v1129_v14  ;;  %vm1139_vm9 = vcmp.eq.s32.totalorder %v1120_v12, %v1129_v14  ;;  %vm1140_vm5 = vcmp.lt.s32.totalorder %v1121_v13, %v1136_v15  ;;  %v1239_v16 = vsel %vm1238_vm7, %v1211_v4, %v1220_v8 }
 0x225   :  { %vm1141_vm8 = vmand %vm1139_vm9, %vm1140_vm5  ;;  %v1240_v17 = vsel %vm1238_vm7, %v1212_v6, %v1227_v9  ;;  %v1248_v18 = vrot.slane %v1239_v16, %v1677_v5  ;;  %v1369_v38 = vld [vmem:[#allocation12 + $0x8] sm:$0xff] }
 0x226   :  { %vm1142_vm10 = vmor %vm1138_vm6, %vm1141_vm8  ;;  %v1255_v19 = vrot.slane %v1240_v17, %v1677_v5  ;;  %v1398_v40 = vld [vmem:[#allocation14 + $0x8] sm:$0xff] }
 0x227   :  { %vm1147_vm1 = vmxor %vm1142_vm10, %vm1863_vm0  ;;  %vm1257_vm12 = vcmp.gt.s32.totalorder %v1239_v16, %v1248_v18  ;;  %vm1258_vm14 = vcmp.eq.s32.totalorder %v1239_v16, %v1248_v18  ;;  %1400 = vxpose.xlu0.b32.end [2/2] (short) (narrow) %v1398_v40, 8 }
 0x228   :  { %v1148_v20 = vsel %vm1147_vm1, %v1120_v12, %v1129_v14  ;;  %v1149_v21 = vsel %vm1147_vm1, %v1121_v13, %v1136_v15  ;;  %vm1259_vm2 = vcmp.lt.s32.totalorder %v1240_v17, %v1255_v19 }
 0x229   :  { %v1157_v22 = vrot.slane %v1148_v20, %v1677_v5  ;;  %v1164_v23 = vrot.slane %v1149_v21, %v1677_v5  ;;  %vm1260_vm4 = vmand %vm1258_vm14, %vm1259_vm2 }
 0x22a   :  { %vm1261_vm13 = vmor %vm1257_vm12, %vm1260_vm4 }
 0x22b   :  { %vm1166_vm3 = vcmp.gt.s32.totalorder %v1148_v20, %v1157_v22  ;;  %vm1167_vm7 = vcmp.eq.s32.totalorder %v1148_v20, %v1157_v22  ;;  %vm1168_vm9 = vcmp.lt.s32.totalorder %v1149_v21, %v1164_v23  ;;  %vm1266_vm6 = vmxor %vm1261_vm13, %vm1862_vm11 }
 0x22c   :  { %vm1169_vm5 = vmand %vm1167_vm7, %vm1168_vm9  ;;  %v1267_v24 = vsel %vm1266_vm6, %v1239_v16, %v1248_v18  ;;  %v1268_v25 = vsel %vm1266_vm6, %v1240_v17, %v1255_v19 }
 0x22d   :  { %vm1170_vm8 = vmor %vm1166_vm3, %vm1169_vm5  ;;  %v1282_v26 = vrot.slane %v1267_v24, %v1619_v39  ;;  %v1289_v27 = vrot.slane %v1268_v25, %v1619_v39 }
 0x22e   :  { %vm1175_vm10 = vmxor %vm1170_vm8, %vm1862_vm11 }
 0x22f   :  { %v1176_v28 = vsel %vm1175_vm10, %v1148_v20, %v1157_v22  ;;  %v1177_v29 = vsel %vm1175_vm10, %v1149_v21, %v1164_v23  ;;  %vm1291_vm1 = vcmp.gt.s32.totalorder %v1267_v24, %v1282_v26  ;;  %vm1292_vm12 = vcmp.eq.s32.totalorder %v1267_v24, %v1282_v26 }
 0x230   :  { %1179 = vst [vmem:[#allocation13] sm:$0xff] %v1176_v28  ;;  %1180 = vst [vmem:[#allocation15] sm:$0xff] %v1177_v29  ;;  %vm1293_vm14 = vcmp.lt.s32.totalorder %v1268_v25, %v1289_v27 }
 0x231   :  { %vm1294_vm2 = vmand %vm1292_vm12, %vm1293_vm14 }
 0x232   :  { %vm1295_vm4 = vmor %vm1291_vm1, %vm1294_vm2 }
 0x233   :  { %vm1300_vm13 = vmxor %vm1295_vm4, %vm1865_vm15  ;;  %vm1370_vm4 = vcmp.lt.s32.totalorder %v1369_v38, 0 }
 0x234   :  { %v1301_v30 = vsel %vm1300_vm13, %v1267_v24, %v1282_v26  ;;  %v1302_v2 = vsel %vm1300_vm13, %v1268_v25, %v1289_v27 }
 0x235   :  { %v1310_v33 = vrot.slane %v1301_v30, %v1647_v55  ;;  %v1317_v39 = vrot.slane %v1302_v2, %v1647_v55 }
 0x237   :  { %vm1319_vm3 = vcmp.gt.s32.totalorder %v1301_v30, %v1310_v33  ;;  %vm1320_vm7 = vcmp.eq.s32.totalorder %v1301_v30, %v1310_v33  ;;  %vm1321_vm9 = vcmp.lt.s32.totalorder %v1302_v2, %v1317_v39 }
 0x238   :  { %vm1322_vm6 = vmand %vm1320_vm7, %vm1321_vm9 }
 0x239   :  { %vm1323_vm5 = vmor %vm1319_vm3, %vm1322_vm6 }
 0x23a   :  { %vm1328_vm8 = vmxor %vm1323_vm5, %vm1863_vm0  ;;  %vm1364_vm0 = vcmp.lt.s32.totalorder %v1363_v36, 0 }
 0x23b   :  { %v1329_v31 = vsel %vm1328_vm8, %v1301_v30, %v1310_v33  ;;  %v1330_v32 = vsel %vm1328_vm8, %v1302_v2, %v1317_v39  ;;  %v1366_v41 = vsel %vm1364_vm0, %v1365_v37, %v1363_v36 }
 0x23c   :  { %v1338_v34 = vrot.slane %v1329_v31, %v1677_v5  ;;  %v1345_v49 = vrot.slane %v1330_v32, %v1677_v5  ;;  %v1371_v5 = vsub.s32 2147483647, %v1369_v38  ;;  %1367 = vst [vmem:[#allocation12] sm:$0xff] %v1366_v41  ;;  %1377 = vxpose.xlu1.b32.start [1/2] (short) (narrow) %v1366_v41, 8 }
 0x23e   :  { %vm1347_vm15 = vcmp.gt.s32.totalorder %v1329_v31, %v1338_v34  ;;  %vm1348_vm10 = vcmp.eq.s32.totalorder %v1329_v31, %v1338_v34  ;;  %vm1349_vm1 = vcmp.lt.s32.totalorder %v1330_v32, %v1345_v49  ;;  %v1372_v42 = vsel %vm1370_vm4, %v1371_v5, %v1369_v38 }
 0x23f   :  { %vm1350_vm12 = vmand %vm1348_vm10, %vm1349_vm1  ;;  %1373 = vst [vmem:[#allocation12 + $0x8] sm:$0xff] %v1372_v42 }
 0x240   :  { %vm1351_vm14 = vmor %vm1347_vm15, %vm1350_vm12  ;;  %1378 = vxpose.xlu1.b32.end [2/2] (short) (narrow) %v1372_v42, 8 }
 0x241   :  { %vm1356_vm2 = vmxor %vm1351_vm14, %vm1862_vm11 }
 0x242   :  { %v1357_v55 = vsel %vm1356_vm2, %v1329_v31, %v1338_v34  ;;  %v1358_v35 = vsel %vm1356_vm2, %v1330_v32, %v1345_v49 }
 0x243   :  { %1360 = vst [vmem:[#allocation13 + $0x8] sm:$0xff] %v1357_v55  ;;  %1361 = vst [vmem:[#allocation15 + $0x8] sm:$0xff] %v1358_v35 }
 0x2a3   :  { %v1401_v7 = vpop.trf.xlu0 }
 0x2a4   :  { %1417 = vst [vmem:[#allocation10] sm:$0xff] %v1401_v7 }
 0x2ab   :  { %v1427_v44 = vld [vmem:[#allocation10] sm:$0x3] }
 0x2ac   :  { %1429 = vst [vmem:[#allocation11] sm:$0x3] %v1427_v44 }
 0x2bc   :  { %v1379_v43 = vpop.trf.xlu1 }
 0x2bd   :  { %1395 = vst [vmem:[#allocation7] sm:$0xff] %v1379_v43 }
 0x2c4   :  { %v1421_v45 = vld [vmem:[#allocation7] sm:$0x3] }
 0x2c5   :  { %1423 = vst [vmem:[#allocation8] sm:$0x3] %v1421_v45 }
 0x2c6   :  { %1538 = shalt.err (!%p1535_p7)
}
 0x2c7   :  { %s1539_s19 = scalar_lea.hbm %s1838_s1, 32 }
 0x2c8   :  { %p1540_p8 = scmp.ne.s32.totalorder %s1838_s1, %s1539_s19  ;;  %p1543_p9 = scmp.lt.u32.totalorder %s1539_s19, %s1838_s1 }
 0x2ca   :  { %p1545_p10 = pnand %p1543_p9, %p1540_p8 }
 0x2cc   :  { %1548 = shalt.err (!%p1545_p10)
}
 0x2cd   :  { %1437 = dma.vmem_to_hbm [thread:$0]  %s1435_s15, 32, %s1838_s1, [#allocation9]   ;;  %v1453_v46 = vld [vmem:[#allocation11] sm:$0x3] }
 0x2ce   :  { %1454 = vst [vmem:[%s1839_s2] sm:$0x3] %v1453_v46 }
 0x2cf   :  { %1553 = dma.done.wait [#allocation9], 32  }
 0x2d0   :  { %1554 = vsyncadd [#allocation9], 4294967264 }
 0x2d1   :  { %1470 = vsyncpa [#allocation9], 1 }

// kernel: _lambda_.14
= control target key start
LH: loop header
LB: loop body
LE: loop exit
PB: predicated region body
PF: predicated region fallthrough
CT: control target
= control target key end

     0   :  { %v419_v0 = vlaneseq  ;;  %vm911_vm0 = vcmask 1040384   ;;  %vm936_vm1 = vcmask 1041408   ;;  %vm961_vm2 = vcmask 1042432   ;;  %s1498_s0 = inlined_call_operand.vmem [shape: f32[4,3072], index: 0, kind: input, shape index: {}]   ;;  %s1499_s1 = inlined_call_operand.vmem [shape: f32[4,3072], index: 1, kind: input, shape index: {}]   ;;  %s1500_s2 = inlined_call_operand.vmem [shape: f32[4,3072], index: 2, kind: output, shape index: {}]  }
   0x1   :  { %v11_v1 = vld [vmem:[%s1498_s0] sm:$0xff]  ;;  %v12_v3 = vld [vmem:[%s1498_s0 + $0x8] sm:$0xff]  ;;  %v13_v8 = vld [vmem:[%s1498_s0 + $0x10] sm:$0xff] }
   0x2   :  { %v23_v2 = vld [vmem:[%s1499_s1] sm:$0xff]  ;;  %v155_v5 = vmin.f32 %v11_v1, 4.1351666  ;;  %v420_v6 = vshrl.u32 %v419_v0, 7  ;;  %v24_v7 = vld [vmem:[%s1499_s1 + $0x8] sm:$0xff]  ;;  %v25_v11 = vld [vmem:[%s1499_s1 + $0x10] sm:$0xff] }
   0x3   :  { %v47_v4 = vrot.slane %v23_v2, 6  ;;  %v48_v9 = vrot.slane %v24_v7, 6  ;;  %v156_v10 = vmin.f32 %v12_v3, 4.1351666  ;;  %v157_v12 = vmin.f32 %v13_v8, 4.1351666 }
   0x4   :  { %v239_v14 = vmul.f32 1.442695, %v155_v5  ;;  %v1131_v15 = vsub.s32 0, %v420_v6  ;;  %v1133_v16 = vsub.s32 4, %v420_v6  ;;  %v1135_v17 = vsub.s32 1, %v420_v6  ;;  %v26_v20 = vld [vmem:[%s1499_s1 + $0x18] sm:$0xff] }
   0x5   :  { %v71_v13 = vsub.f32 %v23_v2, %v47_v4  ;;  %v72_v18 = vsub.f32 %v24_v7, %v48_v9  ;;  %v241_v19 = vmul.f32 1.442695, %v156_v10  ;;  %v49_v23 = vrot.slane %v25_v11, 6  ;;  %v14_v24 = vld [vmem:[%s1498_s0 + $0x18] sm:$0xff]  ;;  %v15_v32 = vld [vmem:[%s1498_s0 + $0x20] sm:$0xff]  ;;  %v28_v45 = vld [vmem:[%s1499_s1 + $0x28] sm:$0xff] }
   0x6   :  { %1074 = vpow2.f32 %v239_v14  ;;  %v243_v27 = vmul.f32 1.442695, %v157_v12  ;;  %v50_v31 = vrot.slane %v26_v20, 6  ;;  %v27_v33 = vld [vmem:[%s1499_s1 + $0x20] sm:$0xff]  ;;  %v1149_v34 = vsub.s32 5, %v420_v6  ;;  %v16_v50 = vld [vmem:[%s1498_s0 + $0x28] sm:$0xff] }
   0x7   :  { %v83_v21 = vmul.f32 0.5, %v71_v13  ;;  %v1062_v22 = vrot.slane %v71_v13, 10  ;;  %v84_v25 = vmul.f32 0.5, %v72_v18  ;;  %v1063_v26 = vrot.slane %v72_v18, 10  ;;  %v17_v12 = vld [vmem:[%s1498_s0 + $0x30] sm:$0xff] }
   0x8   :  { %1076 = vpow2.f32 %v241_v19  ;;  %v73_v30 = vsub.f32 %v25_v11, %v49_v23  ;;  %v158_v36 = vmin.f32 %v14_v24, 4.1351666  ;;  %v1151_v40 = vsub.f32 %v26_v20, %v50_v31 }
   0x9   :  { %v1050_v28 = vrot.slane %v83_v21, 10  ;;  %v215_v29 = vmul.f32 %v1062_v22, %v11_v1  ;;  %v1051_v35 = vrot.slane %v84_v25, 10  ;;  %1078 = vpow2.f32 %v243_v27 }
   0xa   :  { %v85_v38 = vmul.f32 0.5, %v73_v30  ;;  %v1064_v39 = vrot.slane %v73_v30, 10  ;;  %v216_v41 = vmul.f32 %v1063_v26, %v12_v3  ;;  %v245_v42 = vmul.f32 1.442695, %v158_v36 }
   0xb   :  { %v143_v37 = vadd.f32 %v1050_v28, %v23_v2  ;;  %v51_v43 = vrot.slane %v27_v33, 6  ;;  %v159_v44 = vmin.f32 %v15_v32, 4.1351666  ;;  %v144_v47 = vadd.f32 %v1051_v35, %v24_v7  ;;  %v1172_v2 = vld [vmem:[%s1499_s1 + $0x30] sm:$0xff] }
   0xc   :  { %v1052_v48 = vrot.slane %v85_v38, 10  ;;  %v86_v49 = vmul.f32 0.5, %v1151_v40  ;;  %v217_v51 = vmul.f32 %v1064_v39, %v13_v8  ;;  %v1065_v52 = vrot.slane %v1151_v40, 10 }
   0xd   :  { %v1156_v46 = vadd.f32 %v215_v29, %v143_v37  ;;  %1080 = vpow2.f32 %v245_v42  ;;  %v1163_v53 = vsub.f32 %v27_v33, %v51_v43  ;;  %v247_v56 = vmul.f32 1.442695, %v159_v44 }
   0xe   :  { %v145_v54 = vadd.f32 %v1052_v48, %v25_v11  ;;  %v1053_v55 = vrot.slane %v86_v49, 10  ;;  %v52_v57 = vrot.slane %v28_v45, 6  ;;  %v218_v58 = vmul.f32 %v1065_v52, %v14_v24 }
   0xf   :  { %v87_v59 = vmul.f32 0.5, %v1163_v53  ;;  %v1066_v60 = vrot.slane %v1163_v53, 10  ;;  %v160_v61 = vmin.f32 %v16_v50, 4.1351666  ;;  %v228_v63 = vadd.f32 %v216_v41, %v144_v47 }
  0x10   :  { %v1075_v62 = vpop.eup %1074  ;;  %v146_v0 = vadd.f32 %v1053_v55, %v26_v20  ;;  %1082 = vpow2.f32 %v247_v56  ;;  %v1167_v1 = vsub.f32 %v28_v45, %v52_v57  ;;  %v229_v5 = vadd.f32 %v217_v51, %v145_v54 }
  0x11   :  { %v263_v4 = vmul.f32 %v1075_v62, %v71_v13  ;;  %v1054_v6 = vrot.slane %v87_v59, 10  ;;  %v249_v7 = vmul.f32 1.442695, %v160_v61  ;;  %v219_v9 = vmul.f32 %v1066_v60, %v15_v32 }
  0x12   :  { %v1077_v3 = vpop.eup %1076  ;;  %v88_v10 = vmul.f32 0.5, %v1167_v1  ;;  %v1067_v11 = vrot.slane %v1167_v1, 10  ;;  %v1179_v20 = vadd.f32 %v218_v58, %v146_v0  ;;  %v53_v13 = vrot.slane %v1172_v2, 6 }
  0x13   :  { %v264_v8 = vmul.f32 %v1077_v3, %v72_v18  ;;  %v1079_v14 = vpop.eup %1078  ;;  %v275_v19 = vmul.f32 0.5, %v263_v4  ;;  %v147_v21 = vadd.f32 %v1054_v6, %v27_v33  ;;  %1084 = vpow2.f32 %v249_v7  ;;  %v1185_v18 = vld [vmem:[%s1499_s1 + $0x38] sm:$0xff] }
  0x14   :  { %v265_v23 = vmul.f32 %v1079_v14, %v73_v30  ;;  %v1055_v24 = vrot.slane %v88_v10, 10  ;;  %v220_v26 = vmul.f32 %v1067_v11, %v16_v50  ;;  %v1188_v27 = vsub.f32 %v1172_v2, %v53_v13 }
  0x15   :  { %v276_v22 = vmul.f32 0.5, %v264_v8  ;;  %v299_v25 = vrot.slane %v275_v19, 6  ;;  %v161_v28 = vmin.f32 %v17_v12, 4.1351666  ;;  %v1190_v32 = vadd.f32 %v219_v9, %v147_v21 }
  0x16   :  { %v277_v31 = vmul.f32 0.5, %v265_v23  ;;  %v148_v33 = vadd.f32 %v1055_v24, %v28_v45  ;;  %v1193_v36 = vmul.f32 0.5, %v1188_v27  ;;  %v1068_v37 = vrot.slane %v1188_v27, 10 }
  0x17   :  { %v301_v29 = vrot.slane %v276_v22, 6  ;;  %v1081_v30 = vpop.eup %1080  ;;  %v300_v35 = vrot.slane %v299_v25, 4  ;;  %v54_v38 = vrot.slane %v1185_v18, 6  ;;  %v1198_v43 = vmul.f32 1.442695, %v161_v28 }
  0x18   :  { %v303_v41 = vrot.slane %v277_v31, 6  ;;  %v266_v42 = vmul.f32 %v1081_v30, %v1151_v40  ;;  %v1202_v47 = vadd.f32 %v220_v26, %v148_v33  ;;  %v1056_v48 = vrot.slane %v1193_v36, 10 }
  0x19   :  { %v302_v39 = vrot.slane %v301_v29, 4  ;;  %v335_v44 = vsub.f32 %v1156_v46, %v300_v35  ;;  %v347_v45 = vadd.f32 %v300_v35, %v1156_v46  ;;  %v1206_v40 = vmul.f32 %v1068_v37, %v17_v12 }
  0x1a   :  { %v1083_v49 = vpop.eup %1082  ;;  %v304_v52 = vrot.slane %v303_v41, 4  ;;  %v278_v54 = vmul.f32 0.5, %v266_v42  ;;  %1086 = vpow2.f32 %v1198_v43 }
  0x1b   :  { %v336_v50 = vsub.f32 %v228_v63, %v302_v39  ;;  %v348_v51 = vadd.f32 %v302_v39, %v228_v63  ;;  %v359_v55 = vmax.f32 %v335_v44, 0.0  ;;  %v383_v56 = vmax.f32 %v347_v45, 0.0 }
  0x1c   :  { %v267_v57 = vmul.f32 %v1083_v49, %v1163_v53  ;;  %v337_v60 = vsub.f32 %v229_v5, %v304_v52  ;;  %v349_v61 = vadd.f32 %v304_v52, %v229_v5  ;;  %v305_v0 = vrot.slane %v278_v54, 6 }
  0x1d   :  { %v360_v58 = vmax.f32 %v336_v50, 0.0  ;;  %v384_v59 = vmax.f32 %v348_v51, 0.0  ;;  %v371_v46 = vmin.f32 %v359_v55, 32.0  ;;  %v395_v62 = vmin.f32 %v383_v56, 32.0  ;;  %v1085_v4 = vpop.eup %1084 }
  0x1e   :  { %v279_v3 = vmul.f32 0.5, %v267_v57  ;;  %v361_v63 = vmax.f32 %v337_v60, 0.0  ;;  %v385_v8 = vmax.f32 %v349_v61, 0.0  ;;  %v306_v52 = vrot.slane %v305_v0, 4 }
  0x1f   :  { %v372_v6 = vmin.f32 %v360_v58, 32.0  ;;  %v396_v7 = vmin.f32 %v384_v59, 32.0  ;;  %v422_v9 = vrot.slane %v371_v46, %v1131_v15  ;;  %v426_v10 = vrot.slane %v371_v46, %v1133_v16 }
  0x20   :  { %v542_v53 = vrot.slane %v371_v46, %v1135_v17  ;;  %v546_v11 = vrot.slane %v371_v46, %v1149_v34  ;;  %v674_v12 = vrot.slane %v395_v62, %v1131_v15  ;;  %v678_v5 = vrot.slane %v395_v62, %v1133_v16 }
  0x21   :  { %v794_v14 = vrot.slane %v395_v62, %v1135_v17  ;;  %v798_v19 = vrot.slane %v395_v62, %v1149_v34  ;;  %v430_v22 = vrot.slane %v372_v6, %v1131_v15  ;;  %v434_v23 = vrot.slane %v372_v6, %v1133_v16 }
  0x22   :  { %v912_v21 = vsel %vm911_vm0, %v422_v9, %v542_v53  ;;  %v913_v13 = vsel %vm911_vm0, %v426_v10, %v546_v11  ;;  %v550_v26 = vrot.slane %v372_v6, %v1135_v17  ;;  %v554_v28 = vrot.slane %v372_v6, %v1149_v34 }
  0x23   :  { %v937_v24 = vsel %vm936_vm1, %v912_v21, %v674_v12  ;;  %v938_v25 = vsel %vm936_vm1, %v913_v13, %v678_v5  ;;  %v682_v33 = vrot.slane %v396_v7, %v1131_v15  ;;  %v686_v30 = vrot.slane %v396_v7, %v1133_v16 }
  0x24   :  { %v962_v29 = vsel %vm961_vm2, %v937_v24, %v794_v14  ;;  %v963_v31 = vsel %vm961_vm2, %v938_v25, %v798_v19  ;;  %v802_v37 = vrot.slane %v396_v7, %v1135_v17  ;;  %v806_v39 = vrot.slane %v396_v7, %v1149_v34 }
  0x25   :  { %v1010_v35 = vcombine.low %v962_v29, %v963_v31  ;;  %v914_v41 = vsel %vm911_vm0, %v430_v22, %v550_v26  ;;  %v915_v42 = vsel %vm911_vm0, %v434_v23, %v554_v28  ;;  %v373_v45 = vmin.f32 %v361_v63, 32.0 }
  0x26   :  { %v939_v44 = vsel %vm936_vm1, %v914_v41, %v682_v33  ;;  %v397_v49 = vmin.f32 %v385_v8, 32.0  ;;  %v940_v50 = vsel %vm936_vm1, %v915_v42, %v686_v30  ;;  %v307_v54 = vrot.slane %v279_v3, 6 }
  0x27   :  { %1034 = vst [vmem:[%s1500_s2] sm:$0xff] %v1010_v35  ;;  %v964_v51 = vsel %vm961_vm2, %v939_v44, %v802_v37  ;;  %v965_v55 = vsel %vm961_vm2, %v940_v50, %v806_v39  ;;  %v438_v56 = vrot.slane %v373_v45, %v1131_v15  ;;  %v442_v57 = vrot.slane %v373_v45, %v1133_v16  ;;  %v18_v50 = vld [vmem:[%s1498_s0 + $0x38] sm:$0xff] }
  0x28   :  { %v558_v58 = vrot.slane %v373_v45, %v1135_v17  ;;  %v1011_v59 = vcombine.low %v964_v51, %v965_v55  ;;  %v562_v60 = vrot.slane %v373_v45, %v1149_v34  ;;  %v690_v61 = vrot.slane %v397_v49, %v1131_v15 }
  0x29   :  { %v694_v46 = vrot.slane %v397_v49, %v1133_v16  ;;  %v810_v62 = vrot.slane %v397_v49, %v1135_v17  ;;  %v814_v0 = vrot.slane %v397_v49, %v1149_v34  ;;  %v338_v6 = vsub.f32 %v1179_v20, %v306_v52 }
  0x2a   :  { %v916_v3 = vsel %vm911_vm0, %v438_v56, %v558_v58  ;;  %1035 = vst [vmem:[%s1500_s2 + $0x8] sm:$0xff] %v1011_v59  ;;  %v917_v7 = vsel %vm911_vm0, %v442_v57, %v562_v60  ;;  %v350_v8 = vadd.f32 %v306_v52, %v1179_v20  ;;  %v308_v9 = vrot.slane %v307_v54, 4 }
  0x2b   :  { %v941_v63 = vsel %vm936_vm1, %v916_v3, %v690_v61  ;;  %v942_v10 = vsel %vm936_vm1, %v917_v7, %v694_v46  ;;  %v362_v11 = vmax.f32 %v338_v6, 0.0  ;;  %v268_v12 = vmul.f32 %v1085_v4, %v1167_v1  ;;  %v1311_v7 = vld [vmem:[%s1499_s1 + $0x40] sm:$0xff] }
  0x2c   :  { %v966_v53 = vsel %vm961_vm2, %v941_v63, %v810_v62  ;;  %v967_v5 = vsel %vm961_vm2, %v942_v10, %v814_v0  ;;  %v386_v14 = vmax.f32 %v350_v8, 0.0  ;;  %v339_v19 = vsub.f32 %v1190_v32, %v308_v9  ;;  %v1087_v63 = vpop.eup %1086 }
  0x2d   :  { %v351_v21 = vadd.f32 %v308_v9, %v1190_v32  ;;  %v1012_v13 = vcombine.low %v966_v53, %v967_v5  ;;  %v374_v22 = vmin.f32 %v362_v11, 32.0  ;;  %v280_v23 = vmul.f32 0.5, %v268_v12 }
  0x2e   :  { %v149_v20 = vadd.f32 %v1056_v48, %v1172_v2  ;;  %v398_v24 = vmin.f32 %v386_v14, 32.0  ;;  %v363_v25 = vmax.f32 %v339_v19, 0.0  ;;  %v1283_v41 = vsub.f32 %v1185_v18, %v54_v38  ;;  %v1323_v19 = vld [vmem:[%s1499_s1 + $0x48] sm:$0xff] }
  0x2f   :  { %v387_v26 = vmax.f32 %v351_v21, 0.0  ;;  %1036 = vst [vmem:[%s1500_s2 + $0x10] sm:$0xff] %v1012_v13  ;;  %v446_v1 = vrot.slane %v374_v22, %v1131_v15  ;;  %v450_v32 = vrot.slane %v374_v22, %v1133_v16  ;;  %v566_v4 = vrot.slane %v374_v22, %v1135_v17 }
  0x30   :  { %v570_v28 = vrot.slane %v374_v22, %v1149_v34  ;;  %v698_v36 = vrot.slane %v398_v24, %v1131_v15  ;;  %v702_v2 = vrot.slane %v398_v24, %v1133_v16  ;;  %v818_v48 = vrot.slane %v398_v24, %v1135_v17 }
  0x31   :  { %v822_v43 = vrot.slane %v398_v24, %v1149_v34  ;;  %v918_v29 = vsel %vm911_vm0, %v446_v1, %v566_v4  ;;  %v375_v33 = vmin.f32 %v363_v25, 32.0  ;;  %v399_v30 = vmin.f32 %v387_v26, 32.0 }
  0x32   :  { %v919_v31 = vsel %vm911_vm0, %v450_v32, %v570_v28  ;;  %v943_v35 = vsel %vm936_vm1, %v918_v29, %v698_v36  ;;  %v309_v39 = vrot.slane %v280_v23, 6  ;;  %v90_v61 = vmul.f32 0.5, %v1283_v41 }
  0x33   :  { %v944_v37 = vsel %vm936_vm1, %v919_v31, %v702_v2  ;;  %v968_v42 = vsel %vm961_vm2, %v943_v35, %v818_v48  ;;  %v454_v45 = vrot.slane %v375_v33, %v1131_v15  ;;  %v458_v49 = vrot.slane %v375_v33, %v1133_v16 }
  0x34   :  { %v969_v44 = vsel %vm961_vm2, %v944_v37, %v822_v43  ;;  %v574_v52 = vrot.slane %v375_v33, %v1135_v17  ;;  %v578_v54 = vrot.slane %v375_v33, %v1149_v34  ;;  %v706_v38 = vrot.slane %v399_v30, %v1131_v15 }
  0x35   :  { %v1013_v51 = vcombine.low %v968_v42, %v969_v44  ;;  %v710_v55 = vrot.slane %v399_v30, %v1133_v16  ;;  %v826_v56 = vrot.slane %v399_v30, %v1135_v17  ;;  %v830_v57 = vrot.slane %v399_v30, %v1149_v34  ;;  %v20_v44 = vld [vmem:[%s1498_s0 + $0x48] sm:$0xff] }
  0x36   :  { %v310_v58 = vrot.slane %v309_v39, 4  ;;  %v920_v59 = vsel %vm911_vm0, %v454_v45, %v574_v52  ;;  %v921_v60 = vsel %vm911_vm0, %v458_v49, %v578_v54  ;;  %v162_v46 = vmin.f32 %v18_v50, 4.1351666  ;;  %v21_v52 = vld [vmem:[%s1498_s0 + $0x50] sm:$0xff] }
  0x37   :  { %1037 = vst [vmem:[%s1500_s2 + $0x18] sm:$0xff] %v1013_v51  ;;  %v945_v62 = vsel %vm936_vm1, %v920_v59, %v706_v38  ;;  %v946_v0 = vsel %vm936_vm1, %v921_v60, %v710_v55  ;;  %v1057_v10 = vrot.slane %v90_v61, 10  ;;  %v1069_v53 = vrot.slane %v1283_v41, 10  ;;  %v33_v54 = vld [vmem:[%s1499_s1 + $0x50] sm:$0xff] }
  0x38   :  { %v340_v3 = vsub.f32 %v1202_v47, %v310_v58  ;;  %v352_v6 = vadd.f32 %v310_v58, %v1202_v47  ;;  %v970_v8 = vsel %vm961_vm2, %v945_v62, %v826_v56  ;;  %v971_v9 = vsel %vm961_vm2, %v946_v0, %v830_v57  ;;  %v19_v47 = vld [vmem:[%s1498_s0 + $0x40] sm:$0xff] }
  0x39   :  { %v1014_v11 = vcombine.low %v970_v8, %v971_v9  ;;  %v269_v14 = vmul.f32 %v1087_v63, %v1188_v27  ;;  %v233_v21 = vadd.f32 %v1206_v40, %v149_v20  ;;  %v150_v13 = vadd.f32 %v1057_v10, %v1185_v18 }
  0x3a   :  { %v364_v12 = vmax.f32 %v340_v3, 0.0  ;;  %v388_v5 = vmax.f32 %v352_v6, 0.0  ;;  %v253_v22 = vmul.f32 1.442695, %v162_v46  ;;  %v55_v23 = vrot.slane %v1311_v7, 6 }
  0x3b   :  { %1038 = vst [vmem:[%s1500_s2 + $0x20] sm:$0xff] %v1014_v11  ;;  %v281_v25 = vmul.f32 0.5, %v269_v14  ;;  %v222_v26 = vmul.f32 %v1069_v53, %v18_v50  ;;  %v163_v32 = vmin.f32 %v19_v47, 4.1351666  ;;  %v56_v40 = vrot.slane %v1323_v19, 6 }
  0x3c   :  { %v376_v27 = vmin.f32 %v364_v12, 32.0  ;;  %v400_v24 = vmin.f32 %v388_v5, 32.0  ;;  %1088 = vpow2.f32 %v253_v22  ;;  %v1332_v1 = vsub.f32 %v1311_v7, %v55_v23 }
  0x3d   :  { %v311_v33 = vrot.slane %v281_v25, 6  ;;  %v255_v42 = vmul.f32 1.442695, %v163_v32  ;;  %v1360_v55 = vadd.f32 %v222_v26, %v150_v13  ;;  %v1363_v56 = vsub.f32 %v1323_v19, %v56_v40 }
  0x3e   :  { %v462_v18 = vrot.slane %v376_v27, %v1131_v15  ;;  %v466_v20 = vrot.slane %v376_v27, %v1133_v16  ;;  %v582_v4 = vrot.slane %v376_v27, %v1135_v17  ;;  %v586_v28 = vrot.slane %v376_v27, %v1149_v34 }
  0x3f   :  { %v714_v36 = vrot.slane %v400_v24, %v1131_v15  ;;  %v718_v2 = vrot.slane %v400_v24, %v1133_v16  ;;  %v834_v48 = vrot.slane %v400_v24, %v1135_v17  ;;  %v838_v43 = vrot.slane %v400_v24, %v1149_v34 }
  0x40   :  { %v922_v29 = vsel %vm911_vm0, %v462_v18, %v582_v4  ;;  %v923_v31 = vsel %vm911_vm0, %v466_v20, %v586_v28  ;;  %v91_v30 = vmul.f32 0.5, %v1332_v1  ;;  %v1070_v39 = vrot.slane %v1332_v1, 10  ;;  %v22_v4 = vld [vmem:[%s1498_s0 + $0x58] sm:$0xff] }
  0x41   :  { %v947_v35 = vsel %vm936_vm1, %v922_v29, %v714_v36  ;;  %v948_v37 = vsel %vm936_vm1, %v923_v31, %v718_v2  ;;  %v312_v50 = vrot.slane %v311_v33, 4  ;;  %1090 = vpow2.f32 %v255_v42  ;;  %v34_v28 = vld [vmem:[%s1499_s1 + $0x58] sm:$0xff] }
  0x42   :  { %v972_v45 = vsel %vm961_vm2, %v947_v35, %v834_v48  ;;  %v973_v49 = vsel %vm961_vm2, %v948_v37, %v838_v43  ;;  %v1058_v51 = vrot.slane %v91_v30, 10  ;;  %v223_v59 = vmul.f32 %v1070_v39, %v19_v47 }
  0x43   :  { %v1015_v38 = vcombine.low %v972_v45, %v973_v49  ;;  %v341_v57 = vsub.f32 %v233_v21, %v312_v50  ;;  %v353_v58 = vadd.f32 %v312_v50, %v233_v21  ;;  %v164_v60 = vmin.f32 %v20_v44, 4.1351666 }
  0x44   :  { %v92_v61 = vmul.f32 0.5, %v1363_v56  ;;  %v1071_v46 = vrot.slane %v1363_v56, 10  ;;  %v57_v62 = vrot.slane %v33_v54, 6  ;;  %v165_v0 = vmin.f32 %v21_v52, 4.1351666 }
  0x45   :  { %1039 = vst [vmem:[%s1500_s2 + $0x28] sm:$0xff] %v1015_v38  ;;  %v365_v3 = vmax.f32 %v341_v57, 0.0  ;;  %v389_v6 = vmax.f32 %v353_v58, 0.0  ;;  %v151_v63 = vadd.f32 %v1058_v51, %v1311_v7  ;;  %v257_v8 = vmul.f32 1.442695, %v164_v60 }
  0x46   :  { %v1089_v9 = vpop.eup %1088  ;;  %v1059_v10 = vrot.slane %v92_v61, 10  ;;  %v224_v53 = vmul.f32 %v1071_v46, %v20_v44  ;;  %v81_v11 = vsub.f32 %v33_v54, %v57_v62  ;;  %v259_v12 = vmul.f32 1.442695, %v165_v0 }
  0x47   :  { %v377_v5 = vmin.f32 %v365_v3, 32.0  ;;  %v401_v14 = vmin.f32 %v389_v6, 32.0  ;;  %v270_v47 = vmul.f32 %v1089_v9, %v1283_v41  ;;  %1092 = vpow2.f32 %v257_v8 }
  0x48   :  { %v152_v21 = vadd.f32 %v1059_v10, %v1323_v19  ;;  %v93_v13 = vmul.f32 0.5, %v81_v11  ;;  %v1072_v22 = vrot.slane %v81_v11, 10  ;;  %1094 = vpow2.f32 %v259_v12 }
  0x49   :  { %v470_v23 = vrot.slane %v377_v5, %v1131_v15  ;;  %v474_v7 = vrot.slane %v377_v5, %v1133_v16  ;;  %v590_v27 = vrot.slane %v377_v5, %v1135_v17  ;;  %v594_v24 = vrot.slane %v377_v5, %v1149_v34 }
  0x4a   :  { %v722_v25 = vrot.slane %v401_v14, %v1131_v15  ;;  %v726_v26 = vrot.slane %v401_v14, %v1133_v16  ;;  %v842_v41 = vrot.slane %v401_v14, %v1135_v17  ;;  %v846_v32 = vrot.slane %v401_v14, %v1149_v34 }
  0x4b   :  { %v924_v19 = vsel %vm911_vm0, %v470_v23, %v590_v27  ;;  %v925_v40 = vsel %vm911_vm0, %v474_v7, %v594_v24  ;;  %v282_v18 = vmul.f32 0.5, %v270_v47  ;;  %v1383_v20 = vadd.f32 %v224_v53, %v152_v21  ;;  %v1091_v36 = vpop.eup %1090 }
  0x4c   :  { %v949_v2 = vsel %vm936_vm1, %v924_v19, %v722_v25  ;;  %v950_v48 = vsel %vm936_vm1, %v925_v40, %v726_v26  ;;  %v1060_v43 = vrot.slane %v93_v13, 10  ;;  %v225_v29 = vmul.f32 %v1072_v22, %v21_v52 }
  0x4d   :  { %v974_v31 = vsel %vm961_vm2, %v949_v2, %v842_v41  ;;  %v975_v33 = vsel %vm961_vm2, %v950_v48, %v846_v32  ;;  %v313_v30 = vrot.slane %v282_v18, 6  ;;  %v271_v35 = vmul.f32 %v1091_v36, %v1332_v1 }
  0x4e   :  { %v1016_v37 = vcombine.low %v974_v31, %v975_v33  ;;  %v153_v39 = vadd.f32 %v1060_v43, %v33_v54  ;;  %v58_v42 = vrot.slane %v34_v28, 6  ;;  %v166_v44 = vmin.f32 %v22_v4, 4.1351666 }
  0x4f   :  { %v314_v45 = vrot.slane %v313_v30, 4  ;;  %v283_v49 = vmul.f32 0.5, %v271_v35  ;;  %v235_v1 = vadd.f32 %v223_v59, %v151_v63 }
  0x50   :  { %1040 = vst [vmem:[%s1500_s2 + $0x30] sm:$0xff] %v1016_v37  ;;  %v1399_v50 = vadd.f32 %v225_v29, %v153_v39  ;;  %v1401_v51 = vsub.f32 %v34_v28, %v58_v42  ;;  %v261_v62 = vmul.f32 1.442695, %v166_v44 }
  0x51   :  { %v1093_v52 = vpop.eup %1092  ;;  %v342_v38 = vsub.f32 %v1360_v55, %v314_v45  ;;  %v354_v57 = vadd.f32 %v314_v45, %v1360_v55  ;;  %v315_v58 = vrot.slane %v283_v49, 6 }
  0x52   :  { %v1095_v54 = vpop.eup %1094  ;;  %v272_v60 = vmul.f32 %v1093_v52, %v1363_v56  ;;  %v94_v61 = vmul.f32 0.5, %v1401_v51  ;;  %v1073_v46 = vrot.slane %v1401_v51, 10  ;;  %1096 = vpow2.f32 %v261_v62 }
  0x53   :  { %v366_v0 = vmax.f32 %v342_v38, 0.0  ;;  %v390_v3 = vmax.f32 %v354_v57, 0.0  ;;  %v316_v6 = vrot.slane %v315_v58, 4  ;;  %v273_v8 = vmul.f32 %v1095_v54, %v81_v11 }
  0x54   :  { %v284_v9 = vmul.f32 0.5, %v272_v60  ;;  %v1061_v10 = vrot.slane %v94_v61, 10  ;;  %v226_v53 = vmul.f32 %v1073_v46, %v22_v4 }
  0x55   :  { %v378_v12 = vmin.f32 %v366_v0, 32.0  ;;  %v402_v5 = vmin.f32 %v390_v3, 32.0  ;;  %v343_v55 = vsub.f32 %v235_v1, %v316_v6  ;;  %v355_v59 = vadd.f32 %v316_v6, %v235_v1 }
  0x56   :  { %v317_v63 = vrot.slane %v284_v9, 6  ;;  %v285_v14 = vmul.f32 0.5, %v273_v8  ;;  %v154_v47 = vadd.f32 %v1061_v10, %v34_v28 }
  0x57   :  { %v478_v56 = vrot.slane %v378_v12, %v1131_v15  ;;  %v482_v21 = vrot.slane %v378_v12, %v1133_v16  ;;  %v598_v13 = vrot.slane %v378_v12, %v1135_v17  ;;  %v602_v22 = vrot.slane %v378_v12, %v1149_v34 }
  0x58   :  { %v730_v11 = vrot.slane %v402_v5, %v1131_v15  ;;  %v734_v23 = vrot.slane %v402_v5, %v1133_v16  ;;  %v850_v7 = vrot.slane %v402_v5, %v1135_v17  ;;  %v854_v27 = vrot.slane %v402_v5, %v1149_v34 }
  0x59   :  { %v926_v24 = vsel %vm911_vm0, %v478_v56, %v598_v13  ;;  %v927_v25 = vsel %vm911_vm0, %v482_v21, %v602_v22  ;;  %v367_v26 = vmax.f32 %v343_v55, 0.0  ;;  %v391_v41 = vmax.f32 %v355_v59, 0.0 }
  0x5a   :  { %v951_v32 = vsel %vm936_vm1, %v926_v24, %v730_v11  ;;  %v952_v19 = vsel %vm936_vm1, %v927_v25, %v734_v23  ;;  %v318_v40 = vrot.slane %v317_v63, 4  ;;  %v319_v18 = vrot.slane %v285_v14, 6 }
  0x5b   :  { %v976_v4 = vsel %vm961_vm2, %v951_v32, %v850_v7  ;;  %v977_v28 = vsel %vm961_vm2, %v952_v19, %v854_v27  ;;  %v379_v36 = vmin.f32 %v367_v26, 32.0  ;;  %v403_v2 = vmin.f32 %v391_v41, 32.0 }
  0x5c   :  { %v1017_v48 = vcombine.low %v976_v4, %v977_v28  ;;  %v344_v43 = vsub.f32 %v1383_v20, %v318_v40  ;;  %v356_v29 = vadd.f32 %v318_v40, %v1383_v20  ;;  %v320_v31 = vrot.slane %v319_v18, 4  ;;  %v1097_v57 = vpop.eup %1096 }
  0x5d   :  { %v486_v33 = vrot.slane %v379_v36, %v1131_v15  ;;  %v490_v30 = vrot.slane %v379_v36, %v1133_v16  ;;  %v606_v35 = vrot.slane %v379_v36, %v1135_v17  ;;  %v610_v37 = vrot.slane %v379_v36, %v1149_v34 }
  0x5e   :  { %1041 = vst [vmem:[%s1500_s2 + $0x38] sm:$0xff] %v1017_v48  ;;  %v738_v39 = vrot.slane %v403_v2, %v1131_v15  ;;  %v742_v42 = vrot.slane %v403_v2, %v1133_v16  ;;  %v858_v44 = vrot.slane %v403_v2, %v1135_v17  ;;  %v862_v20 = vrot.slane %v403_v2, %v1149_v34 }
  0x5f   :  { %v928_v45 = vsel %vm911_vm0, %v486_v33, %v606_v35  ;;  %v929_v49 = vsel %vm911_vm0, %v490_v30, %v610_v37  ;;  %v368_v52 = vmax.f32 %v344_v43, 0.0  ;;  %v392_v38 = vmax.f32 %v356_v29, 0.0 }
  0x60   :  { %v953_v1 = vsel %vm936_vm1, %v928_v45, %v738_v39  ;;  %v954_v58 = vsel %vm936_vm1, %v929_v49, %v742_v42  ;;  %v345_v54 = vsub.f32 %v1399_v50, %v320_v31  ;;  %v357_v60 = vadd.f32 %v320_v31, %v1399_v50 }
  0x61   :  { %v978_v61 = vsel %vm961_vm2, %v953_v1, %v858_v44  ;;  %v979_v46 = vsel %vm961_vm2, %v954_v58, %v862_v20  ;;  %v380_v62 = vmin.f32 %v368_v52, 32.0  ;;  %v404_v0 = vmin.f32 %v392_v38, 32.0 }
  0x62   :  { %v1018_v3 = vcombine.low %v978_v61, %v979_v46  ;;  %v369_v6 = vmax.f32 %v345_v54, 0.0  ;;  %v393_v8 = vmax.f32 %v357_v60, 0.0  ;;  %v238_v9 = vadd.f32 %v226_v53, %v154_v47 }
  0x63   :  { %v494_v10 = vrot.slane %v380_v62, %v1131_v15  ;;  %v498_v12 = vrot.slane %v380_v62, %v1133_v16  ;;  %v614_v5 = vrot.slane %v380_v62, %v1135_v17  ;;  %v618_v55 = vrot.slane %v380_v62, %v1149_v34 }
  0x64   :  { %1042 = vst [vmem:[%s1500_s2 + $0x40] sm:$0xff] %v1018_v3  ;;  %v746_v50 = vrot.slane %v404_v0, %v1131_v15  ;;  %v750_v59 = vrot.slane %v404_v0, %v1133_v16  ;;  %v866_v63 = vrot.slane %v404_v0, %v1135_v17  ;;  %v870_v53 = vrot.slane %v404_v0, %v1149_v34 }
  0x65   :  { %v930_v14 = vsel %vm911_vm0, %v494_v10, %v614_v5  ;;  %v931_v47 = vsel %vm911_vm0, %v498_v12, %v618_v55  ;;  %v381_v56 = vmin.f32 %v369_v6, 32.0  ;;  %v405_v21 = vmin.f32 %v393_v8, 32.0 }
  0x66   :  { %v955_v13 = vsel %vm936_vm1, %v930_v14, %v746_v50  ;;  %v956_v22 = vsel %vm936_vm1, %v931_v47, %v750_v59  ;;  %v274_v11 = vmul.f32 %v1097_v57, %v1401_v51 }
  0x67   :  { %v980_v23 = vsel %vm961_vm2, %v955_v13, %v866_v63  ;;  %v981_v7 = vsel %vm961_vm2, %v956_v22, %v870_v53  ;;  %v502_v27 = vrot.slane %v381_v56, %v1131_v15  ;;  %v506_v24 = vrot.slane %v381_v56, %v1133_v16 }
  0x68   :  { %v1019_v25 = vcombine.low %v980_v23, %v981_v7  ;;  %v622_v26 = vrot.slane %v381_v56, %v1135_v17  ;;  %v626_v41 = vrot.slane %v381_v56, %v1149_v34  ;;  %v754_v32 = vrot.slane %v405_v21, %v1131_v15 }
  0x69   :  { %v758_v19 = vrot.slane %v405_v21, %v1133_v16  ;;  %v874_v40 = vrot.slane %v405_v21, %v1135_v17  ;;  %v878_v51 = vrot.slane %v405_v21, %v1149_v34  ;;  %v286_v18 = vmul.f32 0.5, %v274_v11 }
  0x6a   :  { %1043 = vst [vmem:[%s1500_s2 + $0x48] sm:$0xff] %v1019_v25  ;;  %v932_v4 = vsel %vm911_vm0, %v502_v27, %v622_v26  ;;  %v933_v28 = vsel %vm911_vm0, %v506_v24, %v626_v41 }
  0x6b   :  { %v957_v36 = vsel %vm936_vm1, %v932_v4, %v754_v32  ;;  %v958_v2 = vsel %vm936_vm1, %v933_v28, %v758_v19  ;;  %v321_v48 = vrot.slane %v286_v18, 6 }
  0x6c   :  { %v982_v43 = vsel %vm961_vm2, %v957_v36, %v874_v40  ;;  %v983_v29 = vsel %vm961_vm2, %v958_v2, %v878_v51 }
  0x6d   :  { %v1020_v31 = vcombine.low %v982_v43, %v983_v29  ;;  %v322_v33 = vrot.slane %v321_v48, 4 }
  0x6f   :  { %1044 = vst [vmem:[%s1500_s2 + $0x50] sm:$0xff] %v1020_v31  ;;  %v346_v30 = vsub.f32 %v238_v9, %v322_v33  ;;  %v358_v35 = vadd.f32 %v322_v33, %v238_v9 }
  0x71   :  { %v370_v37 = vmax.f32 %v346_v30, 0.0  ;;  %v394_v39 = vmax.f32 %v358_v35, 0.0 }
  0x73   :  { %v382_v42 = vmin.f32 %v370_v37, 32.0  ;;  %v406_v44 = vmin.f32 %v394_v39, 32.0 }
  0x75   :  { %v510_v20 = vrot.slane %v382_v42, %v1131_v15  ;;  %v514_v45 = vrot.slane %v382_v42, %v1133_v16  ;;  %v630_v49 = vrot.slane %v382_v42, %v1135_v17  ;;  %v634_v52 = vrot.slane %v382_v42, %v1149_v34 }
  0x76   :  { %v762_v38 = vrot.slane %v406_v44, %v1131_v15  ;;  %v766_v57 = vrot.slane %v406_v44, %v1133_v16  ;;  %v882_v1 = vrot.slane %v406_v44, %v1135_v17  ;;  %v886_v58 = vrot.slane %v406_v44, %v1149_v34 }
  0x77   :  { %v934_v54 = vsel %vm911_vm0, %v510_v20, %v630_v49  ;;  %v935_v60 = vsel %vm911_vm0, %v514_v45, %v634_v52 }
  0x78   :  { %v959_v61 = vsel %vm936_vm1, %v934_v54, %v762_v38  ;;  %v960_v46 = vsel %vm936_vm1, %v935_v60, %v766_v57 }
  0x79   :  { %v984_v62 = vsel %vm961_vm2, %v959_v61, %v882_v1  ;;  %v985_v0 = vsel %vm961_vm2, %v960_v46, %v886_v58 }
  0x7a   :  { %v1021_v3 = vcombine.low %v984_v62, %v985_v0 }
  0x7c   :  { %1045 = vst [vmem:[%s1500_s2 + $0x58] sm:$0xff] %v1021_v3 }

// kernel: _lambda_.18
= control target key start
LH: loop header
LB: loop body
LE: loop exit
PB: predicated region body
PF: predicated region fallthrough
CT: control target
= control target key end

     0   :  { %s339_s1 = inlined_call_operand.vmem [shape: bf16[128,128], index: 1, kind: input, shape index: {}]   ;;  %s340_s0 = inlined_call_operand.vmem [shape: bf16[32,128], index: 0, kind: input, shape index: {}]   ;;  %s341_s2 = inlined_call_operand.vmem [shape: f32[1,128], index: 2, kind: input, shape index: {}]   ;;  %s342_s3 = inlined_call_operand.vmem [shape: bf16[32,128], index: 3, kind: output, shape index: {}]  }
   0x1   :  { %v270_v0 = vld [vmem:[%s339_s1] sm:$0xff]   ;;  %v271_v1 = vld [vmem:[%s339_s1 + $0x8] sm:$0xff]   ;;  %v272_v2 = vld [vmem:[%s339_s1 + $0x10] sm:$0xff]  }
   0x2   :  { %250 = vmatprep.subr.bf16.mxu0 %v270_v0  ;;  %v273_v3 = vld [vmem:[%s339_s1 + $0x18] sm:$0xff]   ;;  %v278_v4 = vld [vmem:[%s340_s0] sm:$0xff]   ;;  %v275_v6 = vld [vmem:[%s339_s1 + $0x28] sm:$0xff]  }
   0x3   :  { %251 = vmatpush3.bf16.msra.mxu0 %v270_v0  ;;  %266 = vmatprep.mubr.bf16.mxu0 %v278_v4  ;;  %v274_v5 = vld [vmem:[%s339_s1 + $0x20] sm:$0xff]   ;;  %v276_v7 = vld [vmem:[%s339_s1 + $0x30] sm:$0xff]   ;;  %v277_v8 = vld [vmem:[%s339_s1 + $0x38] sm:$0xff]  }
   0x4   :  { %252 = vmatprep.subr.bf16.mxu0 %v271_v1  ;;  %v279_v9 = vld [vmem:[%s340_s0 + $0x8] sm:$0xff]   ;;  %v220_v10 = vld [vmem:[%s341_s2] ss:$0 sm:$0xff] }
   0x7   :  { %253 = vmatpush3.bf16.msra.mxu0 %v271_v1 }
   0x8   :  { %254 = vmatprep.subr.bf16.mxu0 %v272_v2 }
   0xb   :  { %255 = vmatpush3.bf16.msra.mxu0 %v272_v2 }
   0xc   :  { %256 = vmatprep.subr.bf16.mxu0 %v273_v3 }
   0xf   :  { %257 = vmatpush3.bf16.msra.mxu0 %v273_v3 }
  0x10   :  { %258 = vmatprep.subr.bf16.mxu0 %v274_v5 }
  0x13   :  { %259 = vmatpush3.bf16.msra.mxu0 %v274_v5 }
  0x14   :  { %260 = vmatprep.subr.bf16.mxu0 %v275_v6 }
  0x17   :  { %261 = vmatpush3.bf16.msra.mxu0 %v275_v6 }
  0x18   :  { %262 = vmatprep.subr.bf16.mxu0 %v276_v7 }
  0x1b   :  { %263 = vmatpush3.bf16.msra.mxu0 %v276_v7 }
  0x1c   :  { %264 = vmatprep.subr.bf16.mxu0 %v277_v8 }
  0x1f   :  { %265 = vmatpush3.bf16.msra.mxu0 %v277_v8 }
  0x22   :  { %267 = vmatmul.mubr.bf16.vlgmr.msra.gmra.mrb[0].mxu0 %v279_v9 }
  0xf5   :  { %v268_v11 = vpop.f32.mrb[0].mxu0 }
  0xf6   :  { %v180_v12 = vadd.f32 %v268_v11, %v220_v10  ;;  %v141_v13 = vpop.f32.mrb[1].mxu0 }
  0xf7   :  { %v178_v14 = vadd.f32 %v220_v10, %v141_v13  ;;  %v269_v15 = vpop.f32.mrb[2].mxu0 }
  0xf8   :  { %v181_v16 = vadd.f32 %v269_v15, %v220_v10  ;;  %v144_v17 = vpop.f32.mrb[3].mxu0  ;;  %v184_v19 = vmax.f32 %v180_v12, 0.0 }
  0xf9   :  { %v179_v18 = vadd.f32 %v220_v10, %v144_v17  ;;  %v182_v21 = vmax.f32 %v178_v14, 0.0 }
  0xfa   :  { %v185_v20 = vmax.f32 %v181_v16, 0.0 }
  0xfb   :  { %v183_v22 = vmax.f32 %v179_v18, 0.0 }
  0xfc   :  { %v237_v23 = vpack.c.bf16 %v185_v20, %v184_v19 }
  0xfd   :  { %v232_v24 = vpack.c.bf16 %v183_v22, %v182_v21 }
  0xfe   :  { %239 = vst [vmem:[%s342_s3 + $0x8] sm:$0xff] %v237_v23  }
  0xff   :  { %233 = vst [vmem:[%s342_s3] sm:$0xff] %v232_v24  }

// kernel: _lambda_.20
= control target key start
LH: loop header
LB: loop body
LE: loop exit
PB: predicated region body
PF: predicated region fallthrough
CT: control target
= control target key end

     0   :  { %s306_s1 = inlined_call_operand.vmem [shape: bf16[128,128], index: 1, kind: input, shape index: {}]   ;;  %s307_s0 = inlined_call_operand.vmem [shape: bf16[32,128], index: 0, kind: input, shape index: {}]   ;;  %s308_s2 = inlined_call_operand.vmem [shape: f32[1,128], index: 2, kind: input, shape index: {}]   ;;  %s309_s3 = inlined_call_operand.vmem [shape: f32[32,128], index: 3, kind: output, shape index: {}]  }
   0x1   :  { %v231_v0 = vld [vmem:[%s306_s1] sm:$0xff]   ;;  %v232_v1 = vld [vmem:[%s306_s1 + $0x8] sm:$0xff]   ;;  %v233_v2 = vld [vmem:[%s306_s1 + $0x10] sm:$0xff]  }
   0x2   :  { %211 = vmatprep.subr.bf16.mxu0 %v231_v0  ;;  %v234_v3 = vld [vmem:[%s306_s1 + $0x18] sm:$0xff]   ;;  %v239_v4 = vld [vmem:[%s307_s0] sm:$0xff]   ;;  %v236_v6 = vld [vmem:[%s306_s1 + $0x28] sm:$0xff]  }
   0x3   :  { %212 = vmatpush3.bf16.msra.mxu0 %v231_v0  ;;  %227 = vmatprep.mubr.bf16.mxu0 %v239_v4  ;;  %v235_v5 = vld [vmem:[%s306_s1 + $0x20] sm:$0xff]   ;;  %v237_v7 = vld [vmem:[%s306_s1 + $0x30] sm:$0xff]   ;;  %v238_v8 = vld [vmem:[%s306_s1 + $0x38] sm:$0xff]  }
   0x4   :  { %213 = vmatprep.subr.bf16.mxu0 %v232_v1  ;;  %v240_v9 = vld [vmem:[%s307_s0 + $0x8] sm:$0xff]   ;;  %v200_v10 = vld [vmem:[%s308_s2] ss:$0 sm:$0xff] }
   0x7   :  { %214 = vmatpush3.bf16.msra.mxu0 %v232_v1 }
   0x8   :  { %215 = vmatprep.subr.bf16.mxu0 %v233_v2 }
   0xb   :  { %216 = vmatpush3.bf16.msra.mxu0 %v233_v2 }
   0xc   :  { %217 = vmatprep.subr.bf16.mxu0 %v234_v3 }
   0xf   :  { %218 = vmatpush3.bf16.msra.mxu0 %v234_v3 }
  0x10   :  { %219 = vmatprep.subr.bf16.mxu0 %v235_v5 }
  0x13   :  { %220 = vmatpush3.bf16.msra.mxu0 %v235_v5 }
  0x14   :  { %221 = vmatprep.subr.bf16.mxu0 %v236_v6 }
  0x17   :  { %222 = vmatpush3.bf16.msra.mxu0 %v236_v6 }
  0x18   :  { %223 = vmatprep.subr.bf16.mxu0 %v237_v7 }
  0x1b   :  { %224 = vmatpush3.bf16.msra.mxu0 %v237_v7 }
  0x1c   :  { %225 = vmatprep.subr.bf16.mxu0 %v238_v8 }
  0x1f   :  { %226 = vmatpush3.bf16.msra.mxu0 %v238_v8 }
  0x22   :  { %228 = vmatmul.mubr.bf16.vlgmr.msra.gmra.mrb[0].mxu0 %v240_v9 }
  0xf5   :  { %v229_v11 = vpop.f32.mrb[0].mxu0 }
  0xf6   :  { %v180_v12 = vadd.f32 %v229_v11, %v200_v10  ;;  %v141_v13 = vpop.f32.mrb[1].mxu0 }
  0xf7   :  { %v178_v14 = vadd.f32 %v200_v10, %v141_v13  ;;  %v230_v15 = vpop.f32.mrb[2].mxu0 }
  0xf8   :  { %184 = vst [vmem:[%s309_s3 + $0x10] sm:$0xff] %v180_v12  ;;  %v181_v16 = vadd.f32 %v230_v15, %v200_v10  ;;  %v144_v17 = vpop.f32.mrb[3].mxu0 }
  0xf9   :  { %182 = vst [vmem:[%s309_s3] sm:$0xff] %v178_v14  ;;  %v179_v18 = vadd.f32 %v200_v10, %v144_v17 }
  0xfa   :  { %185 = vst [vmem:[%s309_s3 + $0x18] sm:$0xff] %v181_v16 }
  0xfb   :  { %183 = vst [vmem:[%s309_s3 + $0x8] sm:$0xff] %v179_v18 }

// kernel: _lambda_.17
= control target key start
LH: loop header
LB: loop body
LE: loop exit
PB: predicated region body
PF: predicated region fallthrough
CT: control target
= control target key end

     0   :  { %s2730_s1 = inlined_call_operand.vmem [shape: bf16[2048,128], index: 1, kind: input, shape index: {}]   ;;  %s2731_s0 = inlined_call_operand.vmem [shape: bf16[32,2048], index: 0, kind: input, shape index: {}]   ;;  %s2732_s2 = inlined_call_operand.vmem [shape: f32[1,128], index: 2, kind: input, shape index: {}]   ;;  %s2733_s3 = inlined_call_operand.vmem [shape: bf16[32,128], index: 3, kind: output, shape index: {}]  }
   0x1   :  { %v2093_v0 = vld [vmem:[%s2730_s1 + $0x40] sm:$0xff]   ;;  %v2097_v4 = vld [vmem:[%s2730_s1 + $0x48] sm:$0xff]   ;;  %v2101_v8 = vld [vmem:[%s2730_s1 + $0x50] sm:$0xff]  }
   0x2   :  { %v2094_v1 = vld [vmem:[%s2730_s1 + $0xc0] sm:$0xff]   ;;  %1869 = vmatprep.subr.bf16.mxu0 %v2093_v0  ;;  %v2098_v5 = vld [vmem:[%s2730_s1 + $0xc8] sm:$0xff]   ;;  %v2102_v9 = vld [vmem:[%s2730_s1 + $0xd0] sm:$0xff]  }
   0x3   :  { %v2095_v2 = vld [vmem:[%s2730_s1] sm:$0xff]   ;;  %1897 = vmatprep.subr.bf16.mxu1 %v2094_v1  ;;  %v2099_v6 = vld [vmem:[%s2730_s1 + $0x8] sm:$0xff]   ;;  %v2103_v10 = vld [vmem:[%s2730_s1 + $0x10] sm:$0xff]  }
   0x4   :  { %v2096_v3 = vld [vmem:[%s2730_s1 + $0x80] sm:$0xff]   ;;  %1870 = vmatpush3.bf16.msra.mxu0 %v2095_v2  ;;  %v2100_v7 = vld [vmem:[%s2730_s1 + $0x88] sm:$0xff]   ;;  %v2104_v11 = vld [vmem:[%s2730_s1 + $0x90] sm:$0xff]  }
   0x5   :  { %1898 = vmatpush3.bf16.msra.mxu1 %v2096_v3  ;;  %1871 = vmatprep.subr.bf16.mxu0 %v2097_v4  ;;  %v2105_v12 = vld [vmem:[%s2730_s1 + $0x58] sm:$0xff]   ;;  %v2109_v16 = vld [vmem:[%s2730_s1 + $0x60] sm:$0xff]   ;;  %v2113_v20 = vld [vmem:[%s2730_s1 + $0x68] sm:$0xff]  }
   0x6   :  { %1899 = vmatprep.subr.bf16.mxu1 %v2098_v5  ;;  %v2106_v13 = vld [vmem:[%s2730_s1 + $0xd8] sm:$0xff]   ;;  %v2110_v17 = vld [vmem:[%s2730_s1 + $0xe0] sm:$0xff]   ;;  %v2114_v21 = vld [vmem:[%s2730_s1 + $0xe8] sm:$0xff]  }
   0x7   :  { %v2107_v14 = vld [vmem:[%s2730_s1 + $0x18] sm:$0xff]   ;;  %v2111_v18 = vld [vmem:[%s2730_s1 + $0x20] sm:$0xff]   ;;  %v2115_v22 = vld [vmem:[%s2730_s1 + $0x28] sm:$0xff]  }
   0x8   :  { %1872 = vmatpush3.bf16.msra.mxu0 %v2099_v6  ;;  %v2108_v15 = vld [vmem:[%s2730_s1 + $0x98] sm:$0xff]   ;;  %v2112_v19 = vld [vmem:[%s2730_s1 + $0xa0] sm:$0xff]   ;;  %v2116_v23 = vld [vmem:[%s2730_s1 + $0xa8] sm:$0xff]  }
   0x9   :  { %1900 = vmatpush3.bf16.msra.mxu1 %v2100_v7  ;;  %1873 = vmatprep.subr.bf16.mxu0 %v2101_v8  ;;  %v2117_v24 = vld [vmem:[%s2730_s1 + $0x70] sm:$0xff]   ;;  %v2121_v28 = vld [vmem:[%s2730_s1 + $0x78] sm:$0xff]   ;;  %v27_v32 = vld [vmem:[%s2731_s0] sm:$0xff] }
   0xa   :  { %1901 = vmatprep.subr.bf16.mxu1 %v2102_v9  ;;  %v2118_v25 = vld [vmem:[%s2730_s1 + $0xf0] sm:$0xff]   ;;  %v2122_v29 = vld [vmem:[%s2730_s1 + $0xf8] sm:$0xff]   ;;  %v35_v33 = vld [vmem:[%s2731_s0 + $0x40] sm:$0xff] }
   0xb   :  { %v2119_v26 = vld [vmem:[%s2730_s1 + $0x30] sm:$0xff]   ;;  %v2123_v30 = vld [vmem:[%s2730_s1 + $0x38] sm:$0xff]   ;;  %v28_v34 = vld [vmem:[%s2731_s0 + $0x8] sm:$0xff]  ;;  %v1689_v35 = vcombine.low %v27_v32, %v35_v33  ;;  %v1690_v36 = vcombine.high %v27_v32, %v35_v33 }
   0xc   :  { %1874 = vmatpush3.bf16.msra.mxu0 %v2103_v10  ;;  %v2120_v27 = vld [vmem:[%s2730_s1 + $0xb0] sm:$0xff]   ;;  %v2124_v31 = vld [vmem:[%s2730_s1 + $0xb8] sm:$0xff]   ;;  %v36_v37 = vld [vmem:[%s2731_s0 + $0x48] sm:$0xff] }
   0xd   :  { %1902 = vmatpush3.bf16.msra.mxu1 %v2104_v11  ;;  %1875 = vmatprep.subr.bf16.mxu0 %v2105_v12  ;;  %v1691_v38 = vcombine.low %v28_v34, %v36_v37  ;;  %v1692_v39 = vcombine.high %v28_v34, %v36_v37  ;;  %v2125_v40 = vld [vmem:[%s2730_s1 + $0x140] sm:$0xff]   ;;  %v2129_v44 = vld [vmem:[%s2730_s1 + $0x148] sm:$0xff]   ;;  %v2133_v48 = vld [vmem:[%s2730_s1 + $0x150] sm:$0xff]  }
   0xe   :  { %1903 = vmatprep.subr.bf16.mxu1 %v2106_v13  ;;  %1275 = vmatprep.mubr.bf16.mxu0 %v1690_v36  ;;  %v2126_v41 = vld [vmem:[%s2730_s1 + $0x1c0] sm:$0xff]   ;;  %v2130_v45 = vld [vmem:[%s2730_s1 + $0x1c8] sm:$0xff]   ;;  %v2134_v49 = vld [vmem:[%s2730_s1 + $0x1d0] sm:$0xff]  }
   0xf   :  { %1324 = vmatprep.mubr.bf16.mxu1 %v1692_v39  ;;  %v2127_v42 = vld [vmem:[%s2730_s1 + $0x100] sm:$0xff]   ;;  %v2131_v46 = vld [vmem:[%s2730_s1 + $0x108] sm:$0xff]   ;;  %v2135_v50 = vld [vmem:[%s2730_s1 + $0x110] sm:$0xff]  }
  0x10   :  { %1876 = vmatpush3.bf16.msra.mxu0 %v2107_v14  ;;  %v2128_v43 = vld [vmem:[%s2730_s1 + $0x180] sm:$0xff]   ;;  %v2132_v47 = vld [vmem:[%s2730_s1 + $0x188] sm:$0xff]   ;;  %v2136_v51 = vld [vmem:[%s2730_s1 + $0x190] sm:$0xff]  }
  0x11   :  { %1904 = vmatpush3.bf16.msra.mxu1 %v2108_v15  ;;  %1877 = vmatprep.subr.bf16.mxu0 %v2109_v16  ;;  %v2137_v52 = vld [vmem:[%s2730_s1 + $0x158] sm:$0xff]   ;;  %v2141_v56 = vld [vmem:[%s2730_s1 + $0x160] sm:$0xff]   ;;  %v2145_v60 = vld [vmem:[%s2730_s1 + $0x168] sm:$0xff]  }
  0x12   :  { %1905 = vmatprep.subr.bf16.mxu1 %v2110_v17  ;;  %v2138_v53 = vld [vmem:[%s2730_s1 + $0x1d8] sm:$0xff]   ;;  %v2142_v57 = vld [vmem:[%s2730_s1 + $0x1e0] sm:$0xff]   ;;  %v2146_v61 = vld [vmem:[%s2730_s1 + $0x1e8] sm:$0xff]  }
  0x13   :  { %v2139_v54 = vld [vmem:[%s2730_s1 + $0x118] sm:$0xff]   ;;  %v2143_v58 = vld [vmem:[%s2730_s1 + $0x120] sm:$0xff]   ;;  %v44_v1 = vld [vmem:[%s2731_s0 + $0x88] sm:$0xff] }
  0x14   :  { %1878 = vmatpush3.bf16.msra.mxu0 %v2111_v18  ;;  %v2140_v55 = vld [vmem:[%s2730_s1 + $0x198] sm:$0xff]   ;;  %v2144_v59 = vld [vmem:[%s2730_s1 + $0x1a0] sm:$0xff]   ;;  %v52_v2 = vld [vmem:[%s2731_s0 + $0xc8] sm:$0xff] }
  0x15   :  { %1906 = vmatpush3.bf16.msra.mxu1 %v2112_v19  ;;  %1879 = vmatprep.subr.bf16.mxu0 %v2113_v20  ;;  %v43_v62 = vld [vmem:[%s2731_s0 + $0x80] sm:$0xff]  ;;  %v1708_v4 = vcombine.high %v44_v1, %v52_v2  ;;  %v2147_v5 = vld [vmem:[%s2730_s1 + $0x128] sm:$0xff]   ;;  %v1707_v6 = vcombine.low %v44_v1, %v52_v2  ;;  %v2149_v8 = vld [vmem:[%s2730_s1 + $0x170] sm:$0xff]  }
  0x16   :  { %1907 = vmatprep.subr.bf16.mxu1 %v2114_v21  ;;  %v51_v63 = vld [vmem:[%s2731_s0 + $0xc0] sm:$0xff]  ;;  %v2148_v7 = vld [vmem:[%s2730_s1 + $0x1a8] sm:$0xff]   ;;  %v2150_v9 = vld [vmem:[%s2730_s1 + $0x1f0] sm:$0xff]  }
  0x17   :  { %v1706_v0 = vcombine.high %v43_v62, %v51_v63  ;;  %v1705_v3 = vcombine.low %v43_v62, %v51_v63  ;;  %v2151_v10 = vld [vmem:[%s2730_s1 + $0x130] sm:$0xff]   ;;  %v2153_v12 = vld [vmem:[%s2730_s1 + $0x178] sm:$0xff]   ;;  %v39_v1 = vld [vmem:[%s2731_s0 + $0x60] sm:$0xff] }
  0x18   :  { %1880 = vmatpush3.bf16.msra.mxu0 %v2115_v22  ;;  %v2152_v11 = vld [vmem:[%s2730_s1 + $0x1b0] sm:$0xff]   ;;  %v2154_v13 = vld [vmem:[%s2730_s1 + $0x1f8] sm:$0xff]  }
  0x19   :  { %1908 = vmatpush3.bf16.msra.mxu1 %v2116_v23  ;;  %1881 = vmatprep.subr.bf16.mxu0 %v2117_v24  ;;  %v2155_v14 = vld [vmem:[%s2730_s1 + $0x138] sm:$0xff]   ;;  %v29_v16 = vld [vmem:[%s2731_s0 + $0x10] sm:$0xff]  ;;  %v2157_v24 = vld [vmem:[%s2730_s1 + $0x240] sm:$0xff]  }
  0x1a   :  { %1909 = vmatprep.subr.bf16.mxu1 %v2118_v25  ;;  %v2156_v15 = vld [vmem:[%s2730_s1 + $0x1b8] sm:$0xff]   ;;  %v37_v17 = vld [vmem:[%s2731_s0 + $0x50] sm:$0xff]  ;;  %v2158_v25 = vld [vmem:[%s2730_s1 + $0x2c0] sm:$0xff]  }
  0x1b   :  { %v30_v18 = vld [vmem:[%s2731_s0 + $0x18] sm:$0xff]  ;;  %v1693_v20 = vcombine.low %v29_v16, %v37_v17  ;;  %v1694_v21 = vcombine.high %v29_v16, %v37_v17  ;;  %v45_v32 = vld [vmem:[%s2731_s0 + $0x90] sm:$0xff]  ;;  %v47_v16 = vld [vmem:[%s2731_s0 + $0xa0] sm:$0xff] }
  0x1c   :  { %1882 = vmatpush3.bf16.msra.mxu0 %v2119_v26  ;;  %v38_v19 = vld [vmem:[%s2731_s0 + $0x58] sm:$0xff]  ;;  %v2159_v26 = vld [vmem:[%s2730_s1 + $0x200] sm:$0xff]   ;;  %v53_v33 = vld [vmem:[%s2731_s0 + $0xd0] sm:$0xff] }
  0x1d   :  { %1910 = vmatpush3.bf16.msra.mxu1 %v2120_v27  ;;  %1883 = vmatprep.subr.bf16.mxu0 %v2121_v28  ;;  %v1695_v22 = vcombine.low %v30_v18, %v38_v19  ;;  %v1696_v23 = vcombine.high %v30_v18, %v38_v19  ;;  %v2160_v27 = vld [vmem:[%s2730_s1 + $0x280] sm:$0xff]   ;;  %v2161_v28 = vld [vmem:[%s2730_s1 + $0x248] sm:$0xff]   ;;  %v1710_v34 = vcombine.high %v45_v32, %v53_v33  ;;  %v2165_v36 = vld [vmem:[%s2730_s1 + $0x250] sm:$0xff]  }
  0x1e   :  { %1911 = vmatprep.subr.bf16.mxu1 %v2122_v29  ;;  %v2162_v29 = vld [vmem:[%s2730_s1 + $0x2c8] sm:$0xff]   ;;  %v2166_v37 = vld [vmem:[%s2730_s1 + $0x2d0] sm:$0xff]   ;;  %v54_v39 = vld [vmem:[%s2731_s0 + $0xd8] sm:$0xff] }
  0x1f   :  { %v2187_v62 = vld [vmem:[%s2730_s1 + $0x238] sm:$0xff]   ;;  %v55_v17 = vld [vmem:[%s2731_s0 + $0xe0] sm:$0xff] }
  0x20   :  { %1884 = vmatpush3.bf16.msra.mxu0 %v2123_v30  ;;  %v2163_v30 = vld [vmem:[%s2730_s1 + $0x208] sm:$0xff]   ;;  %v2188_v63 = vld [vmem:[%s2730_s1 + $0x2b8] sm:$0xff]   ;;  %v1714_v18 = vcombine.high %v47_v16, %v55_v17  ;;  %v1713_v19 = vcombine.low %v47_v16, %v55_v17 }
  0x21   :  { %1912 = vmatpush3.bf16.msra.mxu1 %v2124_v31  ;;  %1925 = vmatprep.subr.bf16.mxu0 %v2125_v40  ;;  %v2164_v31 = vld [vmem:[%s2730_s1 + $0x288] sm:$0xff]  }
  0x22   :  { %1953 = vmatprep.subr.bf16.mxu1 %v2126_v41  ;;  %v2167_v41 = vld [vmem:[%s2730_s1 + $0x210] sm:$0xff]  }
  0x23   :  { %1276 = vmatmul.mubr.bf16.vlgmr.msra.gmra.mrb[0].mxu0 %v1689_v35  ;;  %v1709_v35 = vcombine.low %v45_v32, %v53_v33  ;;  %v2205_v32 = vld [vmem:[%s2730_s1 + $0x360] sm:$0xff]  }
  0x24   :  { %1325 = vmatmul.mubr.bf16.vlgmr.msra.gmra.mrb[0].mxu1 %v1691_v38  ;;  %1926 = vmatpush3.bf16.msra.mxu0 %v2127_v42  ;;  %v46_v38 = vld [vmem:[%s2731_s0 + $0x98] sm:$0xff]  ;;  %v2206_v33 = vld [vmem:[%s2730_s1 + $0x3e0] sm:$0xff]  }
  0x25   :  { %1954 = vmatpush3.bf16.msra.mxu1 %v2128_v43  ;;  %1927 = vmatprep.subr.bf16.mxu0 %v2129_v44  ;;  %v1712_v40 = vcombine.high %v46_v38, %v54_v39  ;;  %v1711_v42 = vcombine.low %v46_v38, %v54_v39  ;;  %v2168_v43 = vld [vmem:[%s2730_s1 + $0x290] sm:$0xff]   ;;  %v2169_v44 = vld [vmem:[%s2730_s1 + $0x258] sm:$0xff]   ;;  %v2211_v38 = vld [vmem:[%s2730_s1 + $0x328] sm:$0xff]  }
  0x26   :  { %1955 = vmatprep.subr.bf16.mxu1 %v2130_v45  ;;  %1283 = vmatprep.mubr.bf16.mxu0 %v1706_v0  ;;  %v2170_v45 = vld [vmem:[%s2730_s1 + $0x2d8] sm:$0xff]   ;;  %v31_v0 = vld [vmem:[%s2731_s0 + $0x20] sm:$0xff]  ;;  %v2212_v39 = vld [vmem:[%s2730_s1 + $0x3a8] sm:$0xff]  }
  0x27   :  { %1332 = vmatprep.mubr.bf16.mxu1 %v1708_v4  ;;  %v1697_v2 = vcombine.low %v31_v0, %v39_v1  ;;  %v32_v4 = vld [vmem:[%s2731_s0 + $0x28] sm:$0xff] }
  0x28   :  { %1928 = vmatpush3.bf16.msra.mxu0 %v2131_v46  ;;  %v2171_v46 = vld [vmem:[%s2730_s1 + $0x218] sm:$0xff]  }
  0x29   :  { %1956 = vmatpush3.bf16.msra.mxu1 %v2132_v47  ;;  %1929 = vmatprep.subr.bf16.mxu0 %v2133_v48  ;;  %v2172_v47 = vld [vmem:[%s2730_s1 + $0x298] sm:$0xff]   ;;  %v2173_v48 = vld [vmem:[%s2730_s1 + $0x260] sm:$0xff]  }
  0x2a   :  { %1957 = vmatprep.subr.bf16.mxu1 %v2134_v49  ;;  %v2174_v49 = vld [vmem:[%s2730_s1 + $0x2e0] sm:$0xff]  }
  0x2b   :  { %1284 = vmatmul.mubr.bf16.gmra.mrb[4].mxu0 %v1705_v3  ;;  %v1698_v3 = vcombine.high %v31_v0, %v39_v1 }
  0x2c   :  { %1930 = vmatpush3.bf16.msra.mxu0 %v2135_v50  ;;  %1333 = vmatmul.mubr.bf16.gmra.mrb[4].mxu1 %v1707_v6  ;;  %v2175_v50 = vld [vmem:[%s2730_s1 + $0x220] sm:$0xff]  }
  0x2d   :  { %1958 = vmatpush3.bf16.msra.mxu1 %v2136_v51  ;;  %1931 = vmatprep.subr.bf16.mxu0 %v2137_v52  ;;  %v2176_v51 = vld [vmem:[%s2730_s1 + $0x2a0] sm:$0xff]   ;;  %v2177_v52 = vld [vmem:[%s2730_s1 + $0x268] sm:$0xff]  }
  0x2e   :  { %1959 = vmatprep.subr.bf16.mxu1 %v2138_v53  ;;  %1373 = vmatprep.mubr.bf16.mxu0 %v1694_v21  ;;  %v2178_v53 = vld [vmem:[%s2730_s1 + $0x2e8] sm:$0xff]   ;;  %v2198_v21 = vld [vmem:[%s2730_s1 + $0x3d0] sm:$0xff]  }
  0x2f   :  { %1422 = vmatprep.mubr.bf16.mxu1 %v1696_v23  ;;  %v56_v23 = vld [vmem:[%s2731_s0 + $0xe8] sm:$0xff] }
  0x30   :  { %1932 = vmatpush3.bf16.msra.mxu0 %v2139_v54  ;;  %v2179_v54 = vld [vmem:[%s2730_s1 + $0x228] sm:$0xff]  }
  0x31   :  { %1960 = vmatpush3.bf16.msra.mxu1 %v2140_v55  ;;  %1933 = vmatprep.subr.bf16.mxu0 %v2141_v56  ;;  %v2180_v55 = vld [vmem:[%s2730_s1 + $0x2a8] sm:$0xff]   ;;  %v2181_v56 = vld [vmem:[%s2730_s1 + $0x270] sm:$0xff]  }
  0x32   :  { %1961 = vmatprep.subr.bf16.mxu1 %v2142_v57  ;;  %v2182_v57 = vld [vmem:[%s2730_s1 + $0x2f0] sm:$0xff]  }
  0x34   :  { %1934 = vmatpush3.bf16.msra.mxu0 %v2143_v58  ;;  %v2183_v58 = vld [vmem:[%s2730_s1 + $0x230] sm:$0xff]  }
  0x35   :  { %1962 = vmatpush3.bf16.msra.mxu1 %v2144_v59  ;;  %1935 = vmatprep.subr.bf16.mxu0 %v2145_v60  ;;  %v2184_v59 = vld [vmem:[%s2730_s1 + $0x2b0] sm:$0xff]   ;;  %v2185_v60 = vld [vmem:[%s2730_s1 + $0x278] sm:$0xff]  }
  0x36   :  { %1963 = vmatprep.subr.bf16.mxu1 %v2146_v61  ;;  %v2186_v61 = vld [vmem:[%s2730_s1 + $0x2f8] sm:$0xff]  }
  0x38   :  { %1936 = vmatpush3.bf16.msra.mxu0 %v2147_v5  ;;  %v40_v5 = vld [vmem:[%s2731_s0 + $0x68] sm:$0xff] }
  0x39   :  { %1964 = vmatpush3.bf16.msra.mxu1 %v2148_v7  ;;  %1937 = vmatprep.subr.bf16.mxu0 %v2149_v8  ;;  %v1699_v6 = vcombine.low %v32_v4, %v40_v5  ;;  %v1700_v7 = vcombine.high %v32_v4, %v40_v5  ;;  %v2189_v8 = vld [vmem:[%s2730_s1 + $0x340] sm:$0xff]  }
  0x3a   :  { %1965 = vmatprep.subr.bf16.mxu1 %v2150_v9  ;;  %v2190_v9 = vld [vmem:[%s2730_s1 + $0x3c0] sm:$0xff]  }
  0x3c   :  { %1938 = vmatpush3.bf16.msra.mxu0 %v2151_v10  ;;  %v2191_v10 = vld [vmem:[%s2730_s1 + $0x300] sm:$0xff]  }
  0x3d   :  { %1966 = vmatpush3.bf16.msra.mxu1 %v2152_v11  ;;  %1939 = vmatprep.subr.bf16.mxu0 %v2153_v12  ;;  %v2192_v11 = vld [vmem:[%s2730_s1 + $0x380] sm:$0xff]   ;;  %v2193_v12 = vld [vmem:[%s2730_s1 + $0x348] sm:$0xff]  }
  0x3e   :  { %1967 = vmatprep.subr.bf16.mxu1 %v2154_v13  ;;  %v2194_v13 = vld [vmem:[%s2730_s1 + $0x3c8] sm:$0xff]  }
  0x40   :  { %1940 = vmatpush3.bf16.msra.mxu0 %v2155_v14  ;;  %v2195_v14 = vld [vmem:[%s2730_s1 + $0x308] sm:$0xff]  }
  0x41   :  { %1968 = vmatpush3.bf16.msra.mxu1 %v2156_v15  ;;  %1981 = vmatprep.subr.bf16.mxu0 %v2157_v24  ;;  %v2196_v15 = vld [vmem:[%s2730_s1 + $0x388] sm:$0xff]  }
  0x42   :  { %2009 = vmatprep.subr.bf16.mxu1 %v2158_v25  ;;  %v2199_v25 = vld [vmem:[%s2730_s1 + $0x310] sm:$0xff]  }
  0x43   :  { %1374 = vmatmul.mubr.bf16.vlgmr.msra.gmra.mrb[8].mxu0 %v1693_v20  ;;  %v2197_v20 = vld [vmem:[%s2730_s1 + $0x350] sm:$0xff]  }
  0x44   :  { %1423 = vmatmul.mubr.bf16.vlgmr.msra.gmra.mrb[8].mxu1 %v1695_v22  ;;  %1982 = vmatpush3.bf16.msra.mxu0 %v2159_v26  ;;  %v48_v22 = vld [vmem:[%s2731_s0 + $0xa8] sm:$0xff] }
  0x45   :  { %2010 = vmatpush3.bf16.msra.mxu1 %v2160_v27  ;;  %1983 = vmatprep.subr.bf16.mxu0 %v2161_v28  ;;  %v1716_v24 = vcombine.high %v48_v22, %v56_v23  ;;  %v1715_v26 = vcombine.low %v48_v22, %v56_v23  ;;  %v2200_v27 = vld [vmem:[%s2730_s1 + $0x390] sm:$0xff]   ;;  %v2201_v28 = vld [vmem:[%s2730_s1 + $0x358] sm:$0xff]  }
  0x46   :  { %2011 = vmatprep.subr.bf16.mxu1 %v2162_v29  ;;  %1381 = vmatprep.mubr.bf16.mxu0 %v1710_v34  ;;  %v2202_v29 = vld [vmem:[%s2730_s1 + $0x3d8] sm:$0xff]   ;;  %v2207_v34 = vld [vmem:[%s2730_s1 + $0x320] sm:$0xff]  }
  0x47   :  { %1430 = vmatprep.mubr.bf16.mxu1 %v1712_v40  ;;  %v2213_v40 = vld [vmem:[%s2730_s1 + $0x370] sm:$0xff]  }
  0x48   :  { %1984 = vmatpush3.bf16.msra.mxu0 %v2163_v30  ;;  %v2203_v30 = vld [vmem:[%s2730_s1 + $0x318] sm:$0xff]  }
  0x49   :  { %2012 = vmatpush3.bf16.msra.mxu1 %v2164_v31  ;;  %1985 = vmatprep.subr.bf16.mxu0 %v2165_v36  ;;  %v2204_v31 = vld [vmem:[%s2730_s1 + $0x398] sm:$0xff]   ;;  %v2209_v36 = vld [vmem:[%s2730_s1 + $0x368] sm:$0xff]  }
  0x4a   :  { %2013 = vmatprep.subr.bf16.mxu1 %v2166_v37  ;;  %v2210_v37 = vld [vmem:[%s2730_s1 + $0x3e8] sm:$0xff]  }
  0x4b   :  { %1382 = vmatmul.mubr.bf16.gmra.mrb[12].mxu0 %v1709_v35  ;;  %v2208_v35 = vld [vmem:[%s2730_s1 + $0x3a0] sm:$0xff]  }
  0x4c   :  { %1986 = vmatpush3.bf16.msra.mxu0 %v2167_v41  ;;  %1431 = vmatmul.mubr.bf16.gmra.mrb[12].mxu1 %v1711_v42  ;;  %v2214_v41 = vld [vmem:[%s2730_s1 + $0x3f0] sm:$0xff]  }
  0x4d   :  { %2014 = vmatpush3.bf16.msra.mxu1 %v2168_v43  ;;  %1987 = vmatprep.subr.bf16.mxu0 %v2169_v44  ;;  %v2215_v42 = vld [vmem:[%s2730_s1 + $0x330] sm:$0xff]   ;;  %v2217_v44 = vld [vmem:[%s2730_s1 + $0x378] sm:$0xff]  }
  0x4e   :  { %2015 = vmatprep.subr.bf16.mxu1 %v2170_v45  ;;  %1471 = vmatprep.mubr.bf16.mxu0 %v1698_v3  ;;  %v2216_v43 = vld [vmem:[%s2730_s1 + $0x3b0] sm:$0xff]   ;;  %v2218_v45 = vld [vmem:[%s2730_s1 + $0x3f8] sm:$0xff]  }
  0x4f   :  { %1520 = vmatprep.mubr.bf16.mxu1 %v1700_v7 }
  0x50   :  { %1988 = vmatpush3.bf16.msra.mxu0 %v2171_v46  ;;  %v2219_v46 = vld [vmem:[%s2730_s1 + $0x338] sm:$0xff]  }
  0x51   :  { %2016 = vmatpush3.bf16.msra.mxu1 %v2172_v47  ;;  %1989 = vmatprep.subr.bf16.mxu0 %v2173_v48  ;;  %v2220_v47 = vld [vmem:[%s2730_s1 + $0x3b8] sm:$0xff]   ;;  %v33_v48 = vld [vmem:[%s2731_s0 + $0x30] sm:$0xff] }
  0x52   :  { %2017 = vmatprep.subr.bf16.mxu1 %v2174_v49  ;;  %v41_v49 = vld [vmem:[%s2731_s0 + $0x70] sm:$0xff] }
  0x54   :  { %1990 = vmatpush3.bf16.msra.mxu0 %v2175_v50  ;;  %v34_v50 = vld [vmem:[%s2731_s0 + $0x38] sm:$0xff] }
  0x55   :  { %2018 = vmatpush3.bf16.msra.mxu1 %v2176_v51  ;;  %1991 = vmatprep.subr.bf16.mxu0 %v2177_v52  ;;  %v1701_v51 = vcombine.low %v33_v48, %v41_v49  ;;  %v1702_v52 = vcombine.high %v33_v48, %v41_v49 }
  0x56   :  { %2019 = vmatprep.subr.bf16.mxu1 %v2178_v53  ;;  %v42_v53 = vld [vmem:[%s2731_s0 + $0x78] sm:$0xff] }
  0x58   :  { %1992 = vmatpush3.bf16.msra.mxu0 %v2179_v54  ;;  %v49_v54 = vld [vmem:[%s2731_s0 + $0xb0] sm:$0xff] }
  0x59   :  { %2020 = vmatpush3.bf16.msra.mxu1 %v2180_v55  ;;  %1993 = vmatprep.subr.bf16.mxu0 %v2181_v56  ;;  %v57_v55 = vld [vmem:[%s2731_s0 + $0xf0] sm:$0xff]  ;;  %v1703_v56 = vcombine.low %v34_v50, %v42_v53 }
  0x5a   :  { %2021 = vmatprep.subr.bf16.mxu1 %v2182_v57  ;;  %v1704_v57 = vcombine.high %v34_v50, %v42_v53 }
  0x5c   :  { %1994 = vmatpush3.bf16.msra.mxu0 %v2183_v58  ;;  %v1718_v58 = vcombine.high %v49_v54, %v57_v55 }
  0x5d   :  { %2022 = vmatpush3.bf16.msra.mxu1 %v2184_v59  ;;  %1995 = vmatprep.subr.bf16.mxu0 %v2185_v60  ;;  %v50_v59 = vld [vmem:[%s2731_s0 + $0xb8] sm:$0xff] }
  0x5e   :  { %2023 = vmatprep.subr.bf16.mxu1 %v2186_v61  ;;  %v58_v60 = vld [vmem:[%s2731_s0 + $0xf8] sm:$0xff] }
  0x5f   :  { %v1720_v61 = vcombine.high %v50_v59, %v58_v60 }
  0x60   :  { %1996 = vmatpush3.bf16.msra.mxu0 %v2187_v62  ;;  %v1717_v62 = vcombine.low %v49_v54, %v57_v55 }
  0x61   :  { %2024 = vmatpush3.bf16.msra.mxu1 %v2188_v63  ;;  %2037 = vmatprep.subr.bf16.mxu0 %v2189_v8  ;;  %v1719_v63 = vcombine.low %v50_v59, %v58_v60 }
  0x62   :  { %2065 = vmatprep.subr.bf16.mxu1 %v2190_v9 }
  0x63   :  { %1472 = vmatmul.mubr.bf16.vlgmr.msra.gmra.mrb[16].mxu0 %v1697_v2 }
  0x64   :  { %1521 = vmatmul.mubr.bf16.vlgmr.msra.gmra.mrb[16].mxu1 %v1699_v6  ;;  %2038 = vmatpush3.bf16.msra.mxu0 %v2191_v10 }
  0x65   :  { %2066 = vmatpush3.bf16.msra.mxu1 %v2192_v11  ;;  %2039 = vmatprep.subr.bf16.mxu0 %v2193_v12 }
  0x66   :  { %2067 = vmatprep.subr.bf16.mxu1 %v2194_v13  ;;  %1479 = vmatprep.mubr.bf16.mxu0 %v1714_v18 }
  0x67   :  { %1528 = vmatprep.mubr.bf16.mxu1 %v1716_v24 }
  0x68   :  { %2040 = vmatpush3.bf16.msra.mxu0 %v2195_v14 }
  0x69   :  { %2068 = vmatpush3.bf16.msra.mxu1 %v2196_v15  ;;  %2041 = vmatprep.subr.bf16.mxu0 %v2197_v20 }
  0x6a   :  { %2069 = vmatprep.subr.bf16.mxu1 %v2198_v21 }
  0x6b   :  { %1480 = vmatmul.mubr.bf16.gmra.mrb[20].mxu0 %v1713_v19 }
  0x6c   :  { %2042 = vmatpush3.bf16.msra.mxu0 %v2199_v25  ;;  %1529 = vmatmul.mubr.bf16.gmra.mrb[20].mxu1 %v1715_v26 }
  0x6d   :  { %2070 = vmatpush3.bf16.msra.mxu1 %v2200_v27  ;;  %2043 = vmatprep.subr.bf16.mxu0 %v2201_v28 }
  0x6e   :  { %2071 = vmatprep.subr.bf16.mxu1 %v2202_v29  ;;  %1569 = vmatprep.mubr.bf16.mxu0 %v1702_v52 }
  0x6f   :  { %1618 = vmatprep.mubr.bf16.mxu1 %v1704_v57 }
  0x70   :  { %2044 = vmatpush3.bf16.msra.mxu0 %v2203_v30 }
  0x71   :  { %2072 = vmatpush3.bf16.msra.mxu1 %v2204_v31  ;;  %2045 = vmatprep.subr.bf16.mxu0 %v2205_v32 }
  0x72   :  { %2073 = vmatprep.subr.bf16.mxu1 %v2206_v33 }
  0x74   :  { %2046 = vmatpush3.bf16.msra.mxu0 %v2207_v34 }
  0x75   :  { %2074 = vmatpush3.bf16.msra.mxu1 %v2208_v35  ;;  %2047 = vmatprep.subr.bf16.mxu0 %v2209_v36 }
  0x76   :  { %2075 = vmatprep.subr.bf16.mxu1 %v2210_v37 }
  0x78   :  { %2048 = vmatpush3.bf16.msra.mxu0 %v2211_v38 }
  0x79   :  { %2076 = vmatpush3.bf16.msra.mxu1 %v2212_v39  ;;  %2049 = vmatprep.subr.bf16.mxu0 %v2213_v40 }
  0x7a   :  { %2077 = vmatprep.subr.bf16.mxu1 %v2214_v41 }
  0x7c   :  { %2050 = vmatpush3.bf16.msra.mxu0 %v2215_v42 }
  0x7d   :  { %2078 = vmatpush3.bf16.msra.mxu1 %v2216_v43  ;;  %2051 = vmatprep.subr.bf16.mxu0 %v2217_v44 }
  0x7e   :  { %2079 = vmatprep.subr.bf16.mxu1 %v2218_v45 }
  0x80   :  { %2052 = vmatpush3.bf16.msra.mxu0 %v2219_v46 }
  0x81   :  { %2080 = vmatpush3.bf16.msra.mxu1 %v2220_v47 }
  0x83   :  { %1570 = vmatmul.mubr.bf16.vlgmr.msra.gmra.mrb[24].mxu0 %v1701_v51 }
  0x84   :  { %1619 = vmatmul.mubr.bf16.vlgmr.msra.gmra.mrb[24].mxu1 %v1703_v56  ;;  %1577 = vmatprep.mubr.bf16.mxu0 %v1718_v58 }
  0x85   :  { %1626 = vmatprep.mubr.bf16.mxu1 %v1720_v61 }
  0x8b   :  { %1578 = vmatmul.mubr.bf16.gmra.mrb[28].mxu0 %v1717_v62 }
  0x8c   :  { %1627 = vmatmul.mubr.bf16.gmra.mrb[28].mxu1 %v1719_v63 }
  0xf6   :  { %v1885_v0 = vpop.f32.mrb[0].mxu0 }
  0xf7   :  { %v1913_v1 = vpop.f32.mrb[0].mxu1  ;;  %v1886_v2 = vpop.f32.mrb[1].mxu0 }
  0xf8   :  { %v1887_v3 = vadd.f32 %v1886_v2, %v1885_v0  ;;  %v1914_v4 = vpop.f32.mrb[1].mxu1  ;;  %v1888_v5 = vpop.f32.mrb[2].mxu0 }
  0xf9   :  { %v1915_v6 = vadd.f32 %v1914_v4, %v1913_v1  ;;  %v1916_v7 = vpop.f32.mrb[2].mxu1  ;;  %v1889_v8 = vpop.f32.mrb[3].mxu0 }
  0xfa   :  { %v1890_v9 = vadd.f32 %v1889_v8, %v1888_v5  ;;  %v1917_v10 = vpop.f32.mrb[3].mxu1 }
  0xfb   :  { %v1327_v11 = vadd.f32 %v1915_v6, %v1887_v3  ;;  %v1918_v12 = vadd.f32 %v1917_v10, %v1916_v7 }
  0xfd   :  { %v1330_v13 = vadd.f32 %v1918_v12, %v1890_v9 }
  0xfe   :  { %v1891_v14 = vpop.f32.mrb[4].mxu0 }
  0xff   :  { %v1919_v15 = vpop.f32.mrb[4].mxu1  ;;  %v1892_v16 = vpop.f32.mrb[5].mxu0 }
 0x100   :  { %v1893_v17 = vadd.f32 %v1892_v16, %v1891_v14  ;;  %v1920_v18 = vpop.f32.mrb[5].mxu1  ;;  %v1894_v19 = vpop.f32.mrb[6].mxu0 }
 0x101   :  { %v1921_v20 = vadd.f32 %v1920_v18, %v1919_v15  ;;  %v1922_v21 = vpop.f32.mrb[6].mxu1  ;;  %v1895_v22 = vpop.f32.mrb[7].mxu0 }
 0x102   :  { %v1896_v23 = vadd.f32 %v1895_v22, %v1894_v19  ;;  %v1923_v24 = vpop.f32.mrb[7].mxu1 }
 0x103   :  { %v1335_v25 = vadd.f32 %v1921_v20, %v1893_v17  ;;  %v1924_v26 = vadd.f32 %v1923_v24, %v1922_v21 }
 0x105   :  { %v1338_v27 = vadd.f32 %v1924_v26, %v1896_v23 }
 0x116   :  { %v1941_v28 = vpop.f32.mrb[8].mxu0 }
 0x117   :  { %v1969_v29 = vpop.f32.mrb[8].mxu1  ;;  %v1942_v30 = vpop.f32.mrb[9].mxu0 }
 0x118   :  { %v1970_v31 = vpop.f32.mrb[9].mxu1  ;;  %v1943_v32 = vadd.f32 %v1942_v30, %v1941_v28  ;;  %v1944_v34 = vpop.f32.mrb[10].mxu0 }
 0x119   :  { %v1971_v33 = vadd.f32 %v1970_v31, %v1969_v29  ;;  %v1972_v35 = vpop.f32.mrb[10].mxu1  ;;  %v1945_v36 = vpop.f32.mrb[11].mxu0 }
 0x11a   :  { %v1973_v37 = vpop.f32.mrb[11].mxu1  ;;  %v1376_v38 = vadd.f32 %v1943_v32, %v1327_v11  ;;  %v1946_v39 = vadd.f32 %v1945_v36, %v1944_v34 }
 0x11b   :  { %v1974_v40 = vadd.f32 %v1973_v37, %v1972_v35 }
 0x11c   :  { %v1425_v41 = vadd.f32 %v1971_v33, %v1376_v38  ;;  %v1379_v42 = vadd.f32 %v1946_v39, %v1330_v13 }
 0x11e   :  { %v1428_v43 = vadd.f32 %v1974_v40, %v1379_v42  ;;  %v1947_v44 = vpop.f32.mrb[12].mxu0  ;;  %v1849_v40 = vld [vmem:[%s2732_s2] ss:$0 sm:$0xff] }
 0x11f   :  { %v1948_v45 = vpop.f32.mrb[13].mxu0  ;;  %v1975_v50 = vpop.f32.mrb[12].mxu1 }
 0x120   :  { %v1949_v46 = vadd.f32 %v1948_v45, %v1947_v44  ;;  %v1950_v47 = vpop.f32.mrb[14].mxu0  ;;  %v1976_v52 = vpop.f32.mrb[13].mxu1 }
 0x121   :  { %v1951_v48 = vpop.f32.mrb[15].mxu0  ;;  %v1977_v54 = vadd.f32 %v1976_v52, %v1975_v50  ;;  %v1978_v55 = vpop.f32.mrb[14].mxu1 }
 0x122   :  { %v1384_v49 = vadd.f32 %v1949_v46, %v1335_v25  ;;  %v1952_v51 = vadd.f32 %v1951_v48, %v1950_v47  ;;  %v1979_v56 = vpop.f32.mrb[15].mxu1 }
 0x123   :  { %v1980_v58 = vadd.f32 %v1979_v56, %v1978_v55 }
 0x124   :  { %v1387_v53 = vadd.f32 %v1952_v51, %v1338_v27  ;;  %v1433_v57 = vadd.f32 %v1977_v54, %v1384_v49 }
 0x126   :  { %v1436_v59 = vadd.f32 %v1980_v58, %v1387_v53 }
 0x136   :  { %v1997_v60 = vpop.f32.mrb[16].mxu0 }
 0x137   :  { %v2025_v61 = vpop.f32.mrb[16].mxu1  ;;  %v1998_v62 = vpop.f32.mrb[17].mxu0 }
 0x138   :  { %v1999_v63 = vadd.f32 %v1998_v62, %v1997_v60  ;;  %v2026_v0 = vpop.f32.mrb[17].mxu1  ;;  %v2000_v1 = vpop.f32.mrb[18].mxu0 }
 0x139   :  { %v2027_v2 = vadd.f32 %v2026_v0, %v2025_v61  ;;  %v2028_v3 = vpop.f32.mrb[18].mxu1  ;;  %v2001_v4 = vpop.f32.mrb[19].mxu0 }
 0x13a   :  { %v1474_v5 = vadd.f32 %v1999_v63, %v1425_v41  ;;  %v2002_v6 = vadd.f32 %v2001_v4, %v2000_v1  ;;  %v2029_v7 = vpop.f32.mrb[19].mxu1 }
 0x13b   :  { %v2030_v8 = vadd.f32 %v2029_v7, %v2028_v3 }
 0x13c   :  { %v1523_v9 = vadd.f32 %v2027_v2, %v1474_v5  ;;  %v1477_v10 = vadd.f32 %v2002_v6, %v1428_v43 }
 0x13e   :  { %v1526_v11 = vadd.f32 %v2030_v8, %v1477_v10  ;;  %v2003_v12 = vpop.f32.mrb[20].mxu0 }
 0x13f   :  { %v2004_v13 = vpop.f32.mrb[21].mxu0  ;;  %v2031_v16 = vpop.f32.mrb[20].mxu1 }
 0x140   :  { %v2005_v14 = vadd.f32 %v2004_v13, %v2003_v12  ;;  %v2006_v15 = vpop.f32.mrb[22].mxu0  ;;  %v2032_v20 = vpop.f32.mrb[21].mxu1 }
 0x141   :  { %v2007_v17 = vpop.f32.mrb[23].mxu0  ;;  %v2033_v21 = vadd.f32 %v2032_v20, %v2031_v16  ;;  %v2034_v22 = vpop.f32.mrb[22].mxu1 }
 0x142   :  { %v1482_v18 = vadd.f32 %v2005_v14, %v1433_v57  ;;  %v2008_v19 = vadd.f32 %v2007_v17, %v2006_v15  ;;  %v2035_v24 = vpop.f32.mrb[23].mxu1 }
 0x143   :  { %v2036_v26 = vadd.f32 %v2035_v24, %v2034_v22 }
 0x144   :  { %v1485_v23 = vadd.f32 %v2008_v19, %v1436_v59  ;;  %v1531_v25 = vadd.f32 %v2033_v21, %v1482_v18 }
 0x146   :  { %v1534_v27 = vadd.f32 %v2036_v26, %v1485_v23 }
 0x156   :  { %v2053_v28 = vpop.f32.mrb[24].mxu0 }
 0x157   :  { %v2081_v29 = vpop.f32.mrb[24].mxu1  ;;  %v2054_v30 = vpop.f32.mrb[25].mxu0 }
 0x158   :  { %v2055_v31 = vadd.f32 %v2054_v30, %v2053_v28  ;;  %v2082_v32 = vpop.f32.mrb[25].mxu1  ;;  %v2056_v33 = vpop.f32.mrb[26].mxu0 }
 0x159   :  { %v2083_v34 = vadd.f32 %v2082_v32, %v2081_v29  ;;  %v2084_v35 = vpop.f32.mrb[26].mxu1  ;;  %v2057_v36 = vpop.f32.mrb[27].mxu0 }
 0x15a   :  { %v1572_v37 = vadd.f32 %v2055_v31, %v1523_v9  ;;  %v2058_v38 = vadd.f32 %v2057_v36, %v2056_v33  ;;  %v2085_v39 = vpop.f32.mrb[27].mxu1 }
 0x15b   :  { %v2086_v41 = vadd.f32 %v2085_v39, %v2084_v35 }
 0x15c   :  { %v1621_v42 = vadd.f32 %v2083_v34, %v1572_v37  ;;  %v1575_v43 = vadd.f32 %v2058_v38, %v1526_v11 }
 0x15e   :  { %v1657_v44 = vadd.f32 %v1849_v40, %v1621_v42  ;;  %v1624_v45 = vadd.f32 %v2086_v41, %v1575_v43  ;;  %v2059_v46 = vpop.f32.mrb[28].mxu0 }
 0x15f   :  { %v2087_v47 = vpop.f32.mrb[28].mxu1  ;;  %v2060_v48 = vpop.f32.mrb[29].mxu0 }
 0x160   :  { %v1658_v49 = vadd.f32 %v1849_v40, %v1624_v45  ;;  %v2061_v50 = vadd.f32 %v2060_v48, %v2059_v46  ;;  %v2088_v51 = vpop.f32.mrb[29].mxu1  ;;  %v2062_v52 = vpop.f32.mrb[30].mxu0  ;;  %v1661_v56 = vmax.f32 %v1657_v44, 0.0 }
 0x161   :  { %v2089_v53 = vadd.f32 %v2088_v51, %v2087_v47  ;;  %v2090_v54 = vpop.f32.mrb[30].mxu1  ;;  %v2063_v55 = vpop.f32.mrb[31].mxu0 }
 0x162   :  { %v1662_v57 = vmax.f32 %v1658_v49, 0.0  ;;  %v1580_v58 = vadd.f32 %v2061_v50, %v1531_v25  ;;  %v2064_v59 = vadd.f32 %v2063_v55, %v2062_v52  ;;  %v2091_v60 = vpop.f32.mrb[31].mxu1 }
 0x163   :  { %v2092_v61 = vadd.f32 %v2091_v60, %v2090_v54 }
 0x164   :  { %v1861_v62 = vpack.c.bf16 %v1662_v57, %v1661_v56  ;;  %v1629_v63 = vadd.f32 %v2089_v53, %v1580_v58  ;;  %v1583_v0 = vadd.f32 %v2064_v59, %v1534_v27 }
 0x166   :  { %1862 = vst [vmem:[%s2733_s3] sm:$0xff] %v1861_v62   ;;  %v1659_v1 = vadd.f32 %v1849_v40, %v1629_v63  ;;  %v1632_v2 = vadd.f32 %v2092_v61, %v1583_v0 }
 0x168   :  { %v1660_v3 = vadd.f32 %v1849_v40, %v1632_v2  ;;  %v1663_v4 = vmax.f32 %v1659_v1, 0.0 }
 0x16a   :  { %v1664_v5 = vmax.f32 %v1660_v3, 0.0 }
 0x16c   :  { %v1866_v6 = vpack.c.bf16 %v1664_v5, %v1663_v4 }
 0x16e   :  { %1868 = vst [vmem:[%s2733_s3 + $0x8] sm:$0xff] %v1866_v6  }

// kernel: _lambda_.19
= control target key start
LH: loop header
LB: loop body
LE: loop exit
PB: predicated region body
PF: predicated region fallthrough
CT: control target
= control target key end

     0   :  { %v188_v10 = vlaneseq  ;;  %s396_s1 = inlined_call_operand.vmem [shape: bf16[128,128], index: 1, kind: input, shape index: {}]   ;;  %s397_s0 = inlined_call_operand.vmem [shape: bf16[32,128], index: 0, kind: input, shape index: {}]   ;;  %s398_s2 = inlined_call_operand.vmem [shape: f32[1,128], index: 2, kind: input, shape index: {}]   ;;  %s399_s3 = inlined_call_operand.vmem [shape: f32[32,128], index: 3, kind: output, shape index: {0}]   ;;  %s400_s4 = inlined_call_operand.vmem [shape: f32[32,128], index: 4, kind: output, shape index: {1}]  }
   0x1   :  { %v284_v0 = vld [vmem:[%s396_s1] sm:$0xff]   ;;  %v285_v1 = vld [vmem:[%s396_s1 + $0x8] sm:$0xff]   ;;  %v286_v2 = vld [vmem:[%s396_s1 + $0x10] sm:$0xff]  }
   0x2   :  { %264 = vmatprep.subr.bf16.mxu0 %v284_v0  ;;  %v287_v3 = vld [vmem:[%s396_s1 + $0x18] sm:$0xff]   ;;  %v292_v4 = vld [vmem:[%s397_s0] sm:$0xff]   ;;  %v289_v6 = vld [vmem:[%s396_s1 + $0x28] sm:$0xff]   ;;  %v189_v11 = vand.u32 127, %v188_v10 }
   0x3   :  { %265 = vmatpush3.bf16.msra.mxu0 %v284_v0  ;;  %280 = vmatprep.mubr.bf16.mxu0 %v292_v4  ;;  %v288_v5 = vld [vmem:[%s396_s1 + $0x20] sm:$0xff]   ;;  %v290_v7 = vld [vmem:[%s396_s1 + $0x30] sm:$0xff]   ;;  %v291_v8 = vld [vmem:[%s396_s1 + $0x38] sm:$0xff]  }
   0x4   :  { %266 = vmatprep.subr.bf16.mxu0 %v285_v1  ;;  %v293_v9 = vld [vmem:[%s397_s0 + $0x8] sm:$0xff]   ;;  %v253_v12 = vld [vmem:[%s398_s2] ss:$0 sm:$0xff]  ;;  %vm190_vm0 = vcmp.lt.s32.totalorder %v189_v11, 2 }
   0x7   :  { %267 = vmatpush3.bf16.msra.mxu0 %v285_v1 }
   0x8   :  { %268 = vmatprep.subr.bf16.mxu0 %v286_v2 }
   0xb   :  { %269 = vmatpush3.bf16.msra.mxu0 %v286_v2 }
   0xc   :  { %270 = vmatprep.subr.bf16.mxu0 %v287_v3 }
   0xf   :  { %271 = vmatpush3.bf16.msra.mxu0 %v287_v3 }
  0x10   :  { %272 = vmatprep.subr.bf16.mxu0 %v288_v5 }
  0x13   :  { %273 = vmatpush3.bf16.msra.mxu0 %v288_v5 }
  0x14   :  { %274 = vmatprep.subr.bf16.mxu0 %v289_v6 }
  0x17   :  { %275 = vmatpush3.bf16.msra.mxu0 %v289_v6 }
  0x18   :  { %276 = vmatprep.subr.bf16.mxu0 %v290_v7 }
  0x1b   :  { %277 = vmatpush3.bf16.msra.mxu0 %v290_v7 }
  0x1c   :  { %278 = vmatprep.subr.bf16.mxu0 %v291_v8 }
  0x1f   :  { %279 = vmatpush3.bf16.msra.mxu0 %v291_v8 }
  0x22   :  { %281 = vmatmul.mubr.bf16.vlgmr.msra.gmra.mrb[0].mxu0 %v293_v9 }
  0xf5   :  { %v282_v13 = vpop.f32.mrb[0].mxu0 }
  0xf6   :  { %v182_v14 = vadd.f32 %v282_v13, %v253_v12  ;;  %v143_v15 = vpop.f32.mrb[1].mxu0 }
  0xf7   :  { %v180_v16 = vadd.f32 %v253_v12, %v143_v15  ;;  %v283_v17 = vpop.f32.mrb[2].mxu0 }
  0xf8   :  { %186 = vst [vmem:[%s399_s3 + $0x10] sm:$0xff] %v182_v14  ;;  %v183_v18 = vadd.f32 %v283_v17, %v253_v12  ;;  %v146_v19 = vpop.f32.mrb[3].mxu0  ;;  %v193_v20 = vsel %vm190_vm0, %v182_v14, -inf }
  0xf9   :  { %184 = vst [vmem:[%s399_s3] sm:$0xff] %v180_v16  ;;  %v181_v21 = vadd.f32 %v253_v12, %v146_v19  ;;  %199 = vmax.xlane.f32.xlu1 %v193_v20  ;;  %v191_v22 = vsel %vm190_vm0, %v180_v16, -inf }
  0xfa   :  { %187 = vst [vmem:[%s399_s3 + $0x18] sm:$0xff] %v183_v18  ;;  %195 = vmax.xlane.f32.xlu0 %v191_v22  ;;  %v194_v23 = vsel %vm190_vm0, %v183_v18, -inf }
  0xfb   :  { %185 = vst [vmem:[%s399_s3 + $0x8] sm:$0xff] %v181_v21  ;;  %v192_v24 = vsel %vm190_vm0, %v181_v21, -inf }
  0xfd   :  { %201 = vmax.xlane.f32.xlu1 %v194_v23 }
  0xfe   :  { %197 = vmax.xlane.f32.xlu0 %v192_v24 }
 0x186   :  { %v200_v25 = vpop.xlane.xlu1 %199 }
 0x187   :  { %v205_v26 = vsub.f32 %v193_v20, %v200_v25  ;;  %v196_v27 = vpop.xlane.xlu0 %195 }
 0x188   :  { %v203_v28 = vsub.f32 %v191_v22, %v196_v27 }
 0x189   :  { %v211_v31 = vmul.f32 1.442695, %v205_v26 }
 0x18a   :  { %v207_v29 = vmul.f32 1.442695, %v203_v28  ;;  %v202_v30 = vpop.xlane.xlu1 %201 }
 0x18b   :  { %v198_v32 = vpop.xlane.xlu0 %197  ;;  %v206_v33 = vsub.f32 %v194_v23, %v202_v30 }
 0x18c   :  { %294 = vpow2.f32 %v207_v29  ;;  %v204_v34 = vsub.f32 %v192_v24, %v198_v32 }
 0x18d   :  { %296 = vpow2.f32 %v211_v31  ;;  %v213_v36 = vmul.f32 1.442695, %v206_v33 }
 0x18e   :  { %v209_v35 = vmul.f32 1.442695, %v204_v34 }
 0x190   :  { %298 = vpow2.f32 %v209_v35 }
 0x191   :  { %300 = vpow2.f32 %v213_v36 }
 0x196   :  { %v295_v37 = vpop.eup %294 }
 0x197   :  { %215 = vadd.xlane.f32.xlu0 %v295_v37  ;;  %v297_v38 = vpop.eup %296 }
 0x19a   :  { %v299_v39 = vpop.eup %298 }
 0x19b   :  { %219 = vadd.xlane.f32.xlu0 %v297_v38  ;;  %217 = vadd.xlane.f32.xlu1 %v299_v39  ;;  %v301_v40 = vpop.eup %300 }
 0x19f   :  { %221 = vadd.xlane.f32.xlu1 %v301_v40 }
 0x224   :  { %v216_v41 = vpop.xlane.xlu0 %215 }
 0x225   :  { %302 = vrcp.f32 %v216_v41 }
 0x228   :  { %v218_v42 = vpop.xlane.xlu1 %217  ;;  %v220_v43 = vpop.xlane.xlu0 %219 }
 0x229   :  { %304 = vrcp.f32 %v218_v42 }
 0x22a   :  { %306 = vrcp.f32 %v220_v43 }
 0x22c   :  { %v222_v44 = vpop.xlane.xlu1 %221 }
 0x22d   :  { %308 = vrcp.f32 %v222_v44 }
 0x22f   :  { %v303_v45 = vpop.eup %302 }
 0x230   :  { %v227_v46 = vmul.f32 %v303_v45, %v295_v37 }
 0x232   :  { %231 = vst [vmem:[%s400_s4] sm:$0xff] %v227_v46 }
 0x233   :  { %v305_v47 = vpop.eup %304 }
 0x234   :  { %v307_v48 = vpop.eup %306  ;;  %v228_v49 = vmul.f32 %v305_v47, %v299_v39 }
 0x235   :  { %v229_v50 = vmul.f32 %v307_v48, %v297_v38 }
 0x236   :  { %232 = vst [vmem:[%s400_s4 + $0x8] sm:$0xff] %v228_v49 }
 0x237   :  { %v309_v51 = vpop.eup %308  ;;  %233 = vst [vmem:[%s400_s4 + $0x10] sm:$0xff] %v229_v50 }
 0x238   :  { %v230_v52 = vmul.f32 %v309_v51, %v301_v40 }
 0x23a   :  { %234 = vst [vmem:[%s400_s4 + $0x18] sm:$0xff] %v230_v52 }

// kernel: _lambda_.21
= control target key start
LH: loop header
LB: loop body
LE: loop exit
PB: predicated region body
PF: predicated region fallthrough
CT: control target
= control target key end

     0   :  { %vm46_vm0 = vcmask 1041408   ;;  %vm48_vm1 = vcmask 1042432   ;;  %s81_s0 = inlined_call_operand.vmem [shape: f32[4,128], index: 0, kind: input, shape index: {}]   ;;  %s82_s1 = inlined_call_operand.vmem [shape: f32[4,128], index: 1, kind: input, shape index: {}]   ;;  %s83_s2 = inlined_call_operand.vmem [shape: f32[4,128], index: 2, kind: output, shape index: {}]  }
   0x1   :  { %v11_v0 = vld [vmem:[%s81_s0] sm:$0xf] }
   0x2   :  { %v12_v1 = vld [vmem:[%s82_s1] sm:$0xf]  ;;  %v23_v3 = vmul.f32 0.2, %v11_v0  ;;  %v22_v9 = vmul.f32 0.1, %v11_v0 }
   0x3   :  { %v14_v2 = vrot.slane %v12_v1, 6 }
   0x4   :  { %v24_v4 = vmin.f32 %v23_v3, 4.1351666 }
   0x5   :  { %v16_v5 = vsub.f32 %v12_v1, %v14_v2 }
   0x6   :  { %v30_v6 = vmul.f32 1.442695, %v24_v4 }
   0x7   :  { %v17_v7 = vmul.f32 0.5, %v16_v5  ;;  %v26_v10 = vrot.slane %v16_v5, 2 }
   0x8   :  { %55 = vpow2.f32 %v30_v6 }
   0x9   :  { %v19_v8 = vrot.slane %v17_v7, 2  ;;  %v28_v12 = vmul.f32 %v26_v10, %v22_v9 }
   0xb   :  { %v21_v11 = vadd.f32 %v19_v8, %v12_v1 }
   0xd   :  { %v29_v15 = vadd.f32 %v28_v12, %v21_v11 }
  0x12   :  { %v56_v13 = vpop.eup %55 }
  0x13   :  { %v32_v14 = vmul.f32 %v56_v13, %v16_v5 }
  0x15   :  { %v33_v16 = vmul.f32 0.5, %v32_v14 }
  0x17   :  { %v35_v17 = vrot.slane %v33_v16, 2 }
  0x19   :  { %v37_v18 = vsub.f32 %v29_v15, %v35_v17  ;;  %v38_v19 = vadd.f32 %v35_v17, %v29_v15 }
  0x1b   :  { %v39_v20 = vmax.f32 %v37_v18, 0.0  ;;  %v41_v21 = vmax.f32 %v38_v19, 0.0 }
  0x1d   :  { %v40_v22 = vmin.f32 %v39_v20, 32.0  ;;  %v42_v23 = vmin.f32 %v41_v21, 32.0 }
  0x1f   :  { %v44_v24 = vrot.slane %v42_v23, 6 }
  0x21   :  { %v47_v25 = vsel %vm46_vm0, %v40_v22, %v44_v24 }
  0x22   :  { %v49_v26 = vsel %vm48_vm1, %v47_v25, %v44_v24 }
  0x23   :  { %50 = vst [vmem:[%s83_s2] sm:$0xf] %v49_v26 }

</bundles_post_ra>
